<compile_context>
chip_gen: v7x
topology: tpu7x:2x2x1
jax: 0.10.0
libtpu: 0.0.40
codegen_flags: <defaults>
</compile_context>

<pallas_src>
import functools

import jax
import jax.numpy as jnp
from jax.experimental import pallas as pl
from jax.experimental.pallas import tpu as pltpu

BN_EPS = 1e-5
LANES = 128


def _round_up(v, m):
    return (v + m - 1) // m * m


def _pick_tile_h(H, W, target_rows=4096):
    """Largest divisor of H whose tile (TILE_H * W flat rows) stays under target."""
    best = 1
    for th in range(1, H + 1):
        if H % th == 0 and th * W <= target_rows:
            best = th
    return best


def _vmem_limit_bytes():
    # Derive the scoped-VMEM budget from the actual chip (v7x only has 64 MiB
    # physical VMEM); leave headroom for double buffers and compiler temps.
    try:
        cap = int(pltpu.get_tpu_info().vmem_capacity_bytes)
    except Exception:
        cap = 64 << 20
    return min((cap * 3) // 4, 64 << 20)


# ---------------------------------------------------------------------------
# In-kernel helpers
# ---------------------------------------------------------------------------

def _stage_and_stack_dx(stage_ref, pad_ref, W, Cp, PHW):
    """Turn the haloed conv input staged in `stage_ref` into the dx-stacked
    bf16 operand in `pad_ref`.

    stage_ref: (PHW + 16, Cp) f32; rows [8, 8 + PHW) hold the conv input for
        this tile plus one halo image-row above and below (already zero
        outside the image); rows [0, 8) and [8 + PHW, 8 + PHW + 8) are zero
        guards so the +/-1-row shifted reads stay in bounds.
    pad_ref: (PHW, 3 * Cp) bf16; lanes [0:Cp] = x[p-1], [Cp:2Cp] = x[p],
        [2Cp:3Cp] = x[p+1] with width-edge taps zeroed, so a 3x3 conv becomes
        3 K-fused MXU dots at 8-aligned row offsets 0, W, 2W.
    """
    col = jax.lax.broadcasted_iota(jnp.int32, (PHW, Cp), 0) % W
    center = stage_ref[pl.ds(8, PHW), :]
    left = jnp.where(col == 0, 0.0, stage_ref[pl.ds(7, PHW), :])
    right = jnp.where(col == W - 1, 0.0, stage_ref[pl.ds(9, PHW), :])
    pad_ref[:, 0:Cp] = left.astype(jnp.bfloat16)
    pad_ref[:, Cp:2 * Cp] = center.astype(jnp.bfloat16)
    pad_ref[:, 2 * Cp:3 * Cp] = right.astype(jnp.bfloat16)


def _conv3x3(pad_ref, w_ref, bias, THW, W):
    """3x3 conv over the dx-stacked buffer: 3 MXU dots of K = 3*Cp
    (one per tap row dy), f32 accumulation."""
    acc = jnp.dot(pad_ref[pl.ds(0, THW), :], w_ref[0],
                  preferred_element_type=jnp.float32)
    acc = acc + jnp.dot(pad_ref[pl.ds(W, THW), :], w_ref[1],
                        preferred_element_type=jnp.float32)
    acc = acc + jnp.dot(pad_ref[pl.ds(2 * W, THW), :], w_ref[2],
                        preferred_element_type=jnp.float32)
    return acc + bias


def make_pass1_kernel(W, TH, Cp, ntiles_h):
    """conv1 (1x1) -> conv2 (3x3) -> per-tile BN partial sums."""
    THW = TH * W
    PHW = (TH + 2) * W

    def kernel(x_top_ref, x_body_ref, x_bot_ref, w1_ref, b1_ref, w2_ref,
               b2_ref, r_ref, stats_ref, pad_ref, stage_ref):
        j = pl.program_id(1)
        # Halo rows outside the image contribute zero (conv zero padding).
        top_ok = jnp.where(j > 0, 1.0, 0.0).astype(jnp.float32)
        bot_ok = jnp.where(j < ntiles_h - 1, 1.0, 0.0).astype(jnp.float32)

        def conv1(xv):
            return jnp.dot(xv, w1_ref[...],
                           preferred_element_type=jnp.float32) + b1_ref[...]

        zeros8 = jnp.zeros((8, Cp), jnp.float32)
        stage_ref[pl.ds(0, 8), :] = zeros8
        stage_ref[pl.ds(8 + PHW, 8), :] = zeros8
        stage_ref[pl.ds(8, W), :] = conv1(x_top_ref[...]) * top_ok
        stage_ref[pl.ds(8 + W, THW), :] = conv1(x_body_ref[...])
        stage_ref[pl.ds(8 + W + THW, W), :] = conv1(x_bot_ref[...]) * bot_ok

        _stage_and_stack_dx(stage_ref, pad_ref, W, Cp, PHW)
        r = _conv3x3(pad_ref, w2_ref, b2_ref[...], THW, W)

        # conv2 output returns to HBM in bf16 (it feeds the bf16 MXU in pass 2
        # anyway and is re-read with a one-row halo there).
        r_ref[...] = r.astype(jnp.bfloat16)

        # Per-tile BatchNorm partials (two-phase BN, finalized in the wrapper).
        ssum = jnp.sum(r, axis=0, keepdims=True)
        ssq = jnp.sum(r * r, axis=0, keepdims=True)
        stats_ref[...] = jnp.concatenate(
            [ssum, ssq, jnp.zeros((6, Cp), jnp.float32)], axis=0)

    return kernel


def make_pass2_kernel(W, TH, Cp, ntiles_h):
    """BN + ReLU -> conv3 (3x3) -> residual add with conv1(x) -> ReLU."""
    THW = TH * W
    PHW = (TH + 2) * W

    def kernel(r_top_ref, r_body_ref, r_bot_ref, x_body_ref, w1_ref, b1_ref,
               w3_ref, b3_ref, scale_ref, shift_ref, out_ref, pad_ref,
               stage_ref):
        j = pl.program_id(1)
        top_ok = jnp.where(j > 0, 1.0, 0.0).astype(jnp.float32)
        bot_ok = jnp.where(j < ntiles_h - 1, 1.0, 0.0).astype(jnp.float32)

        def bn_relu(v):
            return jnp.maximum(
                v.astype(jnp.float32) * scale_ref[...] + shift_ref[...], 0.0)

        zeros8 = jnp.zeros((8, Cp), jnp.float32)
        stage_ref[pl.ds(0, 8), :] = zeros8
        stage_ref[pl.ds(8 + PHW, 8), :] = zeros8
        stage_ref[pl.ds(8, W), :] = bn_relu(r_top_ref[...]) * top_ok
        stage_ref[pl.ds(8 + W, THW), :] = bn_relu(r_body_ref[...])
        stage_ref[pl.ds(8 + W + THW, W), :] = bn_relu(r_bot_ref[...]) * bot_ok

        _stage_and_stack_dx(stage_ref, pad_ref, W, Cp, PHW)
        r3 = _conv3x3(pad_ref, w3_ref, b3_ref[...], THW, W)

        # Recompute x1 = conv1(x) for the residual: one cheap 1x1 MXU dot vs a
        # full f32 HBM store + load.
        x1 = jnp.dot(x_body_ref[...], w1_ref[...],
                     preferred_element_type=jnp.float32) + b1_ref[...]
        out_ref[...] = jnp.maximum(x1 + r3, 0.0)

    return kernel


# ---------------------------------------------------------------------------
# Wrapper
# ---------------------------------------------------------------------------

@functools.partial(jax.jit, static_argnames=("tile_h",))
def rrb_forward(x_nchw, w1, b1, w2, b2, gamma, beta, w3, b3, tile_h=None):
    N, Cin, H, W = x_nchw.shape
    Cout = w1.shape[1]
    assert W % 8 == 0, "W must be a multiple of 8 for aligned tap reads"
    Cinp = _round_up(Cin, LANES)
    Cp = _round_up(Cout, LANES)
    NHW = N * H * W

    TH = tile_h if tile_h is not None else _pick_tile_h(H, W)
    assert H % TH == 0, "tile_h must divide H"
    ntiles_h = H // TH
    THW = TH * W
    PHW = (TH + 2) * W

    # --- layout prep (NCHW -> channel-padded flat NHWC, bf16 MXU operands).
    # In a full network the padded flat-NHWC activation layout would be kept
    # between blocks, so these transposes/pads are paid once per network.
    # TODO(synk): for deployments where Cout is genuinely small (<< 128), pack
    # spatial pixels into the lane dim instead of zero-padding channels to 128.
    x2d = jnp.transpose(x_nchw, (0, 2, 3, 1)).reshape(NHW, Cin)
    x2d = jnp.pad(x2d, ((0, 0), (0, Cinp - Cin))).astype(jnp.bfloat16)

    w1p = jnp.pad(w1, ((0, Cinp - Cin), (0, Cp - Cout))).astype(jnp.bfloat16)

    def fuse3x3(w9):
        # (9, Cin, Cout) taps -> (3, 3*Cp, Cp): dx taps stacked along K per dy.
        wp = jnp.pad(w9, ((0, 0), (0, Cp - Cout), (0, Cp - Cout)))
        return wp.reshape(3, 3 * Cp, Cp).astype(jnp.bfloat16)

    w2f, w3f = fuse3x3(w2), fuse3x3(w3)

    def pad_vec(v):
        return jnp.pad(v, ((0, 0), (0, Cp - Cout))).astype(jnp.float32)

    b1p, b2p, b3p, gp, bp = map(pad_vec, (b1, b2, b3, gamma, beta))

    # --- grid & specs --------------------------------------------------------
    grid = (N, ntiles_h)

    def body_spec(C):
        return pl.BlockSpec((THW, C), lambda n, j: (n * ntiles_h + j, 0))

    def top_spec(C):   # image row above the tile (clamped; masked when j == 0)
        return pl.BlockSpec(
            (W, C), lambda n, j: (n * H + jnp.maximum(j * TH - 1, 0), 0))

    def bot_spec(C):   # image row below the tile (clamped; masked when j == last)
        return pl.BlockSpec(
            (W, C), lambda n, j: (n * H + jnp.minimum((j + 1) * TH, H - 1), 0))

    def full_spec(shape):
        return pl.BlockSpec(shape, lambda n, j, _s=shape: (0,) * len(_s))

    cparams = pltpu.CompilerParams(
        dimension_semantics=("parallel", "parallel"),
        vmem_limit_bytes=_vmem_limit_bytes())

    def scratches():
        return [pltpu.VMEM((PHW, 3 * Cp), jnp.bfloat16),   # dx-stacked taps
                pltpu.VMEM((PHW + 16, Cp), jnp.float32)]   # haloed staging

    # --- pass 1: conv1 -> conv2 + per-tile BN partial sums -------------------
    r2d, stats = pl.pallas_call(
        make_pass1_kernel(W, TH, Cp, ntiles_h),
        grid=grid,
        in_specs=[top_spec(Cinp), body_spec(Cinp), bot_spec(Cinp),
                  full_spec((Cinp, Cp)), full_spec((1, Cp)),
                  full_spec((3, 3 * Cp, Cp)), full_spec((1, Cp))],
        out_specs=(body_spec(Cp),
                   pl.BlockSpec((8, Cp), lambda n, j: (n * ntiles_h + j, 0))),
        out_shape=(jax.ShapeDtypeStruct((NHW, Cp), jnp.bfloat16),
                   jax.ShapeDtypeStruct((N * ntiles_h * 8, Cp), jnp.float32)),
        scratch_shapes=scratches(),
        compiler_params=cparams,
    )(x2d, x2d, x2d, w1p, b1p, w2f, b2p)

    # --- BN finalize: tiny XLA reduction over the per-tile partials ----------
    stats = stats.reshape(N * ntiles_h, 8, Cp)
    inv_n = 1.0 / float(NHW)
    mean = jnp.sum(stats[:, 0, :], axis=0) * inv_n
    # Training-mode (batch) statistics with biased variance, matching the
    # PyTorch module's default mode.  E[x^2]-E[x]^2 is clamped at zero.
    var = jnp.maximum(jnp.sum(stats[:, 1, :], axis=0) * inv_n - mean * mean, 0.0)
    inv_std = jax.lax.rsqrt(var + BN_EPS)
    scale = (gp[0] * inv_std).reshape(1, Cp)
    shift = (bp[0] - mean * gp[0] * inv_std).reshape(1, Cp)

    # --- pass 2: BN + ReLU -> conv3 -> residual + ReLU ------------------------
    out2d = pl.pallas_call(
        make_pass2_kernel(W, TH, Cp, ntiles_h),
        grid=grid,
        in_specs=[top_spec(Cp), body_spec(Cp), bot_spec(Cp), body_spec(Cinp),
                  full_spec((Cinp, Cp)), full_spec((1, Cp)),
                  full_spec((3, 3 * Cp, Cp)), full_spec((1, Cp)),
                  full_spec((1, Cp)), full_spec((1, Cp))],
        out_specs=body_spec(Cp),
        out_shape=jax.ShapeDtypeStruct((NHW, Cp), jnp.float32),
        scratch_shapes=scratches(),
        compiler_params=cparams,
    )(r2d, r2d, r2d, x2d, w1p, b1p, w3f, b3p, scale, shift)

    out = out2d[:, :Cout].reshape(N, H, W, Cout)
    return jnp.transpose(out, (0, 3, 1, 2)).astype(x_nchw.dtype)


# ---------------------------------------------------------------------------
# Pure-JAX reference & params
# ---------------------------------------------------------------------------

def rrb_reference(x_nchw, w1, b1, w2, b2, gamma, beta, w3, b3):
    """Pure-JAX reference (lax.conv, f32) for correctness checking."""
    Cout = w1.shape[1]
    x = jnp.transpose(x_nchw, (0, 2, 3, 1)).astype(jnp.float32)

    def conv3x3(inp, w9, b):
        w_hwio = w9.reshape(3, 3, Cout, Cout)
        y = jax.lax.conv_general_dilated(
            inp, w_hwio, (1, 1), "SAME",
            dimension_numbers=("NHWC", "HWIO", "NHWC"))
        return y + b.reshape(1, 1, 1, Cout)

    x1 = jnp.einsum("nhwc,co->nhwo", x, w1) + b1.reshape(1, 1, 1, Cout)
    r = conv3x3(x1, w2, b2)
    mean = jnp.mean(r, axis=(0, 1, 2), keepdims=True)
    var = jnp.mean((r - mean) ** 2, axis=(0, 1, 2), keepdims=True)
    r = (r - mean) * jax.lax.rsqrt(var + BN_EPS)
    r = r * gamma.reshape(1, 1, 1, Cout) + beta.reshape(1, 1, 1, Cout)
    r = jnp.maximum(r, 0.0)
    r3 = conv3x3(r, w3, b3)
    out = jnp.maximum(x1 + r3, 0.0)
    return jnp.transpose(out, (0, 3, 1, 2))


def init_params(key, in_channels, out_channels):
    ks = jax.random.split(key, 6)
    scale1 = 1.0 / (in_channels ** 0.5)
    scale3 = 1.0 / ((9 * out_channels) ** 0.5)
    w1 = scale1 * jax.random.normal(ks[0], (in_channels, out_channels), jnp.float32)
    b1 = scale1 * jax.random.normal(ks[1], (1, out_channels), jnp.float32)
    # 3x3 kernels stored as (9, Cin, Cout): tap index = ky*3 + kx
    w2 = scale3 * jax.random.normal(ks[2], (9, out_channels, out_channels), jnp.float32)
    b2 = scale3 * jax.random.normal(ks[3], (1, out_channels), jnp.float32)
    w3 = scale3 * jax.random.normal(ks[4], (9, out_channels, out_channels), jnp.float32)
    b3 = scale3 * jax.random.normal(ks[5], (1, out_channels), jnp.float32)
    gamma = jnp.ones((1, out_channels), jnp.float32)   # BN weight init
    beta = jnp.zeros((1, out_channels), jnp.float32)   # BN bias init
    return w1, b1, w2, b2, gamma, beta, w3, b3


if __name__ == "__main__":
    key = jax.random.PRNGKey(0)
    kx, kp = jax.random.split(key)

    N, Cin, Cout, H, W = 2, 4, 8, 16, 16
    x = jax.random.normal(kx, (N, Cin, H, W), jnp.float32)
    params = init_params(kp, Cin, Cout)

    # tile_h=8 -> grid (N=2, H/8=2): exercises both the cross-tile halo path
    # and the image-boundary (masked) halo path.
    out = rrb_forward(x, *params, tile_h=8)
    out = jax.block_until_ready(out)

    ref = rrb_reference(x, *params)
    assert out.shape == (N, Cout, H, W)
    # bf16 MXU operands + bf16 conv2 intermediate (f32 accumulation) => relaxed
    # tolerance vs the f32 reference.
    err = float(jnp.max(jnp.abs(out - ref)))
    assert jnp.allclose(out, ref, atol=6e-2, rtol=6e-2), err

    print("KERNEL_OK")
</pallas_src>

<mosaic_0001>
module attributes {stable_mosaic.version = 11 : i64} {
  func.func @kernel(%arg0: i32, %arg1: i32, %arg2: memref<16x128xbf16, #tpu.memory_space<vmem>>, %arg3: memref<128x128xbf16, #tpu.memory_space<vmem>>, %arg4: memref<16x128xbf16, #tpu.memory_space<vmem>>, %arg5: memref<128x128xbf16, #tpu.memory_space<vmem>>, %arg6: memref<1x128xf32, #tpu.memory_space<vmem>>, %arg7: memref<3x384x128xbf16, #tpu.memory_space<vmem>>, %arg8: memref<1x128xf32, #tpu.memory_space<vmem>>, %arg9: memref<128x128xbf16, #tpu.memory_space<vmem>>, %arg10: memref<8x128xf32, #tpu.memory_space<vmem>>, %arg11: memref<160x384xbf16, #tpu.memory_space<vmem>>, %arg12: memref<176x128xf32, #tpu.memory_space<vmem>>) attributes {dimension_semantics = [#tpu.dimension_semantics<parallel>, #tpu.dimension_semantics<parallel>], iteration_bounds = array<i64: 2, 2>, scalar_prefetch = 0 : i64, scratch_operands = 2 : i64, tpu.core_type = #tpu.core_type<tc>, window_params = [{transform_indices = @transform_0, window_bounds = array<i64: 16, 128>}, {transform_indices = @transform_1, window_bounds = array<i64: 128, 128>}, {transform_indices = @transform_2, window_bounds = array<i64: 16, 128>}, {pipeline_mode = #tpu.pipeline_mode<synchronous>, transform_indices = @transform_3, window_bounds = array<i64: 128, 128>}, {pipeline_mode = #tpu.pipeline_mode<synchronous>, transform_indices = @transform_4, window_bounds = array<i64: 1, 128>}, {pipeline_mode = #tpu.pipeline_mode<synchronous>, transform_indices = @transform_5, window_bounds = array<i64: 3, 384, 128>}, {pipeline_mode = #tpu.pipeline_mode<synchronous>, transform_indices = @transform_6, window_bounds = array<i64: 1, 128>}, {transform_indices = @transform_7, window_bounds = array<i64: 128, 128>}, {transform_indices = @transform_8, window_bounds = array<i64: 8, 128>}]} {
    %c0_i32 = arith.constant 0 : i32
    %0 = arith.cmpi sgt, %arg1, %c0_i32 : i32
    %cst = arith.constant 1.000000e+00 : f32
    %cst_0 = arith.constant 0.000000e+00 : f32
    %1 = arith.select %0, %cst, %cst_0 : f32
    %c1_i32 = arith.constant 1 : i32
    %2 = arith.cmpi slt, %arg1, %c1_i32 : i32
    %cst_1 = arith.constant 1.000000e+00 : f32
    %cst_2 = arith.constant 0.000000e+00 : f32
    %3 = arith.select %2, %cst_1, %cst_2 : f32
    %cst_3 = arith.constant 0.000000e+00 : f32
    %4 = vector.broadcast %cst_3 : f32 to vector<8x128xf32>
    %c0 = arith.constant 0 : index
    %c0_4 = arith.constant 0 : index
    %5 = vector.load %arg12[%c0, %c0_4] : memref<176x128xf32, #tpu.memory_space<vmem>>, vector<8x128xf32>
    tpu.vector_store %arg12[%c0, %c0_4], %4 {strides = array<i32>} : memref<176x128xf32, #tpu.memory_space<vmem>>, vector<8x128xf32>,
    %c168 = arith.constant 168 : index
    %c0_5 = arith.constant 0 : index
    %6 = vector.load %arg12[%c168, %c0_5] : memref<176x128xf32, #tpu.memory_space<vmem>>, vector<8x128xf32>
    tpu.vector_store %arg12[%c168, %c0_5], %4 {strides = array<i32>} : memref<176x128xf32, #tpu.memory_space<vmem>>, vector<8x128xf32>,
    %c0_6 = arith.constant 0 : index
    %c0_7 = arith.constant 0 : index
    %7 = vector.load %arg2[%c0_6, %c0_7] : memref<16x128xbf16, #tpu.memory_space<vmem>>, vector<16x128xbf16>
    %c0_8 = arith.constant 0 : index
    %c0_9 = arith.constant 0 : index
    %8 = vector.load %arg5[%c0_8, %c0_9] : memref<128x128xbf16, #tpu.memory_space<vmem>>, vector<128x128xbf16>
    %cst_10 = arith.constant dense<0.000000e+00> : vector<16x128xf32>
    %9 = tpu.matmul %7, %8, %cst_10 {dimension_numbers = #tpu.dot_dimension_numbers<[1], [0], [0], [1], [0, 0, 1, 1], [], []>} : vector<16x128xbf16>, vector<128x128xbf16>, vector<16x128xf32> -> vector<16x128xf32>
    %c0_11 = arith.constant 0 : index
    %c0_12 = arith.constant 0 : index
    %10 = vector.load %arg6[%c0_11, %c0_12] : memref<1x128xf32, #tpu.memory_space<vmem>>, vector<1x128xf32>
    %11 = vector.broadcast %10 : vector<1x128xf32> to vector<16x128xf32>
    %12 = arith.addf %9, %11 : vector<16x128xf32>
    %13 = vector.broadcast %1 : f32 to vector<16x128xf32>
    %14 = arith.mulf %12, %13 : vector<16x128xf32>
    %c8 = arith.constant 8 : index
    %c0_13 = arith.constant 0 : index
    %15 = vector.load %arg12[%c8, %c0_13] : memref<176x128xf32, #tpu.memory_space<vmem>>, vector<16x128xf32>
    tpu.vector_store %arg12[%c8, %c0_13], %14 {strides = array<i32>} : memref<176x128xf32, #tpu.memory_space<vmem>>, vector<16x128xf32>,
    %c0_14 = arith.constant 0 : index
    %c0_15 = arith.constant 0 : index
    %16 = vector.load %arg3[%c0_14, %c0_15] : memref<128x128xbf16, #tpu.memory_space<vmem>>, vector<128x128xbf16>
    %c0_16 = arith.constant 0 : index
    %c0_17 = arith.constant 0 : index
    %17 = vector.load %arg5[%c0_16, %c0_17] : memref<128x128xbf16, #tpu.memory_space<vmem>>, vector<128x128xbf16>
    %cst_18 = arith.constant dense<0.000000e+00> : vector<128x128xf32>
    %18 = tpu.matmul %16, %17, %cst_18 {dimension_numbers = #tpu.dot_dimension_numbers<[1], [0], [0], [1], [0, 0, 1, 1], [], []>} : vector<128x128xbf16>, vector<128x128xbf16>, vector<128x128xf32> -> vector<128x128xf32>
    %c0_19 = arith.constant 0 : index
    %c0_20 = arith.constant 0 : index
    %19 = vector.load %arg6[%c0_19, %c0_20] : memref<1x128xf32, #tpu.memory_space<vmem>>, vector<1x128xf32>
    %20 = vector.broadcast %19 : vector<1x128xf32> to vector<128x128xf32>
    %21 = arith.addf %18, %20 : vector<128x128xf32>
    %c24 = arith.constant 24 : index
    %c0_21 = arith.constant 0 : index
    %22 = vector.load %arg12[%c24, %c0_21] : memref<176x128xf32, #tpu.memory_space<vmem>>, vector<128x128xf32>
    tpu.vector_store %arg12[%c24, %c0_21], %21 {strides = array<i32>} : memref<176x128xf32, #tpu.memory_space<vmem>>, vector<128x128xf32>,
    %c0_22 = arith.constant 0 : index
    %c0_23 = arith.constant 0 : index
    %23 = vector.load %arg4[%c0_22, %c0_23] : memref<16x128xbf16, #tpu.memory_space<vmem>>, vector<16x128xbf16>
    %c0_24 = arith.constant 0 : index
    %c0_25 = arith.constant 0 : index
    %24 = vector.load %arg5[%c0_24, %c0_25] : memref<128x128xbf16, #tpu.memory_space<vmem>>, vector<128x128xbf16>
    %cst_26 = arith.constant dense<0.000000e+00> : vector<16x128xf32>
    %25 = tpu.matmul %23, %24, %cst_26 {dimension_numbers = #tpu.dot_dimension_numbers<[1], [0], [0], [1], [0, 0, 1, 1], [], []>} : vector<16x128xbf16>, vector<128x128xbf16>, vector<16x128xf32> -> vector<16x128xf32>
    %c0_27 = arith.constant 0 : index
    %c0_28 = arith.constant 0 : index
    %26 = vector.load %arg6[%c0_27, %c0_28] : memref<1x128xf32, #tpu.memory_space<vmem>>, vector<1x128xf32>
    %27 = vector.broadcast %26 : vector<1x128xf32> to vector<16x128xf32>
    %28 = arith.addf %25, %27 : vector<16x128xf32>
    %29 = vector.broadcast %3 : f32 to vector<16x128xf32>
    %30 = arith.mulf %28, %29 : vector<16x128xf32>
    %c152 = arith.constant 152 : index
    %c0_29 = arith.constant 0 : index
    %31 = vector.load %arg12[%c152, %c0_29] : memref<176x128xf32, #tpu.memory_space<vmem>>, vector<16x128xf32>
    tpu.vector_store %arg12[%c152, %c0_29], %30 {strides = array<i32>} : memref<176x128xf32, #tpu.memory_space<vmem>>, vector<16x128xf32>,
    %32 = tpu.iota {dimensions = array<i32: 0>} : vector<160x128xi32>
    %c16_i32 = arith.constant 16 : i32
    %c0_i32_30 = arith.constant 0 : i32
    %33 = arith.cmpi eq, %c16_i32, %c0_i32_30 : i32
    %c1_i32_31 = arith.constant 1 : i32
    %34 = arith.select %33, %c1_i32_31, %c16_i32 : i32
    %35 = vector.broadcast %34 : i32 to vector<160x128xi32>
    %36 = arith.remsi %32, %35 : vector<160x128xi32>
    %c0_i32_32 = arith.constant 0 : i32
    %37 = vector.broadcast %c0_i32_32 : i32 to vector<160x128xi32>
    %38 = arith.cmpi ne, %36, %37 : vector<160x128xi32>
    %c0_i32_33 = arith.constant 0 : i32
    %39 = vector.broadcast %c0_i32_33 : i32 to vector<160x128xi32>
    %40 = arith.cmpi slt, %36, %39 : vector<160x128xi32>
    %c0_i32_34 = arith.constant 0 : i32
    %41 = arith.cmpi slt, %34, %c0_i32_34 : i32
    %42 = vector.broadcast %41 : i1 to vector<160x128xi1>
    %43 = vector.broadcast %42 : vector<160x128xi1> to vector<160x128xi1>
    %44 = arith.xori %40, %43 : vector<160x128xi1>
    %45 = arith.andi %44, %38 : vector<160x128xi1>
    %46 = vector.broadcast %34 : i32 to vector<160x128xi32>
    %47 = arith.addi %36, %46 : vector<160x128xi32>
    %48 = arith.select %45, %47, %36 : vector<160x128xi1>, vector<160x128xi32>
    %c8_35 = arith.constant 8 : index
    %c0_36 = arith.constant 0 : index
    %49 = vector.load %arg12[%c8_35, %c0_36] : memref<176x128xf32, #tpu.memory_space<vmem>>, vector<160x128xf32>
    %c0_i32_37 = arith.constant 0 : i32
    %50 = vector.broadcast %c0_i32_37 : i32 to vector<160x128xi32>
    %51 = arith.cmpi eq, %48, %50 : vector<160x128xi32>
    %c7 = arith.constant 7 : index
    %c0_38 = arith.constant 0 : index
    %52 = vector.load %arg12[%c7, %c0_38] : memref<176x128xf32, #tpu.memory_space<vmem>>, vector<160x128xf32>
    %cst_39 = arith.constant 0.000000e+00 : f32
    %53 = vector.broadcast %cst_39 : f32 to vector<160x128xf32>
    %54 = arith.select %51, %53, %52 : vector<160x128xi1>, vector<160x128xf32>
    %c15_i32 = arith.constant 15 : i32
    %55 = vector.broadcast %c15_i32 : i32 to vector<160x128xi32>
    %56 = arith.cmpi eq, %48, %55 : vector<160x128xi32>
    %c9 = arith.constant 9 : index
    %c0_40 = arith.constant 0 : index
    %57 = vector.load %arg12[%c9, %c0_40] : memref<176x128xf32, #tpu.memory_space<vmem>>, vector<160x128xf32>
    %cst_41 = arith.constant 0.000000e+00 : f32
    %58 = vector.broadcast %cst_41 : f32 to vector<160x128xf32>
    %59 = arith.select %56, %58, %57 : vector<160x128xi1>, vector<160x128xf32>
    %60 = arith.truncf %54 : vector<160x128xf32> to vector<160x128xbf16>
    %c0_42 = arith.constant 0 : index
    %c0_43 = arith.constant 0 : index
    %61 = vector.load %arg11[%c0_42, %c0_43] : memref<160x384xbf16, #tpu.memory_space<vmem>>, vector<160x128xbf16>
    tpu.vector_store %arg11[%c0_42, %c0_43], %60 {strides = array<i32>} : memref<160x384xbf16, #tpu.memory_space<vmem>>, vector<160x128xbf16>,
    %62 = arith.truncf %49 : vector<160x128xf32> to vector<160x128xbf16>
    %c0_44 = arith.constant 0 : index
    %c128 = arith.constant 128 : index
    %63 = vector.load %arg11[%c0_44, %c128] : memref<160x384xbf16, #tpu.memory_space<vmem>>, vector<160x128xbf16>
    tpu.vector_store %arg11[%c0_44, %c128], %62 {strides = array<i32>} : memref<160x384xbf16, #tpu.memory_space<vmem>>, vector<160x128xbf16>,
    %64 = arith.truncf %59 : vector<160x128xf32> to vector<160x128xbf16>
    %c0_45 = arith.constant 0 : index
    %c256 = arith.constant 256 : index
    %65 = vector.load %arg11[%c0_45, %c256] : memref<160x384xbf16, #tpu.memory_space<vmem>>, vector<160x128xbf16>
    tpu.vector_store %arg11[%c0_45, %c256], %64 {strides = array<i32>} : memref<160x384xbf16, #tpu.memory_space<vmem>>, vector<160x128xbf16>,
    %c0_46 = arith.constant 0 : index
    %c0_47 = arith.constant 0 : index
    %66 = vector.load %arg8[%c0_46, %c0_47] : memref<1x128xf32, #tpu.memory_space<vmem>>, vector<1x128xf32>
    %c0_48 = arith.constant 0 : index
    %c0_49 = arith.constant 0 : index
    %67 = vector.load %arg11[%c0_48, %c0_49] : memref<160x384xbf16, #tpu.memory_space<vmem>>, vector<128x384xbf16>
    %c0_50 = arith.constant 0 : index
    %c0_51 = arith.constant 0 : index
    %c0_52 = arith.constant 0 : index
    %68 = vector.load %arg7[%c0_50, %c0_51, %c0_52] : memref<3x384x128xbf16, #tpu.memory_space<vmem>>, vector<1x384x128xbf16>
    %69 = vector.shape_cast %68 : vector<1x384x128xbf16> to vector<384x128xbf16>
    %cst_53 = arith.constant dense<0.000000e+00> : vector<128x128xf32>
    %70 = tpu.matmul %67, %69, %cst_53 {dimension_numbers = #tpu.dot_dimension_numbers<[1], [0], [0], [1], [0, 0, 1, 1], [], []>} : vector<128x384xbf16>, vector<384x128xbf16>, vector<128x128xf32> -> vector<128x128xf32>
    %c16 = arith.constant 16 : index
    %c0_54 = arith.constant 0 : index
    %71 = vector.load %arg11[%c16, %c0_54] : memref<160x384xbf16, #tpu.memory_space<vmem>>, vector<128x384xbf16>
    %c1 = arith.constant 1 : index
    %c0_55 = arith.constant 0 : index
    %c0_56 = arith.constant 0 : index
    %72 = vector.load %arg7[%c1, %c0_55, %c0_56] : memref<3x384x128xbf16, #tpu.memory_space<vmem>>, vector<1x384x128xbf16>
    %73 = vector.shape_cast %72 : vector<1x384x128xbf16> to vector<384x128xbf16>
    %cst_57 = arith.constant dense<0.000000e+00> : vector<128x128xf32>
    %74 = tpu.matmul %71, %73, %cst_57 {dimension_numbers = #tpu.dot_dimension_numbers<[1], [0], [0], [1], [0, 0, 1, 1], [], []>} : vector<128x384xbf16>, vector<384x128xbf16>, vector<128x128xf32> -> vector<128x128xf32>
    %75 = arith.addf %70, %74 : vector<128x128xf32>
    %c32 = arith.constant 32 : index
    %c0_58 = arith.constant 0 : index
    %76 = vector.load %arg11[%c32, %c0_58] : memref<160x384xbf16, #tpu.memory_space<vmem>>, vector<128x384xbf16>
    %c2 = arith.constant 2 : index
    %c0_59 = arith.constant 0 : index
    %c0_60 = arith.constant 0 : index
    %77 = vector.load %arg7[%c2, %c0_59, %c0_60] : memref<3x384x128xbf16, #tpu.memory_space<vmem>>, vector<1x384x128xbf16>
    %78 = vector.shape_cast %77 : vector<1x384x128xbf16> to vector<384x128xbf16>
    %cst_61 = arith.constant dense<0.000000e+00> : vector<128x128xf32>
    %79 = tpu.matmul %76, %78, %cst_61 {dimension_numbers = #tpu.dot_dimension_numbers<[1], [0], [0], [1], [0, 0, 1, 1], [], []>} : vector<128x384xbf16>, vector<384x128xbf16>, vector<128x128xf32> -> vector<128x128xf32>
    %80 = arith.addf %75, %79 : vector<128x128xf32>
    %81 = vector.broadcast %66 : vector<1x128xf32> to vector<128x128xf32>
    %82 = arith.addf %80, %81 : vector<128x128xf32>
    %83 = arith.truncf %82 : vector<128x128xf32> to vector<128x128xbf16>
    %c0_62 = arith.constant 0 : index
    %c0_63 = arith.constant 0 : index
    %84 = vector.load %arg9[%c0_62, %c0_63] : memref<128x128xbf16, #tpu.memory_space<vmem>>, vector<128x128xbf16>
    tpu.vector_store %arg9[%c0_62, %c0_63], %83 {strides = array<i32>} : memref<128x128xbf16, #tpu.memory_space<vmem>>, vector<128x128xbf16>,
    %cst_64 = arith.constant dense<0.000000e+00> : vector<128xf32>
    %85 = vector.multi_reduction <add>, %82, %cst_64 [0] : vector<128x128xf32> to vector<128xf32>
    %86 = vector.shape_cast %85 : vector<128xf32> to vector<1x128xf32>
    %87 = arith.mulf %82, %82 : vector<128x128xf32>
    %cst_65 = arith.constant dense<0.000000e+00> : vector<128xf32>
    %88 = vector.multi_reduction <add>, %87, %cst_65 [0] : vector<128x128xf32> to vector<128xf32>
    %89 = vector.shape_cast %88 : vector<128xf32> to vector<1x128xf32>
    %cst_66 = arith.constant 0.000000e+00 : f32
    %90 = vector.broadcast %cst_66 : f32 to vector<6x128xf32>
    %91 = tpu.concatenate %86, %89, %90 in 0 : vector<1x128xf32>, vector<1x128xf32>, vector<6x128xf32> -> vector<8x128xf32>
    %c0_67 = arith.constant 0 : index
    %c0_68 = arith.constant 0 : index
    %92 = vector.load %arg10[%c0_67, %c0_68] : memref<8x128xf32, #tpu.memory_space<vmem>>, vector<8x128xf32>
    tpu.vector_store %arg10[%c0_67, %c0_68], %91 {strides = array<i32>} : memref<8x128xf32, #tpu.memory_space<vmem>>, vector<8x128xf32>,
    return
  }
  func.func @transform_0(%arg0: i32, %arg1: i32) -> (i32, i32) {
    %c16_i32 = arith.constant 16 : i32
    %0 = arith.muli %arg0, %c16_i32 : i32
    %c8_i32 = arith.constant 8 : i32
    %1 = arith.muli %arg1, %c8_i32 : i32
    %c1_i32 = arith.constant 1 : i32
    %2 = arith.subi %1, %c1_i32 : i32
    %c0_i32 = arith.constant 0 : i32
    %3 = arith.maxsi %2, %c0_i32 : i32
    %4 = arith.addi %0, %3 : i32
    %c0_i32_0 = arith.constant 0 : i32
    %c0_i32_1 = arith.constant 0 : i32
    return %4, %c0_i32_0 : i32, i32
  }
  func.func @transform_1(%arg0: i32, %arg1: i32) -> (i32, i32) {
    %c2_i32 = arith.constant 2 : i32
    %0 = arith.muli %arg0, %c2_i32 : i32
    %1 = arith.addi %0, %arg1 : i32
    %c0_i32 = arith.constant 0 : i32
    %c0_i32_0 = arith.constant 0 : i32
    return %1, %c0_i32 : i32, i32
  }
  func.func @transform_2(%arg0: i32, %arg1: i32) -> (i32, i32) {
    %c16_i32 = arith.constant 16 : i32
    %0 = arith.muli %arg0, %c16_i32 : i32
    %c1_i32 = arith.constant 1 : i32
    %1 = arith.addi %arg1, %c1_i32 : i32
    %c8_i32 = arith.constant 8 : i32
    %2 = arith.muli %1, %c8_i32 : i32
    %c15_i32 = arith.constant 15 : i32
    %3 = arith.minsi %2, %c15_i32 : i32
    %4 = arith.addi %0, %3 : i32
    %c0_i32 = arith.constant 0 : i32
    %c0_i32_0 = arith.constant 0 : i32
    return %4, %c0_i32 : i32, i32
  }
  func.func @transform_3(%arg0: i32, %arg1: i32) -> (i32, i32) {
    %c0_i32 = arith.constant 0 : i32
    %c0_i32_0 = arith.constant 0 : i32
    %c0_i32_1 = arith.constant 0 : i32
    return %c0_i32, %c0_i32_0 : i32, i32
  }
  func.func @transform_4(%arg0: i32, %arg1: i32) -> (i32, i32) {
    %c0_i32 = arith.constant 0 : i32
    %c0_i32_0 = arith.constant 0 : i32
    %c0_i32_1 = arith.constant 0 : i32
    return %c0_i32, %c0_i32_0 : i32, i32
  }
  func.func @transform_5(%arg0: i32, %arg1: i32) -> (i32, i32, i32) {
    %c0_i32 = arith.constant 0 : i32
    %c0_i32_0 = arith.constant 0 : i32
    %c0_i32_1 = arith.constant 0 : i32
    %c0_i32_2 = arith.constant 0 : i32
    return %c0_i32, %c0_i32_0, %c0_i32_1 : i32, i32, i32
  }
  func.func @transform_6(%arg0: i32, %arg1: i32) -> (i32, i32) {
    %c0_i32 = arith.constant 0 : i32
    %c0_i32_0 = arith.constant 0 : i32
    %c0_i32_1 = arith.constant 0 : i32
    return %c0_i32, %c0_i32_0 : i32, i32
  }
  func.func @transform_7(%arg0: i32, %arg1: i32) -> (i32, i32) {
    %c2_i32 = arith.constant 2 : i32
    %0 = arith.muli %arg0, %c2_i32 : i32
    %1 = arith.addi %0, %arg1 : i32
    %c0_i32 = arith.constant 0 : i32
    %c0_i32_0 = arith.constant 0 : i32
    return %1, %c0_i32 : i32, i32
  }
  func.func @transform_8(%arg0: i32, %arg1: i32) -> (i32, i32) {
    %c2_i32 = arith.constant 2 : i32
    %0 = arith.muli %arg0, %c2_i32 : i32
    %1 = arith.addi %0, %arg1 : i32
    %c0_i32 = arith.constant 0 : i32
    %c0_i32_0 = arith.constant 0 : i32
    return %1, %c0_i32 : i32, i32
  }
}

module attributes {stable_mosaic.version = 11 : i64} {
  func.func @kernel(%arg0: i32, %arg1: i32, %arg2: memref<16x128xbf16, #tpu.memory_space<vmem>>, %arg3: memref<128x128xbf16, #tpu.memory_space<vmem>>, %arg4: memref<16x128xbf16, #tpu.memory_space<vmem>>, %arg5: memref<128x128xbf16, #tpu.memory_space<vmem>>, %arg6: memref<128x128xbf16, #tpu.memory_space<vmem>>, %arg7: memref<1x128xf32, #tpu.memory_space<vmem>>, %arg8: memref<3x384x128xbf16, #tpu.memory_space<vmem>>, %arg9: memref<1x128xf32, #tpu.memory_space<vmem>>, %arg10: memref<1x128xf32, #tpu.memory_space<vmem>>, %arg11: memref<1x128xf32, #tpu.memory_space<vmem>>, %arg12: memref<128x128xf32, #tpu.memory_space<vmem>>, %arg13: memref<160x384xbf16, #tpu.memory_space<vmem>>, %arg14: memref<176x128xf32, #tpu.memory_space<vmem>>) attributes {dimension_semantics = [#tpu.dimension_semantics<parallel>, #tpu.dimension_semantics<parallel>], iteration_bounds = array<i64: 2, 2>, scalar_prefetch = 0 : i64, scratch_operands = 2 : i64, tpu.core_type = #tpu.core_type<tc>, window_params = [{transform_indices = @transform_0, window_bounds = array<i64: 16, 128>}, {transform_indices = @transform_1, window_bounds = array<i64: 128, 128>}, {transform_indices = @transform_2, window_bounds = array<i64: 16, 128>}, {transform_indices = @transform_3, window_bounds = array<i64: 128, 128>}, {pipeline_mode = #tpu.pipeline_mode<synchronous>, transform_indices = @transform_4, window_bounds = array<i64: 128, 128>}, {pipeline_mode = #tpu.pipeline_mode<synchronous>, transform_indices = @transform_5, window_bounds = array<i64: 1, 128>}, {pipeline_mode = #tpu.pipeline_mode<synchronous>, transform_indices = @transform_6, window_bounds = array<i64: 3, 384, 128>}, {pipeline_mode = #tpu.pipeline_mode<synchronous>, transform_indices = @transform_7, window_bounds = array<i64: 1, 128>}, {pipeline_mode = #tpu.pipeline_mode<synchronous>, transform_indices = @transform_8, window_bounds = array<i64: 1, 128>}, {pipeline_mode = #tpu.pipeline_mode<synchronous>, transform_indices = @transform_9, window_bounds = array<i64: 1, 128>}, {transform_indices = @transform_10, window_bounds = array<i64: 128, 128>}]} {
    %c0_i32 = arith.constant 0 : i32
    %0 = arith.cmpi sgt, %arg1, %c0_i32 : i32
    %cst = arith.constant 1.000000e+00 : f32
    %cst_0 = arith.constant 0.000000e+00 : f32
    %1 = arith.select %0, %cst, %cst_0 : f32
    %c1_i32 = arith.constant 1 : i32
    %2 = arith.cmpi slt, %arg1, %c1_i32 : i32
    %cst_1 = arith.constant 1.000000e+00 : f32
    %cst_2 = arith.constant 0.000000e+00 : f32
    %3 = arith.select %2, %cst_1, %cst_2 : f32
    %cst_3 = arith.constant 0.000000e+00 : f32
    %4 = vector.broadcast %cst_3 : f32 to vector<8x128xf32>
    %c0 = arith.constant 0 : index
    %c0_4 = arith.constant 0 : index
    %5 = vector.load %arg14[%c0, %c0_4] : memref<176x128xf32, #tpu.memory_space<vmem>>, vector<8x128xf32>
    tpu.vector_store %arg14[%c0, %c0_4], %4 {strides = array<i32>} : memref<176x128xf32, #tpu.memory_space<vmem>>, vector<8x128xf32>,
    %c168 = arith.constant 168 : index
    %c0_5 = arith.constant 0 : index
    %6 = vector.load %arg14[%c168, %c0_5] : memref<176x128xf32, #tpu.memory_space<vmem>>, vector<8x128xf32>
    tpu.vector_store %arg14[%c168, %c0_5], %4 {strides = array<i32>} : memref<176x128xf32, #tpu.memory_space<vmem>>, vector<8x128xf32>,
    %c0_6 = arith.constant 0 : index
    %c0_7 = arith.constant 0 : index
    %7 = vector.load %arg2[%c0_6, %c0_7] : memref<16x128xbf16, #tpu.memory_space<vmem>>, vector<16x128xbf16>
    %8 = arith.extf %7 : vector<16x128xbf16> to vector<16x128xf32>
    %c0_8 = arith.constant 0 : index
    %c0_9 = arith.constant 0 : index
    %9 = vector.load %arg10[%c0_8, %c0_9] : memref<1x128xf32, #tpu.memory_space<vmem>>, vector<1x128xf32>
    %10 = vector.broadcast %9 : vector<1x128xf32> to vector<16x128xf32>
    %11 = arith.mulf %8, %10 : vector<16x128xf32>
    %c0_10 = arith.constant 0 : index
    %c0_11 = arith.constant 0 : index
    %12 = vector.load %arg11[%c0_10, %c0_11] : memref<1x128xf32, #tpu.memory_space<vmem>>, vector<1x128xf32>
    %13 = vector.broadcast %12 : vector<1x128xf32> to vector<16x128xf32>
    %14 = arith.addf %11, %13 : vector<16x128xf32>
    %cst_12 = arith.constant 0.000000e+00 : f32
    %15 = vector.broadcast %cst_12 : f32 to vector<16x128xf32>
    %16 = arith.maximumf %14, %15 : vector<16x128xf32>
    %17 = vector.broadcast %1 : f32 to vector<16x128xf32>
    %18 = arith.mulf %16, %17 : vector<16x128xf32>
    %c8 = arith.constant 8 : index
    %c0_13 = arith.constant 0 : index
    %19 = vector.load %arg14[%c8, %c0_13] : memref<176x128xf32, #tpu.memory_space<vmem>>, vector<16x128xf32>
    tpu.vector_store %arg14[%c8, %c0_13], %18 {strides = array<i32>} : memref<176x128xf32, #tpu.memory_space<vmem>>, vector<16x128xf32>,
    %c0_14 = arith.constant 0 : index
    %c0_15 = arith.constant 0 : index
    %20 = vector.load %arg3[%c0_14, %c0_15] : memref<128x128xbf16, #tpu.memory_space<vmem>>, vector<128x128xbf16>
    %21 = arith.extf %20 : vector<128x128xbf16> to vector<128x128xf32>
    %c0_16 = arith.constant 0 : index
    %c0_17 = arith.constant 0 : index
    %22 = vector.load %arg10[%c0_16, %c0_17] : memref<1x128xf32, #tpu.memory_space<vmem>>, vector<1x128xf32>
    %23 = vector.broadcast %22 : vector<1x128xf32> to vector<128x128xf32>
    %24 = arith.mulf %21, %23 : vector<128x128xf32>
    %c0_18 = arith.constant 0 : index
    %c0_19 = arith.constant 0 : index
    %25 = vector.load %arg11[%c0_18, %c0_19] : memref<1x128xf32, #tpu.memory_space<vmem>>, vector<1x128xf32>
    %26 = vector.broadcast %25 : vector<1x128xf32> to vector<128x128xf32>
    %27 = arith.addf %24, %26 : vector<128x128xf32>
    %cst_20 = arith.constant 0.000000e+00 : f32
    %28 = vector.broadcast %cst_20 : f32 to vector<128x128xf32>
    %29 = arith.maximumf %27, %28 : vector<128x128xf32>
    %c24 = arith.constant 24 : index
    %c0_21 = arith.constant 0 : index
    %30 = vector.load %arg14[%c24, %c0_21] : memref<176x128xf32, #tpu.memory_space<vmem>>, vector<128x128xf32>
    tpu.vector_store %arg14[%c24, %c0_21], %29 {strides = array<i32>} : memref<176x128xf32, #tpu.memory_space<vmem>>, vector<128x128xf32>,
    %c0_22 = arith.constant 0 : index
    %c0_23 = arith.constant 0 : index
    %31 = vector.load %arg4[%c0_22, %c0_23] : memref<16x128xbf16, #tpu.memory_space<vmem>>, vector<16x128xbf16>
    %32 = arith.extf %31 : vector<16x128xbf16> to vector<16x128xf32>
    %c0_24 = arith.constant 0 : index
    %c0_25 = arith.constant 0 : index
    %33 = vector.load %arg10[%c0_24, %c0_25] : memref<1x128xf32, #tpu.memory_space<vmem>>, vector<1x128xf32>
    %34 = vector.broadcast %33 : vector<1x128xf32> to vector<16x128xf32>
    %35 = arith.mulf %32, %34 : vector<16x128xf32>
    %c0_26 = arith.constant 0 : index
    %c0_27 = arith.constant 0 : index
    %36 = vector.load %arg11[%c0_26, %c0_27] : memref<1x128xf32, #tpu.memory_space<vmem>>, vector<1x128xf32>
    %37 = vector.broadcast %36 : vector<1x128xf32> to vector<16x128xf32>
    %38 = arith.addf %35, %37 : vector<16x128xf32>
    %cst_28 = arith.constant 0.000000e+00 : f32
    %39 = vector.broadcast %cst_28 : f32 to vector<16x128xf32>
    %40 = arith.maximumf %38, %39 : vector<16x128xf32>
    %41 = vector.broadcast %3 : f32 to vector<16x128xf32>
    %42 = arith.mulf %40, %41 : vector<16x128xf32>
    %c152 = arith.constant 152 : index
    %c0_29 = arith.constant 0 : index
    %43 = vector.load %arg14[%c152, %c0_29] : memref<176x128xf32, #tpu.memory_space<vmem>>, vector<16x128xf32>
    tpu.vector_store %arg14[%c152, %c0_29], %42 {strides = array<i32>} : memref<176x128xf32, #tpu.memory_space<vmem>>, vector<16x128xf32>,
    %44 = tpu.iota {dimensions = array<i32: 0>} : vector<160x128xi32>
    %c16_i32 = arith.constant 16 : i32
    %c0_i32_30 = arith.constant 0 : i32
    %45 = arith.cmpi eq, %c16_i32, %c0_i32_30 : i32
    %c1_i32_31 = arith.constant 1 : i32
    %46 = arith.select %45, %c1_i32_31, %c16_i32 : i32
    %47 = vector.broadcast %46 : i32 to vector<160x128xi32>
    %48 = arith.remsi %44, %47 : vector<160x128xi32>
    %c0_i32_32 = arith.constant 0 : i32
    %49 = vector.broadcast %c0_i32_32 : i32 to vector<160x128xi32>
    %50 = arith.cmpi ne, %48, %49 : vector<160x128xi32>
    %c0_i32_33 = arith.constant 0 : i32
    %51 = vector.broadcast %c0_i32_33 : i32 to vector<160x128xi32>
    %52 = arith.cmpi slt, %48, %51 : vector<160x128xi32>
    %c0_i32_34 = arith.constant 0 : i32
    %53 = arith.cmpi slt, %46, %c0_i32_34 : i32
    %54 = vector.broadcast %53 : i1 to vector<160x128xi1>
    %55 = vector.broadcast %54 : vector<160x128xi1> to vector<160x128xi1>
    %56 = arith.xori %52, %55 : vector<160x128xi1>
    %57 = arith.andi %56, %50 : vector<160x128xi1>
    %58 = vector.broadcast %46 : i32 to vector<160x128xi32>
    %59 = arith.addi %48, %58 : vector<160x128xi32>
    %60 = arith.select %57, %59, %48 : vector<160x128xi1>, vector<160x128xi32>
    %c8_35 = arith.constant 8 : index
    %c0_36 = arith.constant 0 : index
    %61 = vector.load %arg14[%c8_35, %c0_36] : memref<176x128xf32, #tpu.memory_space<vmem>>, vector<160x128xf32>
    %c0_i32_37 = arith.constant 0 : i32
    %62 = vector.broadcast %c0_i32_37 : i32 to vector<160x128xi32>
    %63 = arith.cmpi eq, %60, %62 : vector<160x128xi32>
    %c7 = arith.constant 7 : index
    %c0_38 = arith.constant 0 : index
    %64 = vector.load %arg14[%c7, %c0_38] : memref<176x128xf32, #tpu.memory_space<vmem>>, vector<160x128xf32>
    %cst_39 = arith.constant 0.000000e+00 : f32
    %65 = vector.broadcast %cst_39 : f32 to vector<160x128xf32>
    %66 = arith.select %63, %65, %64 : vector<160x128xi1>, vector<160x128xf32>
    %c15_i32 = arith.constant 15 : i32
    %67 = vector.broadcast %c15_i32 : i32 to vector<160x128xi32>
    %68 = arith.cmpi eq, %60, %67 : vector<160x128xi32>
    %c9 = arith.constant 9 : index
    %c0_40 = arith.constant 0 : index
    %69 = vector.load %arg14[%c9, %c0_40] : memref<176x128xf32, #tpu.memory_space<vmem>>, vector<160x128xf32>
    %cst_41 = arith.constant 0.000000e+00 : f32
    %70 = vector.broadcast %cst_41 : f32 to vector<160x128xf32>
    %71 = arith.select %68, %70, %69 : vector<160x128xi1>, vector<160x128xf32>
    %72 = arith.truncf %66 : vector<160x128xf32> to vector<160x128xbf16>
    %c0_42 = arith.constant 0 : index
    %c0_43 = arith.constant 0 : index
    %73 = vector.load %arg13[%c0_42, %c0_43] : memref<160x384xbf16, #tpu.memory_space<vmem>>, vector<160x128xbf16>
    tpu.vector_store %arg13[%c0_42, %c0_43], %72 {strides = array<i32>} : memref<160x384xbf16, #tpu.memory_space<vmem>>, vector<160x128xbf16>,
    %74 = arith.truncf %61 : vector<160x128xf32> to vector<160x128xbf16>
    %c0_44 = arith.constant 0 : index
    %c128 = arith.constant 128 : index
    %75 = vector.load %arg13[%c0_44, %c128] : memref<160x384xbf16, #tpu.memory_space<vmem>>, vector<160x128xbf16>
    tpu.vector_store %arg13[%c0_44, %c128], %74 {strides = array<i32>} : memref<160x384xbf16, #tpu.memory_space<vmem>>, vector<160x128xbf16>,
    %76 = arith.truncf %71 : vector<160x128xf32> to vector<160x128xbf16>
    %c0_45 = arith.constant 0 : index
    %c256 = arith.constant 256 : index
    %77 = vector.load %arg13[%c0_45, %c256] : memref<160x384xbf16, #tpu.memory_space<vmem>>, vector<160x128xbf16>
    tpu.vector_store %arg13[%c0_45, %c256], %76 {strides = array<i32>} : memref<160x384xbf16, #tpu.memory_space<vmem>>, vector<160x128xbf16>,
    %c0_46 = arith.constant 0 : index
    %c0_47 = arith.constant 0 : index
    %78 = vector.load %arg9[%c0_46, %c0_47] : memref<1x128xf32, #tpu.memory_space<vmem>>, vector<1x128xf32>
    %c0_48 = arith.constant 0 : index
    %c0_49 = arith.constant 0 : index
    %79 = vector.load %arg13[%c0_48, %c0_49] : memref<160x384xbf16, #tpu.memory_space<vmem>>, vector<128x384xbf16>
    %c0_50 = arith.constant 0 : index
    %c0_51 = arith.constant 0 : index
    %c0_52 = arith.constant 0 : index
    %80 = vector.load %arg8[%c0_50, %c0_51, %c0_52] : memref<3x384x128xbf16, #tpu.memory_space<vmem>>, vector<1x384x128xbf16>
    %81 = vector.shape_cast %80 : vector<1x384x128xbf16> to vector<384x128xbf16>
    %cst_53 = arith.constant dense<0.000000e+00> : vector<128x128xf32>
    %82 = tpu.matmul %79, %81, %cst_53 {dimension_numbers = #tpu.dot_dimension_numbers<[1], [0], [0], [1], [0, 0, 1, 1], [], []>} : vector<128x384xbf16>, vector<384x128xbf16>, vector<128x128xf32> -> vector<128x128xf32>
    %c16 = arith.constant 16 : index
    %c0_54 = arith.constant 0 : index
    %83 = vector.load %arg13[%c16, %c0_54] : memref<160x384xbf16, #tpu.memory_space<vmem>>, vector<128x384xbf16>
    %c1 = arith.constant 1 : index
    %c0_55 = arith.constant 0 : index
    %c0_56 = arith.constant 0 : index
    %84 = vector.load %arg8[%c1, %c0_55, %c0_56] : memref<3x384x128xbf16, #tpu.memory_space<vmem>>, vector<1x384x128xbf16>
    %85 = vector.shape_cast %84 : vector<1x384x128xbf16> to vector<384x128xbf16>
    %cst_57 = arith.constant dense<0.000000e+00> : vector<128x128xf32>
    %86 = tpu.matmul %83, %85, %cst_57 {dimension_numbers = #tpu.dot_dimension_numbers<[1], [0], [0], [1], [0, 0, 1, 1], [], []>} : vector<128x384xbf16>, vector<384x128xbf16>, vector<128x128xf32> -> vector<128x128xf32>
    %87 = arith.addf %82, %86 : vector<128x128xf32>
    %c32 = arith.constant 32 : index
    %c0_58 = arith.constant 0 : index
    %88 = vector.load %arg13[%c32, %c0_58] : memref<160x384xbf16, #tpu.memory_space<vmem>>, vector<128x384xbf16>
    %c2 = arith.constant 2 : index
    %c0_59 = arith.constant 0 : index
    %c0_60 = arith.constant 0 : index
    %89 = vector.load %arg8[%c2, %c0_59, %c0_60] : memref<3x384x128xbf16, #tpu.memory_space<vmem>>, vector<1x384x128xbf16>
    %90 = vector.shape_cast %89 : vector<1x384x128xbf16> to vector<384x128xbf16>
    %cst_61 = arith.constant dense<0.000000e+00> : vector<128x128xf32>
    %91 = tpu.matmul %88, %90, %cst_61 {dimension_numbers = #tpu.dot_dimension_numbers<[1], [0], [0], [1], [0, 0, 1, 1], [], []>} : vector<128x384xbf16>, vector<384x128xbf16>, vector<128x128xf32> -> vector<128x128xf32>
    %92 = arith.addf %87, %91 : vector<128x128xf32>
    %93 = vector.broadcast %78 : vector<1x128xf32> to vector<128x128xf32>
    %94 = arith.addf %92, %93 : vector<128x128xf32>
    %c0_62 = arith.constant 0 : index
    %c0_63 = arith.constant 0 : index
    %95 = vector.load %arg5[%c0_62, %c0_63] : memref<128x128xbf16, #tpu.memory_space<vmem>>, vector<128x128xbf16>
    %c0_64 = arith.constant 0 : index
    %c0_65 = arith.constant 0 : index
    %96 = vector.load %arg6[%c0_64, %c0_65] : memref<128x128xbf16, #tpu.memory_space<vmem>>, vector<128x128xbf16>
    %cst_66 = arith.constant dense<0.000000e+00> : vector<128x128xf32>
    %97 = tpu.matmul %95, %96, %cst_66 {dimension_numbers = #tpu.dot_dimension_numbers<[1], [0], [0], [1], [0, 0, 1, 1], [], []>} : vector<128x128xbf16>, vector<128x128xbf16>, vector<128x128xf32> -> vector<128x128xf32>
    %c0_67 = arith.constant 0 : index
    %c0_68 = arith.constant 0 : index
    %98 = vector.load %arg7[%c0_67, %c0_68] : memref<1x128xf32, #tpu.memory_space<vmem>>, vector<1x128xf32>
    %99 = vector.broadcast %98 : vector<1x128xf32> to vector<128x128xf32>
    %100 = arith.addf %97, %99 : vector<128x128xf32>
    %101 = arith.addf %100, %94 : vector<128x128xf32>
    %cst_69 = arith.constant 0.000000e+00 : f32
    %102 = vector.broadcast %cst_69 : f32 to vector<128x128xf32>
    %103 = arith.maximumf %101, %102 : vector<128x128xf32>
    %c0_70 = arith.constant 0 : index
    %c0_71 = arith.constant 0 : index
    %104 = vector.load %arg12[%c0_70, %c0_71] : memref<128x128xf32, #tpu.memory_space<vmem>>, vector<128x128xf32>
    tpu.vector_store %arg12[%c0_70, %c0_71], %103 {strides = array<i32>} : memref<128x128xf32, #tpu.memory_space<vmem>>, vector<128x128xf32>,
    return
  }
  func.func @transform_0(%arg0: i32, %arg1: i32) -> (i32, i32) {
    %c16_i32 = arith.constant 16 : i32
    %0 = arith.muli %arg0, %c16_i32 : i32
    %c8_i32 = arith.constant 8 : i32
    %1 = arith.muli %arg1, %c8_i32 : i32
    %c1_i32 = arith.constant 1 : i32
    %2 = arith.subi %1, %c1_i32 : i32
    %c0_i32 = arith.constant 0 : i32
    %3 = arith.maxsi %2, %c0_i32 : i32
    %4 = arith.addi %0, %3 : i32
    %c0_i32_0 = arith.constant 0 : i32
    %c0_i32_1 = arith.constant 0 : i32
    return %4, %c0_i32_0 : i32, i32
  }
  func.func @transform_1(%arg0: i32, %arg1: i32) -> (i32, i32) {
    %c2_i32 = arith.constant 2 : i32
    %0 = arith.muli %arg0, %c2_i32 : i32
    %1 = arith.addi %0, %arg1 : i32
    %c0_i32 = arith.constant 0 : i32
    %c0_i32_0 = arith.constant 0 : i32
    return %1, %c0_i32 : i32, i32
  }
  func.func @transform_2(%arg0: i32, %arg1: i32) -> (i32, i32) {
    %c16_i32 = arith.constant 16 : i32
    %0 = arith.muli %arg0, %c16_i32 : i32
    %c1_i32 = arith.constant 1 : i32
    %1 = arith.addi %arg1, %c1_i32 : i32
    %c8_i32 = arith.constant 8 : i32
    %2 = arith.muli %1, %c8_i32 : i32
    %c15_i32 = arith.constant 15 : i32
    %3 = arith.minsi %2, %c15_i32 : i32
    %4 = arith.addi %0, %3 : i32
    %c0_i32 = arith.constant 0 : i32
    %c0_i32_0 = arith.constant 0 : i32
    return %4, %c0_i32 : i32, i32
  }
  func.func @transform_3(%arg0: i32, %arg1: i32) -> (i32, i32) {
    %c2_i32 = arith.constant 2 : i32
    %0 = arith.muli %arg0, %c2_i32 : i32
    %1 = arith.addi %0, %arg1 : i32
    %c0_i32 = arith.constant 0 : i32
    %c0_i32_0 = arith.constant 0 : i32
    return %1, %c0_i32 : i32, i32
  }
  func.func @transform_4(%arg0: i32, %arg1: i32) -> (i32, i32) {
    %c0_i32 = arith.constant 0 : i32
    %c0_i32_0 = arith.constant 0 : i32
    %c0_i32_1 = arith.constant 0 : i32
    return %c0_i32, %c0_i32_0 : i32, i32
  }
  func.func @transform_5(%arg0: i32, %arg1: i32) -> (i32, i32) {
    %c0_i32 = arith.constant 0 : i32
    %c0_i32_0 = arith.constant 0 : i32
    %c0_i32_1 = arith.constant 0 : i32
    return %c0_i32, %c0_i32_0 : i32, i32
  }
  func.func @transform_6(%arg0: i32, %arg1: i32) -> (i32, i32, i32) {
    %c0_i32 = arith.constant 0 : i32
    %c0_i32_0 = arith.constant 0 : i32
    %c0_i32_1 = arith.constant 0 : i32
    %c0_i32_2 = arith.constant 0 : i32
    return %c0_i32, %c0_i32_0, %c0_i32_1 : i32, i32, i32
  }
  func.func @transform_7(%arg0: i32, %arg1: i32) -> (i32, i32) {
    %c0_i32 = arith.constant 0 : i32
    %c0_i32_0 = arith.constant 0 : i32
    %c0_i32_1 = arith.constant 0 : i32
    return %c0_i32, %c0_i32_0 : i32, i32
  }
  func.func @transform_8(%arg0: i32, %arg1: i32) -> (i32, i32) {
    %c0_i32 = arith.constant 0 : i32
    %c0_i32_0 = arith.constant 0 : i32
    %c0_i32_1 = arith.constant 0 : i32
    return %c0_i32, %c0_i32_0 : i32, i32
  }
  func.func @transform_9(%arg0: i32, %arg1: i32) -> (i32, i32) {
    %c0_i32 = arith.constant 0 : i32
    %c0_i32_0 = arith.constant 0 : i32
    %c0_i32_1 = arith.constant 0 : i32
    return %c0_i32, %c0_i32_0 : i32, i32
  }
  func.func @transform_10(%arg0: i32, %arg1: i32) -> (i32, i32) {
    %c2_i32 = arith.constant 2 : i32
    %0 = arith.muli %arg0, %c2_i32 : i32
    %1 = arith.addi %0, %arg1 : i32
    %c0_i32 = arith.constant 0 : i32
    %c0_i32_0 = arith.constant 0 : i32
    return %1, %c0_i32 : i32, i32
  }
}

</mosaic_0001>

<bundles_post_ra>
// kernel: rrb_forward.3
= control target key start
LH: loop header
LB: loop body
LE: loop exit
PB: predicated region body
PF: predicated region fallthrough
CT: control target
= control target key end

     0   :  { %s4076_s13 = smov 0   ;;  %s4078_s14 = smov 0   ;;  %s5172_s0 = inlined_call_operand.vmem [shape: bf16[512,128], index: 0, kind: input, shape index: {}, may-alias: {0,1,2}]   ;;  %s5173_s1 = inlined_call_operand.vmem [shape: bf16[512,128], index: 1, kind: input, shape index: {}, may-alias: {0,1,2}]   ;;  %s5174_s2 = inlined_call_operand.vmem [shape: bf16[512,128], index: 2, kind: input, shape index: {}, may-alias: {0,1,2}]   ;;  %s5175_s3 = inlined_call_operand.vmem [shape: bf16[512,128], index: 3, kind: input, shape index: {}]   ;;  %s5176_s4 = inlined_call_operand.vmem [shape: bf16[128,128], index: 4, kind: input, shape index: {}]   ;;  %s5177_s5 = inlined_call_operand.vmem [shape: f32[1,128], index: 5, kind: input, shape index: {}]   ;;  %s5178_s6 = inlined_call_operand.vmem [shape: bf16[3,384,128], index: 6, kind: input, shape index: {}]   ;;  %s5179_s7 = inlined_call_operand.vmem [shape: f32[1,128], index: 7, kind: input, shape index: {}]   ;;  %s5180_s8 = inlined_call_operand.vmem [shape: f32[1,128], index: 8, kind: input, shape index: {}]   ;;  %s5181_s9 = inlined_call_operand.vmem [shape: f32[1,128], index: 9, kind: input, shape index: {}]   ;;  %s5182_s10 = inlined_call_operand.vmem [shape: f32[512,128], index: 10, kind: output, shape index: {}]  }
   0x1   :  { %s4080_s15 = smov 0   ;;  %s4082_s16 = smov 0  }
   0x2   :  { %s4084_s17 = smov 0  }
   0x3 LB: > { %s29_s18 = sadd.s32 1, %s4009_s15  ;;  %s32_s19 = sadd.s32 1, %s4013_s16  ;;  %s4017_s17 = sphi %s4084_s17, %s20_s17   ;;  %s4013_s16 = sphi %s4082_s16, %s5231_s16   ;;  %s4009_s15 = sphi %s4080_s15, %s5230_s15   ;;  %s4005_s14 = sphi %s4078_s14, %s5229_s14   ;;  %s4001_s13 = sphi %s4076_s13, %s5228_s13  }
   0x4   : > { %p30_p0 = scmp.ge.s32.totalorder %s29_s18, 2  ;;  %p2859_p1 = scmp.ge.s32.totalorder %s4017_s17, 1 }
   0x5   : > { %p426_p2 = scmp.lt.s32.totalorder %s4017_s17, 5 }
   0x6   : > { %s5233_s18 = smov (%p30_p0, %s29_s18), 0  ;;  %s5235_s19 = smov (!%p30_p0, %s32_s19), %s4013_s16 }
   0x7   : > { %p427_p3 = pnand %p2859_p1, %p426_p2  ;;  %p34_p4 = scmp.ge.s32.totalorder %s5235_s19, 2 }
   0x8   : > { %v3891_v0 = vld [vmem:[%s5178_s6 + $0x100] sm:$0xff] (!%p427_p3)   ;;  %v3895_v4 = vld [vmem:[%s5178_s6 + $0x108] sm:$0xff] (!%p427_p3)   ;;  %s5183_s30 = sshll.u32 (!%p427_p3), %s4001_s13, 3  ;;  %s2865_s20 = sshll.u32 (!%p427_p3), %s4005_s14, 1  ;;  %v738_v6 = vlaneseq (!%p427_p3)  ;;  %v3899_v9 = vld [vmem:[%s5178_s6 + $0x110] sm:$0xff] (!%p427_p3)   ;;  %v4019_v28 = vmov (!%p427_p3), 0.0  }
   0x9   : > { %s5237_s19 = smov (%p34_p4, %s5235_s19), 0  ;;  %430 = sbr.rel (%p427_p3) target bundleno = 423 (0x1a7), region = 60 }
   0xa   : > { %v3892_v1 = vld [vmem:[%s5178_s6 + $0xc0] sm:$0xff] (!%p427_p3)   ;;  %3317 = vmatprep.subr.bf16.mxu0 (!%p427_p3), %v3891_v0  ;;  %v3896_v5 = vld [vmem:[%s5178_s6 + $0xc8] sm:$0xff] (!%p427_p3)   ;;  %s2862_s25 = sadd.s32 (!%p427_p3), 4294967295, %s5183_s30  ;;  %s4142_s28 = sadd.s32 (!%p427_p3), %s4001_s13, %s2865_s20  ;;  %v3900_v10 = vld [vmem:[%s5178_s6 + $0xd0] sm:$0xff] (!%p427_p3)   ;;  %v4148_v11 = vshrl.u32 (!%p427_p3), %v738_v6, 7  ;;  %568 = vst [vmem:[#allocation3] sm:$0xff] (!%p427_p3), %v4019_v28 }
   0xb   : > { %v3893_v2 = vld [vmem:[%s5178_s6 + $0x40] sm:$0xff] (!%p427_p3)   ;;  %3318 = vmatpush3.bf16.msra.mxu0 (!%p427_p3), %v3892_v1  ;;  %v3897_v7 = vld [vmem:[%s5178_s6 + $0x48] sm:$0xff] (!%p427_p3)   ;;  %s5184_s29 = sshll.u32 (!%p427_p3), %s4005_s14, 4  ;;  %v3901_v12 = vld [vmem:[%s5178_s6 + $0x50] sm:$0xff] (!%p427_p3)   ;;  %p500_p5 = scmp.gt.s32.totalorder (!%p427_p3), %s2862_s25, 0  ;;  %569 = vst [vmem:[#allocation3 + $0xa8] sm:$0xff] (!%p427_p3), %v4019_v28 }
   0xc   : > { %v3894_v3 = vld [vmem:[%s5178_s6] sm:$0xff] (!%p427_p3)   ;;  %3397 = vmatprep.subr.bf16.mxu1 (!%p427_p3), %v3893_v2  ;;  %3319 = vmatprep.subr.bf16.mxu0 (!%p427_p3), %v3895_v4  ;;  %v3898_v8 = vld [vmem:[%s5178_s6 + $0x8] sm:$0xff] (!%p427_p3)   ;;  %v3902_v13 = vld [vmem:[%s5178_s6 + $0x10] sm:$0xff] (!%p427_p3)   ;;  %s2866_s24 = sshll.u32 (!%p427_p3), %s4142_s28, 4  ;;  %v4164_v16 = vadd.s32 (!%p427_p3), 16, %v4148_v11  ;;  %v4208_v30 = vadd.s32 (!%p427_p3), 32, %v4148_v11 }
   0xd   : > { %3398 = vmatpush3.bf16.msra.mxu1 (!%p427_p3), %v3894_v3  ;;  %v3903_v14 = vld [vmem:[%s5178_s6 + $0x118] sm:$0xff] (!%p427_p3)   ;;  %p518_p6 = scmp.lt.s32.totalorder (!%p427_p3), %s2866_s24, 63  ;;  %v3907_v19 = vld [vmem:[%s5178_s6 + $0x120] sm:$0xff] (!%p427_p3)   ;;  %v3911_v24 = vld [vmem:[%s5178_s6 + $0x128] sm:$0xff] (!%p427_p3)   ;;  %v4222_v35 = vadd.s32 (!%p427_p3), 48, %v4148_v11  ;;  %p564_p8 = scmp.gt.s32.totalorder (!%p427_p3), %s4001_s13, 0 }
   0xe   : > { %3399 = vmatprep.subr.bf16.mxu1 (!%p427_p3), %v3897_v7  ;;  %v3904_v15 = vld [vmem:[%s5178_s6 + $0xd8] sm:$0xff] (!%p427_p3)   ;;  %v3908_v20 = vld [vmem:[%s5178_s6 + $0xe0] sm:$0xff] (!%p427_p3)   ;;  %v777_v21 = vand.u32 (!%p427_p3), 15, %v4164_v16  ;;  %v3912_v25 = vld [vmem:[%s5178_s6 + $0xe8] sm:$0xff] (!%p427_p3)   ;;  %v791_v33 = vand.u32 (!%p427_p3), 15, %v4208_v30  ;;  %v4249_v41 = vadd.s32 (!%p427_p3), 64, %v4148_v11 }
   0xf   : > { %3320 = vmatpush3.bf16.msra.mxu0 (!%p427_p3), %v3896_v5  ;;  %v3905_v17 = vld [vmem:[%s5178_s6 + $0x58] sm:$0xff] (!%p427_p3)   ;;  %v3909_v22 = vld [vmem:[%s5178_s6 + $0x60] sm:$0xff] (!%p427_p3)   ;;  %v3913_v26 = vld [vmem:[%s5178_s6 + $0x68] sm:$0xff] (!%p427_p3)   ;;  %v805_v39 = vand.u32 (!%p427_p3), 15, %v4222_v35  ;;  %v4273_v52 = vadd.s32 (!%p427_p3), 80, %v4148_v11  ;;  %v763_v55 = vand.u32 (!%p427_p3), 15, %v4148_v11 }
  0x10   : > { %3321 = vmatprep.subr.bf16.mxu0 %v3899_v9  ;;  %s5239_s25 = smov (!%p500_p5, %s2862_s25), 0  ;;  %v3906_v18 = vld [vmem:[%s5178_s6 + $0x18] sm:$0xff]   ;;  %s5241_s24 = smov (!%p518_p6, %s2866_s24), 63  ;;  %v3910_v23 = vld [vmem:[%s5178_s6 + $0x20] sm:$0xff]   ;;  %v3914_v27 = vld [vmem:[%s5178_s6 + $0x28] sm:$0xff]   ;;  %v819_v51 = vand.u32 15, %v4249_v41 }
  0x11   : > { %3400 = vmatpush3.bf16.msra.mxu1 %v3898_v8  ;;  %s502_s28 = sadd.s32 %s5184_s29, %s5239_s25  ;;  %s2867_s22 = sshll.u32 %s5241_s24, 2  ;;  %v3915_v29 = vld [vmem:[%s5178_s6 + $0x130] sm:$0xff]   ;;  %v3919_v36 = vld [vmem:[%s5178_s6 + $0x138] sm:$0xff]   ;;  %v4255_v43 = vld [vmem:[%s5180_s8] ss:$0 sm:$0xff]  ;;  %vm4294_vm0 = vcmp.ne.s32.totalorder %v777_v21, 0 }
  0x12   : > { %3401 = vmatprep.subr.bf16.mxu1 %v3901_v12  ;;  %s2863_s26 = sshll.u32 %s502_s28, 1  ;;  %v3916_v31 = vld [vmem:[%s5178_s6 + $0xf0] sm:$0xff]   ;;  %v3920_v37 = vld [vmem:[%s5178_s6 + $0xf8] sm:$0xff]   ;;  %s4235_s12 = scalar_lea.vmem %s5173_s1, %s2867_s22  ;;  %v4260_v46 = vld [vmem:[%s5181_s9] ss:$0 sm:$0xff]  ;;  %v833_v5 = vand.u32 15, %v4273_v52 }
  0x13   : > { %3322 = vmatpush3.bf16.msra.mxu0 %v3900_v10  ;;  %p504_p7 = scmp.lt.s32.totalorder %s2863_s26, 63  ;;  %v3917_v32 = vld [vmem:[%s5178_s6 + $0x70] sm:$0xff]   ;;  %v3921_v38 = vld [vmem:[%s5178_s6 + $0x78] sm:$0xff]   ;;  %v3083_v42 = vld [vmem:[%s4235_s12] sm:$0xff]   ;;  %v4302_v6 = vadd.s32 96, %v4148_v11  ;;  %vm4314_vm1 = vcmp.ne.s32.totalorder %v763_v55, 0  ;;  %s4700_s20 = scalar_lea.vmem %s5175_s3, %s2867_s22 }
  0x14   : > { %3323 = vmatprep.subr.bf16.mxu0 %v3903_v14  ;;  %v3918_v34 = vld [vmem:[%s5178_s6 + $0x30] sm:$0xff]   ;;  %v3922_v40 = vld [vmem:[%s5178_s6 + $0x38] sm:$0xff]   ;;  %v3084_v44 = vunpack.c.l.bf16 %v3083_v42  ;;  %v3085_v45 = vunpack.c.h.bf16 %v3083_v42  ;;  %s4264_s21 = scalar_select %p564_p8, 1.0, 0.0  ;;  %v4269_v49 = vld [vmem:[%s5178_s6 + $0x140] sm:$0xff]   ;;  %vm4020_vm2 = vmmov 1  }
  0x15   : > { %3402 = vmatpush3.bf16.msra.mxu1 %v3902_v13  ;;  %s5243_s26 = smov (!%p504_p7, %s2863_s26), 63  ;;  %v4281_v56 = vld [vmem:[%s5178_s6 + $0x80] sm:$0xff]   ;;  %v3118_v60 = vld [vmem:[%s4235_s12 + $0x8] sm:$0xff]   ;;  %v3119_v4 = vld [vmem:[%s4235_s12 + $0x10] sm:$0xff]   ;;  %s5193_s25 = sshll.u32 %s4001_s13, 3  ;;  %vm4420_vm5 = vcmp.ne.s32.totalorder %v791_v33, 0 }
  0x16   : > { %3403 = vmatprep.subr.bf16.mxu1 %v3905_v17  ;;  %s2864_s27 = sshll.u32 %s5243_s26, 2  ;;  %v638_v53 = vmul.f32 %v3084_v44, %v4255_v43  ;;  %v639_v54 = vmul.f32 %v3085_v45, %v4255_v43  ;;  %v594_v58 = vstv %s4264_s21  ;;  %v3088_v63 = vunpack.c.l.bf16 %v3118_v60  ;;  %vm4346_vm3 = vmpackc.low %vm4020_vm2, %vm4294_vm0  ;;  %s4415_s21 = sadd.s32 8, %s5193_s25  ;;  %v3975_v52 = vld [vmem:[%s4700_s20 + $0x20] sm:$0xff]  }
  0x17   : > { %3324 = vmatpush3.bf16.msra.mxu0 %v3904_v15  ;;  %s507_s29 = scalar_lea.vmem %s5172_s0, %s2864_s27  ;;  %v3089_v0 = vunpack.c.h.bf16 %v3118_v60  ;;  %v3092_v14 = vunpack.c.l.bf16 %v3119_v4  ;;  %v3093_v15 = vunpack.c.h.bf16 %v3119_v4  ;;  %vm4358_vm4 = vmpackc.low %vm4020_vm2, %vm4314_vm1  ;;  %v4369_v4 = vadd.s32 112, %v4148_v11  ;;  %p528_p9 = scmp.lt.s32.totalorder %s4415_s21, 15 }
  0x18   : > { %3325 = vmatprep.subr.bf16.mxu0 %v3907_v19  ;;  %v3079_v47 = vld [vmem:[%s507_s29] sm:$0xff]   ;;  %v661_v61 = vadd.f32 %v4260_v46, %v638_v53  ;;  %v662_v62 = vadd.f32 %v4260_v46, %v639_v54  ;;  %v640_v9 = vmul.f32 %v3088_v63, %v4255_v43  ;;  %v3120_v19 = vld [vmem:[%s4235_s12 + $0x18] sm:$0xff]   ;;  %v3122_v53 = vld [vmem:[%s4235_s12 + $0x28] sm:$0xff]   ;;  %vm3835_vm7 = vcmp.ne.s32.totalorder %v805_v39, 0  ;;  %s5198_s23 = sshll.u32 %s4005_s14, 4  ;;  %p566_p11 = scmp.lt.s32.totalorder %s4001_s13, 1 }
  0x19   : > { %3404 = vmatpush3.bf16.msra.mxu1 %v3906_v18  ;;  %v3081_v48 = vunpack.c.h.bf16 %v3079_v47  ;;  %v3080_v50 = vunpack.c.l.bf16 %v3079_v47  ;;  %v641_v10 = vmul.f32 %v3089_v0, %v4255_v43  ;;  %v3104_v55 = vunpack.c.l.bf16 %v3122_v53  ;;  %vm4454_vm6 = vmpackc.low %vm4020_vm2, %vm4420_vm5  ;;  %s5245_s21 = smov (!%p528_p9, %s4415_s21), 15  ;;  %v3967_v63 = vld [vmem:[%s5176_s4 + $0x20] sm:$0xff]   ;;  %s2877_s13 = sshll.u32 %s5241_s24, 3 }
  0x1a   : > { %3405 = vmatprep.subr.bf16.mxu1 %v3909_v22  ;;  %v677_v7 = vmax.f32 %v661_v61, 0.0  ;;  %v678_v8 = vmax.f32 %v662_v62, 0.0  ;;  %v663_v17 = vadd.f32 %v4260_v46, %v640_v9  ;;  %v642_v22 = vmul.f32 %v3092_v14, %v4255_v43  ;;  %s4518_s29 = sadd.s32 %s5198_s23, %s5245_s21  ;;  %vm4521_vm8 = vmpackc.low %vm4020_vm2, %vm3835_vm7  ;;  %s5118_s24 = scalar_lea.vmem %s5182_s10, %s2877_s13 }
  0x1b   : > { %3326 = vmatpush3.bf16.msra.mxu0 %v3908_v20  ;;  %v582_v57 = vmul.f32 %v3081_v48, %v4255_v43  ;;  %v581_v59 = vmul.f32 %v3080_v50, %v4255_v43  ;;  %v664_v18 = vadd.f32 %v4260_v46, %v641_v10  ;;  %v4511_v35 = vadd.s32 72, %v4148_v11  ;;  %s2870_s30 = sshll.u32 %s4518_s29, 1 }
  0x1c   : > { %3327 = vmatprep.subr.bf16.mxu0 %v3911_v24  ;;  %693 = vst [vmem:[#allocation3 + $0x18] sm:$0xff] %v677_v7  ;;  %694 = vst [vmem:[#allocation3 + $0x20] sm:$0xff] %v678_v8  ;;  %v4306_v16 = vpack.c.bf16 %v678_v8, %v677_v7  ;;  %v679_v24 = vmax.f32 %v663_v17, 0.0  ;;  %vm3836_vm9 = vcmp.ne.s32.totalorder %v819_v51, 0  ;;  %p4565_p10 = scmp.lt.s32.totalorder %s2870_s30, 63  ;;  %v4570_v41 = vadd.s32 136, %v4148_v11 }
  0x1d   : > { %3406 = vmatpush3.bf16.msra.mxu1 %v3910_v23  ;;  %v591_v1 = vadd.f32 %v4260_v46, %v582_v57  ;;  %v590_v3 = vadd.f32 %v4260_v46, %v581_v59  ;;  %v643_v23 = vmul.f32 %v3093_v15, %v4255_v43  ;;  %v3105_v57 = vunpack.c.h.bf16 %v3122_v53  ;;  %v3931_v59 = vld [vmem:[%s5178_s6 + $0x160] sm:$0xff]   ;;  %v3936_v51 = vld [vmem:[%s5178_s6 + $0xb0] sm:$0xff]   ;;  %vm4576_vm10 = vmpackc.low %vm4020_vm2, %vm3836_vm9  ;;  %s567_s23 = scalar_select %p566_p11, 1.0, 0.0 }
  0x1e   : > { %3407 = vmatprep.subr.bf16.mxu1 %v3913_v26  ;;  %1500 = vmatprep.mubr.bf16.mxu0 %v4306_v16  ;;  %v3096_v26 = vunpack.c.l.bf16 %v3120_v19  ;;  %695 = vst [vmem:[#allocation3 + $0x28] sm:$0xff] %v679_v24  ;;  %s5247_s30 = smov (!%p4565_p10, %s2870_s30), 63  ;;  %vm3837_vm11 = vcmp.ne.s32.totalorder %v833_v5, 0 }
  0x1f   : > { %3328 = vmatpush3.bf16.msra.mxu0 %v3912_v25  ;;  %v593_v12 = vmax.f32 %v591_v1, 0.0  ;;  %v592_v13 = vmax.f32 %v590_v3, 0.0  ;;  %v680_v25 = vmax.f32 %v664_v18, 0.0  ;;  %v648_v1 = vmul.f32 %v3104_v55, %v4255_v43  ;;  %v3123_v3 = vld [vmem:[%s4235_s12 + $0x30] sm:$0xff]   ;;  %v3925_v18 = vld [vmem:[%s5178_s6 + $0x148] sm:$0xff]   ;;  %s2871_s25 = sshll.u32 %s5247_s30, 2  ;;  %vm4621_vm12 = vmpackc.low %vm4020_vm2, %vm3837_vm11 }
  0x20   : > { %3329 = vmatprep.subr.bf16.mxu0 %v3915_v29  ;;  %v649_v2 = vmul.f32 %v3105_v57, %v4255_v43  ;;  %v3109_v14 = vunpack.c.h.bf16 %v3123_v3  ;;  %v3124_v29 = vld [vmem:[%s4235_s12 + $0x38] sm:$0xff]   ;;  %v4442_v57 = vadd.s32 128, %v4148_v11  ;;  %s535_s30 = scalar_lea.vmem %s5174_s2, %s2871_s25 }
  0x21   : > { %3408 = vmatpush3.bf16.msra.mxu1 %v3914_v27  ;;  %v596_v20 = vmul.f32 %v594_v58, %v593_v12  ;;  %v595_v21 = vmul.f32 %v594_v58, %v592_v13  ;;  %v3097_v27 = vunpack.c.h.bf16 %v3120_v19  ;;  %696 = vst [vmem:[#allocation3 + $0x30] sm:$0xff] %v680_v25  ;;  %v4371_v10 = vpack.c.bf16 %v680_v25, %v679_v24  ;;  %v3926_v19 = vld [vmem:[%s5178_s6 + $0x88] sm:$0xff]  }
  0x22   : > { %3409 = vmatprep.subr.bf16.mxu1 %v3917_v32  ;;  %v4322_v32 = vadd.f32 %v4260_v46, %v643_v23  ;;  %v3108_v13 = vunpack.c.l.bf16 %v3123_v3  ;;  %v4391_v23 = vadd.f32 %v4260_v46, %v649_v2  ;;  %v651_v25 = vmul.f32 %v3109_v14, %v4255_v43 }
  0x23   : > { %3330 = vmatpush3.bf16.msra.mxu0 %v3916_v31  ;;  %598 = vst [vmem:[#allocation3 + $0x10] sm:$0xff] %v596_v20  ;;  %597 = vst [vmem:[#allocation3 + $0x8] sm:$0xff] %v595_v21  ;;  %v1159_v28 = vpack.c.bf16 %v596_v20, %v595_v21  ;;  %v4319_v31 = vadd.f32 %v4260_v46, %v642_v22  ;;  %v1042_v58 = vld [vmem:[#allocation3 + $0x1f] sm:$0xff]  ;;  %v4386_v21 = vadd.f32 %v4260_v46, %v648_v1 }
  0x24   : > { %3331 = vmatprep.subr.bf16.mxu0 %v3919_v36  ;;  %v644_v36 = vmul.f32 %v3096_v26, %v4255_v43  ;;  %v682_v44 = vmax.f32 %v4322_v32, 0.0  ;;  %v650_v24 = vmul.f32 %v3108_v13, %v4255_v43 }
  0x25   : > { %3410 = vmatpush3.bf16.msra.mxu1 %v3918_v34  ;;  %v3121_v34 = vld [vmem:[%s4235_s12 + $0x20] sm:$0xff]   ;;  %1838 = vmatprep.mubr.bf16.mxu1 %v1159_v28  ;;  %v681_v42 = vmax.f32 %v4319_v31, 0.0  ;;  %v861_v28 = vand.u32 15, %v4369_v4  ;;  %v3929_v31 = vld [vmem:[%s5178_s6 + $0x158] sm:$0xff]  }
  0x26   : > { %3411 = vmatprep.subr.bf16.mxu1 %v3921_v38  ;;  %v3100_v38 = vunpack.c.l.bf16 %v3121_v34  ;;  %v3101_v45 = vunpack.c.h.bf16 %v3121_v34  ;;  %v4331_v47 = vadd.f32 %v4260_v46, %v644_v36  ;;  %698 = vst [vmem:[#allocation3 + $0x40] sm:$0xff] %v682_v44  ;;  %v1043_v22 = vld [vmem:[#allocation3 + $0x27] sm:$0xff]  ;;  %v688_v34 = vmax.f32 %v4391_v23, 0.0 }
  0x27   : > { %3332 = vmatpush3.bf16.msra.mxu0 %v3920_v37  ;;  %v645_v37 = vmul.f32 %v3097_v27, %v4255_v43  ;;  %697 = vst [vmem:[#allocation3 + $0x38] sm:$0xff] %v681_v42  ;;  %v687_v27 = vmax.f32 %v4386_v21, 0.0  ;;  %v4408_v36 = vadd.f32 %v4260_v46, %v650_v24  ;;  %v4462_v1 = vpack.c.bf16 %v682_v44, %v681_v42  ;;  %v3930_v44 = vld [vmem:[%s5178_s6 + $0x98] sm:$0xff]   ;;  %v3933_v24 = vld [vmem:[%s5178_s6 + $0x168] sm:$0xff]  }
  0x28   : > { %3573 = vmatprep.subr.bf16.mxu0 %v4269_v49  ;;  %v646_v50 = vmul.f32 %v3100_v38, %v4255_v43  ;;  %v647_v54 = vmul.f32 %v3101_v45, %v4255_v43  ;;  %v683_v60 = vmax.f32 %v4331_v47, 0.0  ;;  %v1044_v26 = vld [vmem:[#allocation3 + $0x2f] sm:$0xff]  ;;  %v3112_v38 = vunpack.c.l.bf16 %v3124_v29  ;;  %704 = vst [vmem:[#allocation3 + $0x70] sm:$0xff] %v688_v34 }
  0x29   : > { %3412 = vmatpush3.bf16.msra.mxu1 %v3922_v40  ;;  %v847_v40 = vand.u32 15, %v4302_v6  ;;  %v4334_v48 = vadd.f32 %v4260_v46, %v645_v37  ;;  %v4411_v37 = vadd.f32 %v4260_v46, %v651_v25  ;;  %v3927_v45 = vld [vmem:[%s5178_s6 + $0x150] sm:$0xff]   ;;  %703 = vst [vmem:[#allocation3 + $0x68] sm:$0xff] %v687_v27  ;;  %v4432_v53 = vpack.c.bf16 %v1044_v26, %v1043_v22  ;;  %v3934_v47 = vld [vmem:[%s5178_s6 + $0xa8] sm:$0xff]  }
  0x2a   : > { %3605 = vmatprep.subr.bf16.mxu1 %v4281_v56  ;;  %v4353_v62 = vadd.f32 %v4260_v46, %v646_v50  ;;  %v4363_v0 = vadd.f32 %v4260_v46, %v647_v54  ;;  %v1041_v7 = vld [vmem:[#allocation3 + $0x17] sm:$0xff]  ;;  %v1039_v8 = vld [vmem:[#allocation3 + $0x7] sm:$0xff]  ;;  %v1040_v9 = vld [vmem:[#allocation3 + $0xf] sm:$0xff]  ;;  %699 = vst [vmem:[#allocation3 + $0x48] sm:$0xff] %v683_v60  ;;  %v689_v30 = vmax.f32 %v4408_v36, 0.0  ;;  %v652_v54 = vmul.f32 %v3112_v38, %v4255_v43 }
  0x2b   : > { %v684_v61 = vmax.f32 %v4334_v48, 0.0  ;;  %v3127_v15 = vpack.c.bf16 %v1042_v58, %v1041_v7  ;;  %v3191_v17 = vpack.c.bf16 %v1040_v9, %v1039_v8  ;;  %v3928_v50 = vld [vmem:[%s5178_s6 + $0x90] sm:$0xff]   ;;  %v690_v33 = vmax.f32 %v4411_v37, 0.0 }
  0x2c   : > { %v685_v12 = vmax.f32 %v4353_v62, 0.0  ;;  %v686_v20 = vmax.f32 %v4363_v0, 0.0  ;;  %v4445_v58 = vadd.s32 24, %v4148_v11  ;;  %705 = vst [vmem:[#allocation3 + $0x78] sm:$0xff] %v689_v30  ;;  %v4469_v2 = vadd.f32 %v4260_v46, %v652_v54 }
  0x2d   : > { %700 = vst [vmem:[#allocation3 + $0x50] sm:$0xff] %v684_v61  ;;  %3128 = vmatmul.mubr.msk.bf16.vlgmr.msra.gmra.mrb[0].mxu0 %vm4346_vm3, %v3127_v15  ;;  %3192 = vmatmul.mubr.msk.bf16.vlgmr.msra.gmra.mrb[0].mxu1 %vm4358_vm4, %v3191_v17  ;;  %706 = vst [vmem:[#allocation3 + $0x80] sm:$0xff] %v690_v33  ;;  %v875_v42 = vand.u32 15, %v4442_v57  ;;  %v3932_v17 = vld [vmem:[%s5178_s6 + $0xa0] sm:$0xff]   ;;  %v4529_v22 = vpack.c.bf16 %v684_v61, %v683_v60  ;;  %v4535_v25 = vadd.s32 88, %v4148_v11  ;;  %v4538_v26 = vadd.s32 104, %v4148_v11 }
  0x2e   : > { %701 = vst [vmem:[#allocation3 + $0x58] sm:$0xff] %v685_v12  ;;  %702 = vst [vmem:[#allocation3 + $0x60] sm:$0xff] %v686_v20  ;;  %3574 = vmatpush3.bf16.msra.mxu0 %v4269_v49  ;;  %1508 = vmatprep.mubr.bf16.mxu0 %v4371_v10  ;;  %v691_v3 = vmax.f32 %v4469_v2, 0.0  ;;  %v784_v7 = vand.u32 15, %v4445_v58  ;;  %v1045_v13 = vld [vmem:[#allocation3 + $0x37] sm:$0xff]  ;;  %v1046_v14 = vld [vmem:[#allocation3 + $0x3f] sm:$0xff]  ;;  %v4629_v5 = vpack.c.bf16 %v688_v34, %v687_v27  ;;  %v733_v37 = vstv %s567_s23 }
  0x2f   : > { %3606 = vmatpush3.bf16.msra.mxu1 %v4281_v56  ;;  %3575 = vmatprep.subr.bf16.mxu0 %v3925_v18  ;;  %v3113_v56 = vunpack.c.h.bf16 %v3124_v29  ;;  %v4513_v39 = vpack.c.bf16 %v1046_v14, %v1045_v13  ;;  %v826_v29 = vand.u32 15, %v4511_v35  ;;  %v4552_v48 = vadd.s32 120, %v4148_v11  ;;  %v3935_v49 = vld [vmem:[%s5178_s6 + $0x170] sm:$0xff]   ;;  %v3938_v13 = vld [vmem:[%s5178_s6 + $0xb8] sm:$0xff]   ;;  %v3115_v27 = vld [vmem:[%s535_s30] sm:$0xff]  }
  0x30   : > { %1846 = vmatprep.mubr.bf16.mxu1 %v4306_v16  ;;  %3607 = vmatprep.subr.bf16.mxu1 %v3926_v19  ;;  %v4448_v16 = vadd.s32 40, %v4148_v11  ;;  %707 = vst [vmem:[#allocation3 + $0x88] sm:$0xff] %v691_v3  ;;  %v840_v38 = vand.u32 15, %v4535_v25  ;;  %v1052_v23 = vld [vmem:[#allocation3 + $0x6f] sm:$0xff]  ;;  %vm3838_vm13 = vcmp.ne.s32.totalorder %v847_v40, 0  ;;  %v3116_v34 = vunpack.c.l.bf16 %v3115_v27 }
  0x31   : > { %v653_v55 = vmul.f32 %v3113_v56, %v4255_v43  ;;  %v1047_v60 = vld [vmem:[#allocation3 + $0x47] sm:$0xff]  ;;  %v868_v54 = vand.u32 15, %v4552_v48  ;;  %vm4649_vm14 = vmpackc.low %vm4020_vm2, %vm3838_vm13  ;;  %vm3839_vm15 = vcmp.ne.s32.totalorder %v861_v28, 0  ;;  %vm3840_vm1 = vcmp.ne.s32.totalorder %v875_v42, 0 }
  0x32   : > { %3576 = vmatpush3.bf16.msra.mxu0 %v3925_v18  ;;  %v798_v8 = vand.u32 15, %v4448_v16  ;;  %v720_v6 = vmul.f32 %v3116_v34, %v4255_v43  ;;  %vm4681_vm0 = vmpackc.low %vm4020_vm2, %vm3839_vm15  ;;  %v1103_v58 = vld [vmem:[#allocation3 + $0x29] sm:$0xff] }
  0x33   : > { %3608 = vmatpush3.bf16.msra.mxu1 %v3926_v19  ;;  %3577 = vmatprep.subr.bf16.mxu0 %v3927_v45  ;;  %v4475_v32 = vadd.f32 %v4260_v46, %v653_v55  ;;  %v4587_v55 = vpack.c.bf16 %v686_v20, %v685_v12  ;;  %v3939_v12 = vld [vmem:[%s5178_s6 + $0x1c0] sm:$0xff]   ;;  %v1053_v36 = vld [vmem:[#allocation3 + $0x77] sm:$0xff]  ;;  %vm4715_vm5 = vmpackc.low %vm4020_vm2, %vm3840_vm1 }
  0x34   : > { %3609 = vmatprep.subr.bf16.mxu1 %v3928_v50  ;;  %v1048_v61 = vld [vmem:[#allocation3 + $0x4f] sm:$0xff]  ;;  %v4616_v20 = vld [vmem:[%s5178_s6 + $0x200] sm:$0xff]   ;;  %vm3842_vm11 = vcmp.ne.s32.totalorder %v798_v8, 15 }
  0x35   : > { %3132 = vmatmul.mubr.msk.bf16.gmra.mrb[4].mxu0 %vm4454_vm6, %v4432_v53  ;;  %3196 = vmatmul.mubr.msk.bf16.gmra.mrb[4].mxu1 %vm4346_vm3, %v3127_v15  ;;  %v692_v9 = vmax.f32 %v4475_v32, 0.0  ;;  %v4505_v15 = vadd.s32 56, %v4148_v11  ;;  %v4580_v56 = vpack.c.bf16 %v1048_v61, %v1047_v60  ;;  %v1049_v62 = vld [vmem:[#allocation3 + $0x57] sm:$0xff]  ;;  %v1050_v0 = vld [vmem:[#allocation3 + $0x5f] sm:$0xff]  ;;  %v1051_v21 = vld [vmem:[#allocation3 + $0x67] sm:$0xff]  ;;  %v729_v60 = vadd.f32 %v4260_v46, %v720_v6 }
  0x36   : > { %1516 = vmatprep.mubr.bf16.mxu0 %v4462_v1  ;;  %1854 = vmatprep.mubr.bf16.mxu1 %v4371_v10  ;;  %v4618_v14 = vpack.c.bf16 %v1050_v0, %v1049_v62  ;;  %v1101_v32 = vld [vmem:[#allocation3 + $0x19] sm:$0xff]  ;;  %vm3841_vm3 = vcmp.ne.s32.totalorder %v784_v7, 15  ;;  %v1104_v7 = vld [vmem:[#allocation3 + $0x31] sm:$0xff]  ;;  %v1106_v6 = vld [vmem:[#allocation3 + $0x41] sm:$0xff] }
  0x37   : > { %3578 = vmatpush3.bf16.msra.mxu0 %v3927_v45  ;;  %3610 = vmatpush3.bf16.msra.mxu1 %v3928_v50  ;;  %708 = vst [vmem:[#allocation3 + $0x90] sm:$0xff] %v692_v9  ;;  %v812_v18 = vand.u32 15, %v4505_v15  ;;  %v854_v45 = vand.u32 15, %v4538_v26  ;;  %v4689_v4 = vpack.c.bf16 %v692_v9, %v691_v3  ;;  %v1055_v2 = vld [vmem:[#allocation3 + $0x87] sm:$0xff]  ;;  %vm4722_vm7 = vmpackc.low %vm3841_vm3, %vm4020_vm2  ;;  %v4737_v34 = vpack.c.bf16 %v1104_v7, %v1103_v58  ;;  %v1109_v35 = vld [vmem:[#allocation3 + $0x59] sm:$0xff] }
  0x38   : > { %3579 = vmatprep.subr.bf16.mxu0 %v3929_v31  ;;  %3611 = vmatprep.subr.bf16.mxu1 %v3930_v44  ;;  %v1102_v3 = vld [vmem:[#allocation3 + $0x21] sm:$0xff]  ;;  %v1099_v9 = vld [vmem:[#allocation3 + $0x9] sm:$0xff]  ;;  %vm4740_vm13 = vmpackc.low %vm3842_vm11, %vm4020_vm2  ;;  %vm3844_vm3 = vcmp.ne.s32.totalorder %v826_v29, 15 }
  0x39   : > { %v3159_v57 = vpack.c.bf16 %v1102_v3, %v1101_v32  ;;  %vm3843_vm15 = vcmp.ne.s32.totalorder %v812_v18, 15  ;;  %v3942_v16 = vld [vmem:[%s5178_s6 + $0x1c8] sm:$0xff]   ;;  %vm3846_vm11 = vcmp.ne.s32.totalorder %v854_v45, 15  ;;  %v1113_v26 = vld [vmem:[#allocation3 + $0x79] sm:$0xff]  ;;  %v3969_v50 = vld [vmem:[%s5176_s4 + $0x30] sm:$0xff]  }
  0x3a   : > { %v3944_v8 = vld [vmem:[%s5178_s6 + $0x208] sm:$0xff]   ;;  %vm4763_vm1 = vmpackc.low %vm3843_vm15, %vm4020_vm2  ;;  %v3973_v15 = vld [vmem:[%s4700_s20 + $0x10] sm:$0xff]  }
  0x3b   : > { %3580 = vmatpush3.bf16.msra.mxu0 %v3929_v31  ;;  %3612 = vmatpush3.bf16.msra.mxu1 %v3930_v44  ;;  %v3937_v31 = vld [vmem:[%s5178_s6 + $0x178] sm:$0xff]   ;;  %v882_v44 = vand.u32 15, %v4570_v41  ;;  %v3943_v18 = vld [vmem:[%s5178_s6 + $0x188] sm:$0xff]   ;;  %vm4836_vm15 = vmpackc.low %vm3846_vm11, %vm4020_vm2 }
  0x3c   : > { %3581 = vmatprep.subr.bf16.mxu0 %v3931_v59  ;;  %3613 = vmatprep.subr.bf16.mxu1 %v3932_v17  ;;  %v1110_v29 = vld [vmem:[#allocation3 + $0x61] sm:$0xff]  ;;  %v1111_v3 = vld [vmem:[#allocation3 + $0x69] sm:$0xff] }
  0x3d   : > { %3136 = vmatmul.mubr.msk.bf16.gmra.mrb[8].mxu0 %vm4521_vm8, %v4513_v39  ;;  %3200 = vmatmul.mubr.msk.bf16.gmra.mrb[8].mxu1 %vm4454_vm6, %v4432_v53  ;;  %v4803_v32 = vpack.c.bf16 %v1110_v29, %v1109_v35  ;;  %v1114_v45 = vld [vmem:[#allocation3 + $0x81] sm:$0xff]  ;;  %vm3848_vm11 = vcmp.ne.s32.totalorder %v882_v44, 15  ;;  %v3958_v44 = vld [vmem:[%s5178_s6 + $0x1b0] sm:$0xff]  }
  0x3e   : > { %1524 = vmatprep.mubr.bf16.mxu0 %v4529_v22  ;;  %1862 = vmatprep.mubr.bf16.mxu1 %v4462_v1  ;;  %v1056_v0 = vld [vmem:[#allocation3 + $0x8f] sm:$0xff] }
  0x3f   : > { %3582 = vmatpush3.bf16.msra.mxu0 %v3931_v59  ;;  %3614 = vmatpush3.bf16.msra.mxu1 %v3932_v17  ;;  %v3117_v59 = vunpack.c.h.bf16 %v3115_v27  ;;  %v4646_v17 = vpack.c.bf16 %v1052_v23, %v1051_v21  ;;  %v4719_v23 = vpack.c.bf16 %v1056_v0, %v1055_v2  ;;  %v3950_v2 = vld [vmem:[%s5178_s6 + $0x218] sm:$0xff]   ;;  %v3951_v0 = vld [vmem:[%s5178_s6 + $0x1e0] sm:$0xff]   ;;  %v3954_v58 = vld [vmem:[%s5178_s6 + $0x1e8] sm:$0xff]  }
  0x40   : > { %3583 = vmatprep.subr.bf16.mxu0 %v3933_v24  ;;  %3615 = vmatprep.subr.bf16.mxu1 %v3934_v47  ;;  %v3956_v7 = vld [vmem:[%s5178_s6 + $0x228] sm:$0xff]  }
  0x41   : > { %v721_v40 = vmul.f32 %v3117_v59, %v4255_v43  ;;  %v731_v43 = vmax.f32 %v729_v60, 0.0  ;;  %v1105_v59 = vld [vmem:[#allocation3 + $0x39] sm:$0xff]  ;;  %v3964_v35 = vld [vmem:[%s5176_s4 + $0x8] sm:$0xff]  }
  0x42   : > { %v3940_v60 = vld [vmem:[%s5178_s6 + $0x180] sm:$0xff]  }
  0x43   : > { %3584 = vmatpush3.bf16.msra.mxu0 %v3933_v24  ;;  %3616 = vmatpush3.bf16.msra.mxu1 %v3934_v47  ;;  %v4657_v47 = vpack.c.bf16 %v690_v33, %v689_v30  ;;  %v730_v61 = vadd.f32 %v4260_v46, %v721_v40  ;;  %v1054_v30 = vld [vmem:[#allocation3 + $0x7f] sm:$0xff]  ;;  %v740_v33 = vadd.s32 8, %v4148_v11  ;;  %v3977_v24 = vld [vmem:[%s4700_s20 + $0x30] sm:$0xff]  }
  0x44   : > { %3585 = vmatprep.subr.bf16.mxu0 %v3935_v49  ;;  %3617 = vmatprep.subr.bf16.mxu1 %v3936_v51  ;;  %v3971_v40 = vld [vmem:[%s4700_s20] sm:$0xff]  }
  0x45   : > { %3140 = vmatmul.mubr.msk.bf16.gmra.mrb[12].mxu0 %vm4576_vm10, %v4580_v56  ;;  %3204 = vmatmul.mubr.msk.bf16.gmra.mrb[12].mxu1 %vm4521_vm8, %v4513_v39  ;;  %v732_v46 = vmax.f32 %v730_v61, 0.0  ;;  %v770_v62 = vand.u32 15, %v740_v33  ;;  %v4755_v61 = vpack.c.bf16 %v1106_v6, %v1105_v59  ;;  %v3946_v33 = vld [vmem:[%s5178_s6 + $0x190] sm:$0xff]   ;;  %v3183_v59 = vpack.c.bf16 %v1114_v45, %v1113_v26 }
  0x46   : > { %1532 = vmatprep.mubr.bf16.mxu0 %v4587_v55  ;;  %1870 = vmatprep.mubr.bf16.mxu1 %v4529_v22  ;;  %v1115_v6 = vld [vmem:[#allocation3 + $0x89] sm:$0xff] }
  0x47   : > { %3586 = vmatpush3.bf16.msra.mxu0 %v3935_v49  ;;  %3618 = vmatpush3.bf16.msra.mxu1 %v3936_v51  ;;  %v4674_v49 = vmul.f32 %v733_v37, %v731_v43  ;;  %v4676_v51 = vpack.c.bf16 %v1054_v30, %v1053_v36  ;;  %vm3830_vm4 = vcmp.ne.s32.totalorder %v770_v62, 15  ;;  %v1107_v36 = vld [vmem:[#allocation3 + $0x49] sm:$0xff]  ;;  %v3948_v62 = vld [vmem:[%s5178_s6 + $0x1d8] sm:$0xff]  }
  0x48   : > { %3587 = vmatprep.subr.bf16.mxu0 %v3937_v31  ;;  %3619 = vmatprep.subr.bf16.mxu1 %v3938_v13  ;;  %vm3222_vm9 = vmpackc.low %vm3830_vm4, %vm4020_vm2  ;;  %v3945_v30 = vld [vmem:[%s5178_s6 + $0x1d0] sm:$0xff]  }
  0x49   : > { %736 = vst [vmem:[#allocation3 + $0x98] sm:$0xff] %v4674_v49  ;;  %v3947_v43 = vld [vmem:[%s5178_s6 + $0x210] sm:$0xff]   ;;  %vm4788_vm4 = vmpackc.low %vm3844_vm3, %vm4020_vm2  ;;  %vm3847_vm3 = vcmp.ne.s32.totalorder %v868_v54, 15  ;;  %v3955_v54 = vld [vmem:[%s5178_s6 + $0x1a8] sm:$0xff]  }
  0x4b   : > { %3588 = vmatpush3.bf16.msra.mxu0 %v3937_v31  ;;  %3620 = vmatpush3.bf16.msra.mxu1 %v3938_v13  ;;  %v4678_v31 = vmul.f32 %v733_v37, %v732_v46  ;;  %v1108_v37 = vld [vmem:[#allocation3 + $0x51] sm:$0xff] }
  0x4c   : > { %3477 = vmatprep.subr.bf16.mxu0 %v3939_v12  ;;  %3637 = vmatprep.subr.bf16.mxu1 %v4616_v20  ;;  %v1100_v12 = vld [vmem:[#allocation3 + $0x11] sm:$0xff] }
  0x4d   : > { %3144 = vmatmul.mubr.msk.bf16.gmra.mrb[16].mxu0 %vm4621_vm12, %v4618_v14  ;;  %3208 = vmatmul.mubr.msk.bf16.gmra.mrb[16].mxu1 %vm4576_vm10, %v4580_v56  ;;  %737 = vst [vmem:[#allocation3 + $0xa0] sm:$0xff] %v4678_v31  ;;  %v1168_v28 = vpack.c.bf16 %v4678_v31, %v4674_v49  ;;  %v3223_v42 = vpack.c.bf16 %v1100_v12, %v1099_v9  ;;  %v1112_v9 = vld [vmem:[#allocation3 + $0x71] sm:$0xff]  ;;  %v3953_v12 = vld [vmem:[%s5178_s6 + $0x220] sm:$0xff]  }
  0x4e   : > { %1540 = vmatprep.mubr.bf16.mxu0 %v4629_v5  ;;  %1878 = vmatprep.mubr.bf16.mxu1 %v4587_v55  ;;  %v4833_v27 = vpack.c.bf16 %v1112_v9, %v1111_v3 }
  0x55   : > { %3148 = vmatmul.mubr.msk.bf16.gmra.mrb[20].mxu0 %vm4649_vm14, %v4646_v17  ;;  %3212 = vmatmul.mubr.msk.bf16.gmra.mrb[20].mxu1 %vm4621_vm12, %v4618_v14 }
  0x56   : > { %1548 = vmatprep.mubr.bf16.mxu0 %v4657_v47  ;;  %1886 = vmatprep.mubr.bf16.mxu1 %v4629_v5 }
  0x5d   : > { %3152 = vmatmul.mubr.msk.bf16.gmra.mrb[24].mxu0 %vm4681_vm0, %v4676_v51  ;;  %3216 = vmatmul.mubr.msk.bf16.gmra.mrb[24].mxu1 %vm4649_vm14, %v4646_v17 }
  0x5e   : > { %1556 = vmatprep.mubr.bf16.mxu0 %v4689_v4  ;;  %1894 = vmatprep.mubr.bf16.mxu1 %v4657_v47 }
  0x65   : > { %3156 = vmatmul.mubr.msk.bf16.gmra.mrb[28].mxu0 %vm4715_vm5, %v4719_v23  ;;  %3220 = vmatmul.mubr.msk.bf16.gmra.mrb[28].mxu1 %vm4681_vm0, %v4676_v51 }
  0x66   : > { %3589 = vmatprep.mubr.msk.bf16.mxu0 %vm4722_vm7, %v3159_v57  ;;  %3621 = vmatprep.mubr.msk.bf16.mxu1 %vm3222_vm9, %v3223_v42  ;;  %v3952_v42 = vld [vmem:[%s5178_s6 + $0x1a0] sm:$0xff]  }
  0x6d   : > { %3590 = vmatmul.mubr.msk.bf16.vlgmr.msra.gmra.mrb[32].mxu0 %vm4740_vm13, %v4737_v34  ;;  %3622 = vmatmul.mubr.msk.bf16.vlgmr.msra.gmra.mrb[32].mxu1 %vm4722_vm7, %v3159_v57  ;;  %vm3845_vm7 = vcmp.ne.s32.totalorder %v840_v38, 15  ;;  %v3949_v38 = vld [vmem:[%s5178_s6 + $0x198] sm:$0xff]  }
  0x6e   : > { %3478 = vmatpush3.bf16.msra.mxu0 %v3940_v60  ;;  %3638 = vmatpush3.bf16.msra.mxu1 %v4616_v20  ;;  %v4785_v20 = vpack.c.bf16 %v1108_v37, %v1107_v36  ;;  %vm4812_vm9 = vmpackc.low %vm3845_vm7, %vm4020_vm2  ;;  %v1116_v60 = vld [vmem:[#allocation3 + $0x91] sm:$0xff] }
  0x6f   : > { %3479 = vmatprep.subr.bf16.mxu0 %v3942_v16  ;;  %3639 = vmatprep.subr.bf16.mxu1 %v3944_v8  ;;  %vm4858_vm7 = vmpackc.low %vm3847_vm3, %vm4020_vm2  ;;  %v3957_v16 = vld [vmem:[%s5178_s6 + $0x1f0] sm:$0xff]   ;;  %v3960_v36 = vld [vmem:[%s5178_s6 + $0x1f8] sm:$0xff]  }
  0x70   : > { %3593 = vmatprep.mubr.msk.bf16.mxu0 %vm4763_vm1, %v4755_v61  ;;  %3625 = vmatprep.mubr.msk.bf16.mxu1 %vm4740_vm13, %v4737_v34  ;;  %vm4879_vm3 = vmpackc.low %vm3848_vm11, %vm4020_vm2  ;;  %v3962_v37 = vld [vmem:[%s5178_s6 + $0x238] sm:$0xff]  }
  0x72   : > { %3480 = vmatpush3.bf16.msra.mxu0 %v3943_v18  ;;  %3640 = vmatpush3.bf16.msra.mxu1 %v3944_v8  ;;  %v3959_v8 = vld [vmem:[%s5178_s6 + $0x230] sm:$0xff]   ;;  %v3187_v18 = vpack.c.bf16 %v1116_v60, %v1115_v6 }
  0x73   : > { %3481 = vmatprep.subr.bf16.mxu0 %v3945_v30  ;;  %3641 = vmatprep.subr.bf16.mxu1 %v3947_v43  ;;  %v3961_v30 = vld [vmem:[%s5178_s6 + $0x1b8] sm:$0xff]  }
  0x75   : > { %3594 = vmatmul.mubr.msk.bf16.gmra.mrb[36].mxu0 %vm4788_vm4, %v4785_v20  ;;  %3626 = vmatmul.mubr.msk.bf16.gmra.mrb[36].mxu1 %vm4763_vm1, %v4755_v61 }
  0x76   : > { %3482 = vmatpush3.bf16.msra.mxu0 %v3946_v33  ;;  %3642 = vmatpush3.bf16.msra.mxu1 %v3947_v43  ;;  %v3963_v43 = vld [vmem:[%s5176_s4] sm:$0xff]  }
  0x77   : > { %3483 = vmatprep.subr.bf16.mxu0 %v3948_v62  ;;  %3643 = vmatprep.subr.bf16.mxu1 %v3950_v2 }
  0x78   : > { %3597 = vmatprep.mubr.msk.bf16.mxu0 %vm4812_vm9, %v4803_v32  ;;  %3629 = vmatprep.mubr.msk.bf16.mxu1 %vm4788_vm4, %v4785_v20 }
  0x7a   : > { %3484 = vmatpush3.bf16.msra.mxu0 %v3949_v38  ;;  %3644 = vmatpush3.bf16.msra.mxu1 %v3950_v2 }
  0x7b   : > { %3485 = vmatprep.subr.bf16.mxu0 %v3951_v0  ;;  %3645 = vmatprep.subr.bf16.mxu1 %v3953_v12 }
  0x7d   : > { %3598 = vmatmul.mubr.msk.bf16.gmra.mrb[40].mxu0 %vm4836_vm15, %v4833_v27  ;;  %3630 = vmatmul.mubr.msk.bf16.gmra.mrb[40].mxu1 %vm4812_vm9, %v4803_v32 }
  0x7e   : > { %3486 = vmatpush3.bf16.msra.mxu0 %v3952_v42  ;;  %3646 = vmatpush3.bf16.msra.mxu1 %v3953_v12 }
  0x7f   : > { %3487 = vmatprep.subr.bf16.mxu0 %v3954_v58  ;;  %3647 = vmatprep.subr.bf16.mxu1 %v3956_v7 }
  0x80   : > { %3601 = vmatprep.mubr.msk.bf16.mxu0 %vm4858_vm7, %v3183_v59  ;;  %3633 = vmatprep.mubr.msk.bf16.mxu1 %vm4836_vm15, %v4833_v27 }
  0x82   : > { %3488 = vmatpush3.bf16.msra.mxu0 %v3955_v54  ;;  %3648 = vmatpush3.bf16.msra.mxu1 %v3956_v7 }
  0x83   : > { %3489 = vmatprep.subr.bf16.mxu0 %v3957_v16  ;;  %3649 = vmatprep.subr.bf16.mxu1 %v3959_v8 }
  0x85   : > { %3602 = vmatmul.mubr.msk.bf16.gmra.mrb[44].mxu0 %vm4879_vm3, %v3187_v18  ;;  %3634 = vmatmul.mubr.msk.bf16.gmra.mrb[44].mxu1 %vm4858_vm7, %v3183_v59 }
  0x86   : > { %3490 = vmatpush3.bf16.msra.mxu0 %v3958_v44  ;;  %3650 = vmatpush3.bf16.msra.mxu1 %v3959_v8 }
  0x87   : > { %3491 = vmatprep.subr.bf16.mxu0 %v3960_v36  ;;  %3651 = vmatprep.subr.bf16.mxu1 %v3962_v37 }
  0x88   : > { %2249 = vmatprep.mubr.bf16.mxu0 %v4371_v10  ;;  %3653 = vmatprep.mubr.msk.bf16.mxu1 %vm4740_vm13, %v4737_v34  ;;  %v3965_v10 = vld [vmem:[%s5176_s4 + $0x10] sm:$0xff]   ;;  %v1118_v34 = vld [vmem:[#allocation3 + $0xa1] sm:$0xff] }
  0x8a   : > { %3492 = vmatpush3.bf16.msra.mxu0 %v3961_v30  ;;  %3652 = vmatpush3.bf16.msra.mxu1 %v3962_v37 }
  0x8b   : > { %3669 = vmatprep.subr.bf16.mxu1 %v3963_v43 }
  0x8d   : > { %3256 = vmatmul.mubr.msk.bf16.vlgmr.msra.gmra.mrb[48].mxu0 %vm4454_vm6, %v4432_v53  ;;  %3654 = vmatmul.mubr.msk.bf16.vlgmr.msra.gmra.mrb[32].mxu1 %vm4763_vm1, %v4755_v61  ;;  %v3966_v53 = vld [vmem:[%s5176_s4 + $0x18] sm:$0xff]   ;;  %v3972_v61 = vld [vmem:[%s4700_s20 + $0x8] sm:$0xff]  }
  0x8e   : > { %3670 = vmatpush3.bf16.msra.mxu1 %v3963_v43  ;;  %2257 = vmatprep.mubr.bf16.mxu0 %v4462_v1  ;;  %v758_v1 = vadd.s32 152, %v4148_v11 }
  0x8f   : > { %3671 = vmatprep.subr.bf16.mxu1 %v3964_v35  ;;  %3657 = vmatprep.mubr.msk.bf16.mxu1 %vm4788_vm4, %v4785_v20  ;;  %v3976_v20 = vld [vmem:[%s4700_s20 + $0x28] sm:$0xff]  }
  0x90   : > { %v896_v19 = vand.u32 15, %v758_v1 }
  0x92   : > { %3672 = vmatpush3.bf16.msra.mxu1 %v3964_v35  ;;  %vm3832_vm6 = vcmp.ne.s32.totalorder %v896_v19, 15 }
  0x93   : > { %3673 = vmatprep.subr.bf16.mxu1 %v3965_v10 }
  0x95   : > { %3260 = vmatmul.mubr.msk.bf16.gmra.mrb[52].mxu0 %vm4521_vm8, %v4513_v39  ;;  %3658 = vmatmul.mubr.msk.bf16.gmra.mrb[36].mxu1 %vm4812_vm9, %v4803_v32  ;;  %v3968_v39 = vld [vmem:[%s5176_s4 + $0x28] sm:$0xff]   ;;  %vm3314_vm8 = vmpackc.low %vm3832_vm6, %vm4020_vm2 }
  0x96   : > { %3674 = vmatpush3.bf16.msra.mxu1 %v3965_v10  ;;  %2265 = vmatprep.mubr.bf16.mxu0 %v4529_v22  ;;  %v1117_v22 = vld [vmem:[#allocation3 + $0x99] sm:$0xff] }
  0x97   : > { %3675 = vmatprep.subr.bf16.mxu1 %v3966_v53  ;;  %3661 = vmatprep.mubr.msk.bf16.mxu1 %vm4836_vm15, %v4833_v27 }
  0x9a   : > { %3676 = vmatpush3.bf16.msra.mxu1 %v3966_v53 }
  0x9b   : > { %3677 = vmatprep.subr.bf16.mxu1 %v3967_v63 }
  0x9d   : > { %3264 = vmatmul.mubr.msk.bf16.gmra.mrb[56].mxu0 %vm4576_vm10, %v4580_v56  ;;  %3662 = vmatmul.mubr.msk.bf16.gmra.mrb[40].mxu1 %vm4858_vm7, %v3183_v59  ;;  %v3315_v56 = vpack.c.bf16 %v1118_v34, %v1117_v22 }
  0x9e   : > { %3678 = vmatpush3.bf16.msra.mxu1 %v3967_v63  ;;  %2273 = vmatprep.mubr.bf16.mxu0 %v4587_v55  ;;  %v3970_v55 = vld [vmem:[%s5176_s4 + $0x38] sm:$0xff]  }
  0x9f   : > { %3679 = vmatprep.subr.bf16.mxu1 %v3968_v39  ;;  %3665 = vmatprep.mubr.msk.bf16.mxu1 %vm4879_vm3, %v3187_v18 }
  0xa2   : > { %3680 = vmatpush3.bf16.msra.mxu1 %v3968_v39 }
  0xa3   : > { %3681 = vmatprep.subr.bf16.mxu1 %v3969_v50 }
  0xa5   : > { %3268 = vmatmul.mubr.msk.bf16.gmra.mrb[60].mxu0 %vm4621_vm12, %v4618_v14  ;;  %3666 = vmatmul.mubr.msk.bf16.gmra.mrb[44].mxu1 %vm3314_vm8, %v3315_v56  ;;  %v3974_v14 = vld [vmem:[%s4700_s20 + $0x18] sm:$0xff]  }
  0xa6   : > { %3682 = vmatpush3.bf16.msra.mxu1 %v3969_v50  ;;  %2281 = vmatprep.mubr.bf16.mxu0 %v4629_v5  ;;  %v757_v5 = vadd.s32 144, %v4148_v11 }
  0xa7   : > { %3683 = vmatprep.subr.bf16.mxu1 %v3970_v55  ;;  %3685 = vmatprep.mubr.bf16.mxu1 %v3971_v40 }
  0xaa   : > { %3684 = vmatpush3.bf16.msra.mxu1 %v3970_v55 }
  0xad   : > { %3272 = vmatmul.mubr.msk.bf16.gmra.mrb[64].mxu0 %vm4649_vm14, %v4646_v17  ;;  %3686 = vmatmul.mubr.bf16.vlgmr.msra.gmra.mrb[32].mxu1 %v3972_v61  ;;  %v889_v17 = vand.u32 15, %v757_v5 }
  0xae   : > { %2289 = vmatprep.mubr.bf16.mxu0 %v4657_v47  ;;  %3689 = vmatprep.mubr.bf16.mxu1 %v3973_v15  ;;  %v1057_v47 = vld [vmem:[#allocation3 + $0x97] sm:$0xff] }
  0xaf   : > { %vm3831_vm10 = vcmp.ne.s32.totalorder %v889_v17, 0 }
  0xb0   : > { %vm3282_vm12 = vmpackc.low %vm4020_vm2, %vm3831_vm10 }
  0xb5   : > { %3276 = vmatmul.mubr.msk.bf16.gmra.mrb[68].mxu0 %vm4681_vm0, %v4676_v51  ;;  %3690 = vmatmul.mubr.bf16.gmra.mrb[36].mxu1 %v3974_v14  ;;  %v1058_v51 = vld [vmem:[#allocation3 + $0x9f] sm:$0xff] }
  0xb6   : > { %2297 = vmatprep.mubr.bf16.mxu0 %v4689_v4  ;;  %3693 = vmatprep.mubr.bf16.mxu1 %v3975_v52  ;;  %v3283_v13 = vpack.c.bf16 %v1058_v51, %v1057_v47  ;;  %v3978_v4 = vld [vmem:[%s4700_s20 + $0x38] sm:$0xff]  }
  0xbd   : > { %3280 = vmatmul.mubr.msk.bf16.gmra.mrb[72].mxu0 %vm4715_vm5, %v4719_v23  ;;  %3694 = vmatmul.mubr.bf16.gmra.mrb[40].mxu1 %v3976_v20 }
  0xbe   : > { %2305 = vmatprep.mubr.bf16.mxu0 %v1168_v28  ;;  %3697 = vmatprep.mubr.bf16.mxu1 %v3977_v24 }
  0xc5   : > { %3284 = vmatmul.mubr.msk.bf16.gmra.mrb[76].mxu0 %vm3282_vm12, %v3283_v13  ;;  %3698 = vmatmul.mubr.bf16.gmra.mrb[44].mxu1 %v3978_v4 }
 0x100   : > { %v3333_v11 = vpop.f32.mrb[0].mxu0  ;;  %v3413_v29 = vpop.f32.mrb[0].mxu1 }
 0x101   : > { %v3334_v46 = vpop.f32.mrb[1].mxu0  ;;  %v3414_v21 = vpop.f32.mrb[1].mxu1 }
 0x102   : > { %v4985_v23 = vadd.f32 %v3334_v46, %v3333_v11  ;;  %v3336_v33 = vpop.f32.mrb[2].mxu0  ;;  %v4987_v62 = vadd.f32 %v3414_v21, %v3413_v29  ;;  %v3416_v49 = vpop.f32.mrb[2].mxu1 }
 0x103   : > { %v3337_v31 = vpop.f32.mrb[3].mxu0  ;;  %v3417_v28 = vpop.f32.mrb[3].mxu1 }
 0x104   : > { %v4989_v2 = vadd.f32 %v3337_v31, %v3336_v33  ;;  %v4991_v32 = vadd.f32 %v3417_v28, %v3416_v49 }
 0x108   : > { %v3339_v25 = vpop.f32.mrb[4].mxu0  ;;  %v3419_v38 = vpop.f32.mrb[4].mxu1 }
 0x109   : > { %v3340_v3 = vpop.f32.mrb[5].mxu0  ;;  %v3420_v9 = vpop.f32.mrb[5].mxu1 }
 0x10a   : > { %v4993_v0 = vadd.f32 %v3340_v3, %v3339_v25  ;;  %v3342_v12 = vpop.f32.mrb[6].mxu0  ;;  %v4995_v27 = vadd.f32 %v3420_v9, %v3419_v38  ;;  %v3422_v26 = vpop.f32.mrb[6].mxu1 }
 0x10b   : > { %v3343_v45 = vpop.f32.mrb[7].mxu0  ;;  %v3423_v57 = vpop.f32.mrb[7].mxu1 }
 0x10c   : > { %v4997_v42 = vadd.f32 %v3343_v45, %v3342_v12  ;;  %v4999_v58 = vadd.f32 %v3423_v57, %v3422_v26 }
 0x110   : > { %v3345_v7 = vpop.f32.mrb[8].mxu0  ;;  %v3425_v59 = vpop.f32.mrb[8].mxu1 }
 0x111   : > { %v3346_v48 = vpop.f32.mrb[9].mxu0  ;;  %v3426_v54 = vpop.f32.mrb[9].mxu1 }
 0x112   : > { %v5001_v6 = vadd.f32 %v3346_v48, %v3345_v7  ;;  %v3348_v60 = vpop.f32.mrb[10].mxu0  ;;  %v5003_v16 = vadd.f32 %v3426_v54, %v3425_v59  ;;  %v3428_v8 = vpop.f32.mrb[10].mxu1 }
 0x113   : > { %v3349_v18 = vpop.f32.mrb[11].mxu0  ;;  %v3429_v41 = vpop.f32.mrb[11].mxu1 }
 0x114   : > { %v5005_v44 = vadd.f32 %v3349_v18, %v3348_v60  ;;  %v5007_v36 = vadd.f32 %v3429_v41, %v3428_v8 }
 0x118   : > { %v3351_v37 = vpop.f32.mrb[12].mxu0  ;;  %v3431_v30 = vpop.f32.mrb[12].mxu1 }
 0x119   : > { %v3352_v43 = vpop.f32.mrb[13].mxu0  ;;  %v3432_v35 = vpop.f32.mrb[13].mxu1 }
 0x11a   : > { %v5009_v10 = vadd.f32 %v3352_v43, %v3351_v37  ;;  %v3354_v53 = vpop.f32.mrb[14].mxu0  ;;  %v5011_v63 = vadd.f32 %v3432_v35, %v3431_v30  ;;  %v3434_v1 = vpop.f32.mrb[14].mxu1 }
 0x11b   : > { %v3355_v39 = vpop.f32.mrb[15].mxu0  ;;  %v3435_v19 = vpop.f32.mrb[15].mxu1 }
 0x11c   : > { %v5013_v22 = vadd.f32 %v3355_v39, %v3354_v53  ;;  %v5015_v34 = vadd.f32 %v3435_v19, %v3434_v1 }
 0x120   : > { %v3357_v50 = vpop.f32.mrb[16].mxu0  ;;  %v3437_v56 = vpop.f32.mrb[16].mxu1 }
 0x121   : > { %v3358_v55 = vpop.f32.mrb[17].mxu0  ;;  %v3438_v40 = vpop.f32.mrb[17].mxu1 }
 0x122   : > { %v5017_v61 = vadd.f32 %v3358_v55, %v3357_v50  ;;  %v3360_v15 = vpop.f32.mrb[18].mxu0  ;;  %v5019_v14 = vadd.f32 %v3438_v40, %v3437_v56  ;;  %v3440_v52 = vpop.f32.mrb[18].mxu1  ;;  %v3052_v50 = vld [vmem:[%s5179_s7] ss:$0 sm:$0xff] }
 0x123   : > { %v3361_v5 = vpop.f32.mrb[19].mxu0  ;;  %v3441_v20 = vpop.f32.mrb[19].mxu1  ;;  %v3701_v56 = vadd.f32 %v4993_v0, %v3052_v50  ;;  %v3707_v40 = vadd.f32 %v4985_v23, %v3052_v50 }
 0x124   : > { %v5021_v24 = vadd.f32 %v3361_v5, %v3360_v15  ;;  %v5023_v17 = vadd.f32 %v3441_v20, %v3440_v52  ;;  %v3713_v5 = vadd.f32 %v4997_v42, %v3052_v50 }
 0x128   : > { %v3363_v47 = vpop.f32.mrb[20].mxu0  ;;  %v3443_v51 = vpop.f32.mrb[20].mxu1 }
 0x129   : > { %v3364_v13 = vpop.f32.mrb[21].mxu0  ;;  %v3444_v4 = vpop.f32.mrb[21].mxu1 }
 0x12a   : > { %v5025_v11 = vadd.f32 %v3364_v13, %v3363_v47  ;;  %v3366_v29 = vpop.f32.mrb[22].mxu0  ;;  %v5027_v46 = vadd.f32 %v3444_v4, %v3443_v51  ;;  %v3446_v21 = vpop.f32.mrb[22].mxu1  ;;  %v3719_v51 = vadd.f32 %v4989_v2, %v3052_v50 }
 0x12b   : > { %v3367_v33 = vpop.f32.mrb[23].mxu0  ;;  %v3447_v49 = vpop.f32.mrb[23].mxu1 }
 0x12c   : > { %v5029_v31 = vadd.f32 %v3367_v33, %v3366_v29  ;;  %v5031_v28 = vadd.f32 %v3447_v49, %v3446_v21  ;;  %v3725_v49 = vadd.f32 %v5009_v10, %v3052_v50 }
 0x130   : > { %v3369_v25 = vpop.f32.mrb[24].mxu0  ;;  %v3449_v38 = vpop.f32.mrb[24].mxu1 }
 0x131   : > { %v3370_v3 = vpop.f32.mrb[25].mxu0  ;;  %v3450_v9 = vpop.f32.mrb[25].mxu1 }
 0x132   : > { %v5033_v12 = vadd.f32 %v3370_v3, %v3369_v25  ;;  %v3372_v26 = vpop.f32.mrb[26].mxu0  ;;  %v5035_v45 = vadd.f32 %v3450_v9, %v3449_v38  ;;  %v3452_v57 = vpop.f32.mrb[26].mxu1  ;;  %v3731_v25 = vadd.f32 %v5001_v6, %v3052_v50 }
 0x133   : > { %v3373_v7 = vpop.f32.mrb[27].mxu0  ;;  %v3453_v59 = vpop.f32.mrb[27].mxu1 }
 0x134   : > { %v5037_v48 = vadd.f32 %v3373_v7, %v3372_v26  ;;  %v5039_v54 = vadd.f32 %v3453_v59, %v3452_v57  ;;  %v3743_v26 = vadd.f32 %v5005_v44, %v3052_v50  ;;  %v3749_v59 = vadd.f32 %v5025_v11, %v3052_v50 }
 0x138   : > { %v3375_v60 = vpop.f32.mrb[28].mxu0  ;;  %v3455_v8 = vpop.f32.mrb[28].mxu1 }
 0x139   : > { %v3376_v18 = vpop.f32.mrb[29].mxu0  ;;  %v3456_v41 = vpop.f32.mrb[29].mxu1 }
 0x13a   : > { %v3377_v37 = vadd.f32 %v3376_v18, %v3375_v60  ;;  %v3378_v30 = vpop.f32.mrb[30].mxu0  ;;  %v5041_v43 = vadd.f32 %v3456_v41, %v3455_v8  ;;  %v3458_v35 = vpop.f32.mrb[30].mxu1  ;;  %v3755_v60 = vadd.f32 %v5017_v61, %v3052_v50 }
 0x13b   : > { %v3379_v53 = vpop.f32.mrb[31].mxu0  ;;  %v3459_v1 = vpop.f32.mrb[31].mxu1 }
 0x13c   : > { %v3380_v39 = vadd.f32 %v3379_v53, %v3378_v30  ;;  %v5043_v19 = vadd.f32 %v3459_v1, %v3458_v35  ;;  %v3767_v30 = vadd.f32 %v5021_v24, %v3052_v50 }
 0x140   : > { %v3591_v55 = vpop.f32.mrb[32].mxu0 }
 0x141   : > { %v3702_v15 = vadd.f32 %v3701_v56, %v3591_v55  ;;  %v1599_v52 = vpop.f32.mrb[33].mxu0  ;;  %v3779_v56 = vadd.f32 %v5033_v12, %v3052_v50 }
 0x142   : > { %v3708_v20 = vadd.f32 %v3707_v40, %v1599_v52  ;;  %v3592_v47 = vpop.f32.mrb[34].mxu0  ;;  %v3791_v52 = vadd.f32 %v5037_v48, %v3052_v50 }
 0x143   : > { %v5053_v13 = vadd.f32 %v3702_v15, %v4995_v27  ;;  %v3714_v4 = vadd.f32 %v3713_v5, %v3592_v47  ;;  %v1602_v29 = vpop.f32.mrb[35].mxu0  ;;  %v3737_v27 = vadd.f32 %v5013_v22, %v3052_v50 }
 0x144   : > { %v3709_v21 = vadd.f32 %v3708_v20, %v4987_v62  ;;  %v3720_v33 = vadd.f32 %v3719_v51, %v1602_v29 }
 0x145   : > { %v5057_v0 = vadd.f32 %v3714_v4, %v4999_v58 }
 0x146   : > { %v3721_v23 = vadd.f32 %v3720_v33, %v4991_v32 }
 0x148   : > { %v3595_v42 = vpop.f32.mrb[36].mxu0 }
 0x149   : > { %v3726_v38 = vadd.f32 %v3725_v49, %v3595_v42  ;;  %v1615_v2 = vpop.f32.mrb[37].mxu0 }
 0x14a   : > { %v3732_v3 = vadd.f32 %v3731_v25, %v1615_v2  ;;  %v3596_v9 = vpop.f32.mrb[38].mxu0 }
 0x14b   : > { %v5065_v62 = vadd.f32 %v3726_v38, %v5011_v63  ;;  %v3738_v58 = vadd.f32 %v3737_v27, %v3596_v9  ;;  %v1618_v57 = vpop.f32.mrb[39].mxu0  ;;  %v3761_v63 = vadd.f32 %v5029_v31, %v3052_v50  ;;  %v3773_v31 = vadd.f32 %v3377_v37, %v3052_v50 }
 0x14c   : > { %v3733_v32 = vadd.f32 %v3732_v3, %v5003_v16  ;;  %v3744_v7 = vadd.f32 %v3743_v26, %v1618_v57 }
 0x14d   : > { %v5069_v10 = vadd.f32 %v3738_v58, %v5015_v34 }
 0x14e   : > { %v3745_v6 = vadd.f32 %v3744_v7, %v5007_v36 }
 0x150   : > { %v3599_v22 = vpop.f32.mrb[40].mxu0 }
 0x151   : > { %v3750_v8 = vadd.f32 %v3749_v59, %v3599_v22  ;;  %v1631_v44 = vpop.f32.mrb[41].mxu0 }
 0x152   : > { %v3756_v18 = vadd.f32 %v3755_v60, %v1631_v44  ;;  %v3600_v41 = vpop.f32.mrb[42].mxu0 }
 0x153   : > { %v5077_v16 = vadd.f32 %v3750_v8, %v5027_v46  ;;  %v3762_v34 = vadd.f32 %v3761_v63, %v3600_v41  ;;  %v1634_v35 = vpop.f32.mrb[43].mxu0  ;;  %v3785_v46 = vadd.f32 %v3380_v39, %v3052_v50 }
 0x154   : > { %v5080_v36 = vadd.f32 %v3756_v18, %v5019_v14  ;;  %v3768_v11 = vadd.f32 %v3767_v30, %v1634_v35 }
 0x155   : > { %v5083_v53 = vadd.f32 %v3762_v34, %v5031_v28 }
 0x156   : > { %v5086_v61 = vadd.f32 %v3768_v11, %v5023_v17 }
 0x158   : > { %v3603_v1 = vpop.f32.mrb[44].mxu0 }
 0x159   : > { %v3774_v24 = vadd.f32 %v3773_v31, %v3603_v1  ;;  %v1647_v55 = vpop.f32.mrb[45].mxu0 }
 0x15a   : > { %v3780_v40 = vadd.f32 %v3779_v56, %v1647_v55  ;;  %v3604_v15 = vpop.f32.mrb[46].mxu0 }
 0x15b   : > { %v5091_v14 = vadd.f32 %v3774_v24, %v5041_v43  ;;  %v3786_v5 = vadd.f32 %v3785_v46, %v3604_v15  ;;  %v1650_v28 = vpop.f32.mrb[47].mxu0 }
 0x15c   : > { %v5094_v20 = vadd.f32 %v3780_v40, %v5035_v45  ;;  %v3792_v17 = vadd.f32 %v3791_v52, %v1650_v28 }
 0x15d   : > { %v5097_v37 = vadd.f32 %v3786_v5, %v5043_v19 }
 0x15e   : > { %v5100_v12 = vadd.f32 %v3792_v17, %v5039_v54 }
 0x160   : > { %v3493_v39 = vpop.f32.mrb[48].mxu0 }
 0x161   : > { %v3494_v47 = vpop.f32.mrb[49].mxu0 }
 0x162   : > { %v3495_v51 = vadd.f32 %v3494_v47, %v3493_v39  ;;  %v3496_v4 = vpop.f32.mrb[50].mxu0 }
 0x163   : > { %v3497_v48 = vpop.f32.mrb[51].mxu0 }
 0x164   : > { %v3498_v50 = vadd.f32 %v3497_v48, %v3496_v4  ;;  %v3710_v43 = vadd.f32 %v3709_v21, %v3495_v51 }
 0x166   : > { %v3722_v29 = vadd.f32 %v3721_v23, %v3498_v50 }
 0x168   : > { %v3499_v33 = vpop.f32.mrb[52].mxu0 }
 0x169   : > { %v3500_v49 = vpop.f32.mrb[53].mxu0 }
 0x16a   : > { %v3501_v42 = vadd.f32 %v3500_v49, %v3499_v33  ;;  %v3502_v45 = vpop.f32.mrb[54].mxu0 }
 0x16b   : > { %v3503_v25 = vpop.f32.mrb[55].mxu0 }
 0x16c   : > { %v3504_v38 = vadd.f32 %v3503_v25, %v3502_v45  ;;  %v3704_v19 = vadd.f32 %v5053_v13, %v3501_v42 }
 0x16e   : > { %v3716_v2 = vadd.f32 %v5057_v0, %v3504_v38  ;;  %v5109_v0 = vld [vmem:[%s5177_s5] ss:$0 sm:$0xff] }
 0x16f   : > { %v3723_v31 = vadd.f32 %v3722_v29, %v5109_v0 }
 0x170   : > { %v3505_v54 = vpop.f32.mrb[56].mxu0  ;;  %v3717_v30 = vadd.f32 %v3716_v2, %v5109_v0 }
 0x171   : > { %v3506_v27 = vpop.f32.mrb[57].mxu0 }
 0x172   : > { %v3507_v3 = vadd.f32 %v3506_v27, %v3505_v54  ;;  %v3508_v9 = vpop.f32.mrb[58].mxu0 }
 0x173   : > { %v3509_v26 = vpop.f32.mrb[59].mxu0 }
 0x174   : > { %v3734_v58 = vadd.f32 %v3733_v32, %v3507_v3  ;;  %v3510_v57 = vadd.f32 %v3509_v26, %v3508_v9 }
 0x176   : > { %v3746_v21 = vadd.f32 %v3745_v6, %v3510_v57 }
 0x178   : > { %v3511_v23 = vpop.f32.mrb[60].mxu0  ;;  %v3747_v45 = vadd.f32 %v3746_v21, %v5109_v0 }
 0x179   : > { %v3512_v7 = vpop.f32.mrb[61].mxu0 }
 0x17a   : > { %v3513_v59 = vadd.f32 %v3512_v7, %v3511_v23  ;;  %v3514_v22 = vpop.f32.mrb[62].mxu0 }
 0x17b   : > { %v3515_v60 = vpop.f32.mrb[63].mxu0 }
 0x17c   : > { %v3728_v8 = vadd.f32 %v5065_v62, %v3513_v59  ;;  %v3516_v44 = vadd.f32 %v3515_v60, %v3514_v22 }
 0x17e   : > { %v3740_v13 = vadd.f32 %v5069_v10, %v3516_v44  ;;  %v3729_v47 = vadd.f32 %v3728_v8, %v5109_v0 }
 0x180   : > { %v3517_v63 = vpop.f32.mrb[64].mxu0  ;;  %v3687_v18 = vpop.f32.mrb[32].mxu1  ;;  %v3741_v29 = vadd.f32 %v3740_v13, %v5109_v0 }
 0x181   : > { %v3518_v32 = vpop.f32.mrb[65].mxu0  ;;  %v3705_v6 = vadd.f32 %v3704_v19, %v3687_v18  ;;  %v2618_v41 = vpop.f32.mrb[33].mxu1 }
 0x182   : > { %v3519_v34 = vadd.f32 %v3518_v32, %v3517_v63  ;;  %v3520_v35 = vpop.f32.mrb[66].mxu0  ;;  %v3711_v11 = vadd.f32 %v3710_v43, %v2618_v41  ;;  %v3688_v62 = vpop.f32.mrb[34].mxu1 }
 0x183   : > { %v3706_v10 = vadd.f32 %v3705_v6, %v5109_v0  ;;  %v3521_v1 = vpop.f32.mrb[67].mxu0  ;;  %v3718_v56 = vadd.f32 %v3717_v30, %v3688_v62  ;;  %v2621_v24 = vpop.f32.mrb[35].mxu1 }
 0x184   : > { %v3758_v55 = vadd.f32 %v5080_v36, %v3519_v34  ;;  %v3712_v46 = vadd.f32 %v3711_v11, %v5109_v0  ;;  %v3522_v40 = vadd.f32 %v3521_v1, %v3520_v35  ;;  %v3724_v15 = vadd.f32 %v3723_v31, %v2621_v24 }
 0x185   : > { %v2699_v52 = vmax.f32 %v3706_v10, 0.0  ;;  %v2700_v5 = vmax.f32 %v3718_v56, 0.0  ;;  %v3735_v36 = vadd.f32 %v3734_v58, %v5109_v0 }
 0x186   : > { %v2697_v28 = vmax.f32 %v3712_v46, 0.0  ;;  %v3770_v17 = vadd.f32 %v5086_v61, %v3522_v40  ;;  %v2698_v39 = vmax.f32 %v3724_v15, 0.0  ;;  %v3759_v59 = vadd.f32 %v3758_v55, %v5109_v0 }
 0x187   : > { %2715 = vst [vmem:[%s5118_s24 + $0x10] sm:$0xff] %v2699_v52  ;;  %2716 = vst [vmem:[%s5118_s24 + $0x18] sm:$0xff] %v2700_v5 }
 0x188   : > { %2713 = vst [vmem:[%s5118_s24] sm:$0xff] %v2697_v28  ;;  %2714 = vst [vmem:[%s5118_s24 + $0x8] sm:$0xff] %v2698_v39  ;;  %v3523_v51 = vpop.f32.mrb[68].mxu0  ;;  %v3691_v4 = vpop.f32.mrb[36].mxu1  ;;  %v3771_v18 = vadd.f32 %v3770_v17, %v5109_v0 }
 0x189   : > { %v3524_v48 = vpop.f32.mrb[69].mxu0  ;;  %v3730_v50 = vadd.f32 %v3729_v47, %v3691_v4  ;;  %v2634_v43 = vpop.f32.mrb[37].mxu1 }
 0x18a   : > { %v3525_v33 = vadd.f32 %v3524_v48, %v3523_v51  ;;  %v3526_v61 = vpop.f32.mrb[70].mxu0  ;;  %v3736_v49 = vadd.f32 %v3735_v36, %v2634_v43  ;;  %v3692_v42 = vpop.f32.mrb[38].mxu1 }
 0x18b   : > { %v2703_v25 = vmax.f32 %v3730_v50, 0.0  ;;  %v3527_v38 = vpop.f32.mrb[71].mxu0  ;;  %v3742_v19 = vadd.f32 %v3741_v29, %v3692_v42  ;;  %v2637_v2 = vpop.f32.mrb[39].mxu1 }
 0x18c   : > { %v3752_v54 = vadd.f32 %v5077_v16, %v3525_v33  ;;  %v2701_v27 = vmax.f32 %v3736_v49, 0.0  ;;  %v3528_v3 = vadd.f32 %v3527_v38, %v3526_v61  ;;  %v3748_v9 = vadd.f32 %v3747_v45, %v2637_v2 }
 0x18d   : > { %2719 = vst [vmem:[%s5118_s24 + $0x30] sm:$0xff] %v2703_v25  ;;  %v2704_v26 = vmax.f32 %v3742_v19, 0.0 }
 0x18e   : > { %2717 = vst [vmem:[%s5118_s24 + $0x20] sm:$0xff] %v2701_v27  ;;  %v3764_v58 = vadd.f32 %v5083_v53, %v3528_v3  ;;  %v2702_v57 = vmax.f32 %v3748_v9, 0.0  ;;  %v3753_v23 = vadd.f32 %v3752_v54, %v5109_v0 }
 0x18f   : > { %2720 = vst [vmem:[%s5118_s24 + $0x38] sm:$0xff] %v2704_v26 }
 0x190   : > { %2718 = vst [vmem:[%s5118_s24 + $0x28] sm:$0xff] %v2702_v57  ;;  %v3529_v21 = vpop.f32.mrb[72].mxu0  ;;  %v3695_v7 = vpop.f32.mrb[40].mxu1  ;;  %v3765_v22 = vadd.f32 %v3764_v58, %v5109_v0 }
 0x191   : > { %v3530_v16 = vpop.f32.mrb[73].mxu0  ;;  %v3754_v60 = vadd.f32 %v3753_v23, %v3695_v7  ;;  %v2650_v8 = vpop.f32.mrb[41].mxu1 }
 0x192   : > { %v3531_v44 = vadd.f32 %v3530_v16, %v3529_v21  ;;  %v3532_v13 = vpop.f32.mrb[74].mxu0  ;;  %v3760_v63 = vadd.f32 %v3759_v59, %v2650_v8  ;;  %v3696_v53 = vpop.f32.mrb[42].mxu1 }
 0x193   : > { %v2707_v32 = vmax.f32 %v3754_v60, 0.0  ;;  %v3533_v6 = vpop.f32.mrb[75].mxu0  ;;  %v3766_v41 = vadd.f32 %v3765_v22, %v3696_v53  ;;  %v2653_v30 = vpop.f32.mrb[43].mxu1 }
 0x194   : > { %v3782_v34 = vadd.f32 %v5094_v20, %v3531_v44  ;;  %v2705_v35 = vmax.f32 %v3760_v63, 0.0  ;;  %v3534_v11 = vadd.f32 %v3533_v6, %v3532_v13  ;;  %v3772_v62 = vadd.f32 %v3771_v18, %v2653_v30 }
 0x195   : > { %2723 = vst [vmem:[%s5118_s24 + $0x50] sm:$0xff] %v2707_v32  ;;  %v2708_v31 = vmax.f32 %v3766_v41, 0.0 }
 0x196   : > { %2721 = vst [vmem:[%s5118_s24 + $0x40] sm:$0xff] %v2705_v35  ;;  %v3794_v10 = vadd.f32 %v5100_v12, %v3534_v11  ;;  %v2706_v1 = vmax.f32 %v3772_v62, 0.0  ;;  %v3783_v55 = vadd.f32 %v3782_v34, %v5109_v0 }
 0x197   : > { %2724 = vst [vmem:[%s5118_s24 + $0x58] sm:$0xff] %v2708_v31 }
 0x198   : > { %2722 = vst [vmem:[%s5118_s24 + $0x48] sm:$0xff] %v2706_v1  ;;  %v3535_v56 = vpop.f32.mrb[76].mxu0  ;;  %v3699_v24 = vpop.f32.mrb[44].mxu1  ;;  %v3795_v28 = vadd.f32 %v3794_v10, %v5109_v0 }
 0x199   : > { %v3536_v46 = vpop.f32.mrb[77].mxu0  ;;  %v2666_v40 = vpop.f32.mrb[45].mxu1 }
 0x19a   : > { %v3537_v15 = vadd.f32 %v3536_v46, %v3535_v56  ;;  %v3538_v20 = vpop.f32.mrb[78].mxu0  ;;  %v3784_v52 = vadd.f32 %v3783_v55, %v2666_v40  ;;  %v3700_v5 = vpop.f32.mrb[46].mxu1 }
 0x19b   : > { %v3539_v17 = vpop.f32.mrb[79].mxu0  ;;  %v2669_v12 = vpop.f32.mrb[47].mxu1 }
 0x19c   : > { %v3776_v39 = vadd.f32 %v5091_v14, %v3537_v15  ;;  %v2709_v47 = vmax.f32 %v3784_v52, 0.0  ;;  %v3540_v51 = vadd.f32 %v3539_v17, %v3538_v20  ;;  %v3796_v4 = vadd.f32 %v3795_v28, %v2669_v12 }
 0x19e   : > { %v3777_v36 = vadd.f32 %v3776_v39, %v5109_v0  ;;  %2725 = vst [vmem:[%s5118_s24 + $0x60] sm:$0xff] %v2709_v47  ;;  %v3788_v48 = vadd.f32 %v5097_v37, %v3540_v51  ;;  %v2710_v50 = vmax.f32 %v3796_v4, 0.0 }
 0x1a0   : > { %v3778_v43 = vadd.f32 %v3777_v36, %v3699_v24  ;;  %v3789_v29 = vadd.f32 %v3788_v48, %v5109_v0  ;;  %2726 = vst [vmem:[%s5118_s24 + $0x68] sm:$0xff] %v2710_v50 }
 0x1a2   : > { %v2711_v33 = vmax.f32 %v3778_v43, 0.0  ;;  %v3790_v61 = vadd.f32 %v3789_v29, %v3700_v5 }
 0x1a4   : > { %2727 = vst [vmem:[%s5118_s24 + $0x70] sm:$0xff] %v2711_v33  ;;  %v2712_v49 = vmax.f32 %v3790_v61, 0.0 }
 0x1a6   : > { %2728 = vst [vmem:[%s5118_s24 + $0x78] sm:$0xff] %v2712_v49 }
 0x1a7 PF: > { %s20_s17 = sadd.s32 1, %s4017_s17   ;;  %s5228_s13 = smov %s4009_s15 }
 0x1a8   : > { %p17_p12 = scmp.ge.s32.totalorder %s20_s17, 6   ;;  %s5229_s14 = smov %s4013_s16 }
 0x1a9   : > { %s5230_s15 = smov %s5233_s18  ;;  %s5231_s16 = smov %s5237_s19 }
 0x1aa   :  { %19 = sbr.rel (!%p17_p12) target bundleno = 3 (0x3), region = 101 }

// kernel: rrb_forward.2
= control target key start
LH: loop header
LB: loop body
LE: loop exit
PB: predicated region body
PF: predicated region fallthrough
CT: control target
= control target key end

     0   :  { %s4290_s27 = smov 0   ;;  %s4292_s28 = smov 0   ;;  %s5262_s0 = inlined_call_operand.vmem [shape: bf16[512,128], index: 0, kind: input, shape index: {}, may-alias: {0,1,2}]   ;;  %s5263_s1 = inlined_call_operand.vmem [shape: bf16[512,128], index: 1, kind: input, shape index: {}, may-alias: {0,1,2}]   ;;  %s5264_s2 = inlined_call_operand.vmem [shape: bf16[512,128], index: 2, kind: input, shape index: {}, may-alias: {0,1,2}]   ;;  %s5265_s3 = inlined_call_operand.vmem [shape: bf16[128,128], index: 3, kind: input, shape index: {}]   ;;  %s5266_s4 = inlined_call_operand.vmem [shape: f32[1,128], index: 4, kind: input, shape index: {}]   ;;  %s5267_s5 = inlined_call_operand.vmem [shape: bf16[3,384,128], index: 5, kind: input, shape index: {}]   ;;  %s5268_s6 = inlined_call_operand.vmem [shape: f32[1,128], index: 6, kind: input, shape index: {}]   ;;  %s5269_s7 = inlined_call_operand.vmem [shape: bf16[512,128], index: 7, kind: output, shape index: {0}]   ;;  %s5270_s8 = inlined_call_operand.vmem [shape: f32[32,128], index: 8, kind: output, shape index: {1}]  }
   0x1   :  { %s4294_s29 = smov 0   ;;  %s4296_s30 = smov 0  }
   0x2   :  { %s4298_s9 = smov 0  }
   0x3 LB: > { %s28_s10 = sadd.s32 1, %s4232_s29  ;;  %s31_s11 = sadd.s32 1, %s4236_s30  ;;  %s4240_s9 = sphi %s4298_s9, %s19_s9   ;;  %s4236_s30 = sphi %s4296_s30, %s5323_s30   ;;  %s4232_s29 = sphi %s4294_s29, %s5322_s29   ;;  %s4228_s28 = sphi %s4292_s28, %s5321_s28   ;;  %s4224_s27 = sphi %s4290_s27, %s5320_s27  }
   0x4   : > { %p29_p0 = scmp.ge.s32.totalorder %s28_s10, 2  ;;  %p3008_p1 = scmp.ge.s32.totalorder %s4240_s9, 1 }
   0x5   : > { %p364_p2 = scmp.lt.s32.totalorder %s4240_s9, 5 }
   0x6   : > { %s5325_s10 = smov (%p29_p0, %s28_s10), 0  ;;  %s5327_s11 = smov (!%p29_p0, %s31_s11), %s4236_s30 }
   0x7   : > { %p365_p3 = pnand %p3008_p1, %p364_p2  ;;  %p33_p4 = scmp.ge.s32.totalorder %s5327_s11, 2 }
   0x8   : > { %v4096_v0 = vld [vmem:[%s5265_s3] sm:$0xff] (!%p365_p3)   ;;  %v4242_v1 = vmov (!%p365_p3), 0.0   ;;  %v4097_v2 = vld [vmem:[%s5265_s3 + $0x8] sm:$0xff] (!%p365_p3)   ;;  %vm4243_vm0 = vmmov (!%p365_p3), 0   ;;  %s3010_s16 = sshll.u32 (!%p365_p3), %s4224_s27, 3  ;;  %v4098_v3 = vld [vmem:[%s5265_s3 + $0x10] sm:$0xff] (!%p365_p3)   ;;  %v999_v53 = vlaneseq (!%p365_p3) }
   0x9   : > { %s5329_s11 = smov (%p33_p4, %s5327_s11), 0  ;;  %368 = sbr.rel (%p365_p3) target bundleno = 701 (0x2bd), region = 48 }
   0xa   : > { %3785 = vmatprep.subr.bf16.mxu1 (!%p365_p3), %v4242_v1  ;;  %499 = vst [vmem:[#allocation3] sm:$0xff] (!%p365_p3), %v4242_v1  ;;  %500 = vst [vmem:[#allocation3 + $0xa8] sm:$0xff] (!%p365_p3), %v4242_v1  ;;  %3837 = vmatprep.subr.bf16.mxu0 (!%p365_p3), %v4242_v1  ;;  %s3011_s17 = sadd.s32 (!%p365_p3), 4294967295, %s3010_s16  ;;  %s3009_s20 = sshll.u32 (!%p365_p3), %s4228_s28, 4  ;;  %v4099_v4 = vld [vmem:[%s5265_s3 + $0x18] sm:$0xff] (!%p365_p3)   ;;  %v4100_v5 = vld [vmem:[%s5265_s3 + $0x20] sm:$0xff] (!%p365_p3)  }
   0xb   : > { %3786 = vmatpush3.bf16.msra.mxu1 (!%p365_p3), %v4096_v0  ;;  %3801 = vmatprep.mubr.msk.bf16.mxu1 (!%p365_p3), %vm4243_vm0, %v4242_v1  ;;  %p433_p5 = scmp.gt.s32.totalorder (!%p365_p3), %s3011_s17, 0  ;;  %s3014_s21 = sshll.u32 (!%p365_p3), %s4228_s28, 1  ;;  %v4111_v6 = vld [vmem:[%s5265_s3] sm:$0xff] (!%p365_p3)   ;;  %v4113_v7 = vld [vmem:[%s5265_s3 + $0x8] sm:$0xff] (!%p365_p3)   ;;  %v4116_v9 = vld [vmem:[%s5265_s3 + $0x10] sm:$0xff] (!%p365_p3)   ;;  %v4514_v56 = vshrl.u32 (!%p365_p3), %v999_v53, 7 }
   0xc   : > { %3787 = vmatprep.subr.bf16.mxu1 (!%p365_p3), %v4242_v1  ;;  %3853 = vmatprep.mubr.msk.bf16.mxu0 (!%p365_p3), %vm4243_vm0, %v4242_v1  ;;  %s4345_s22 = sadd.s32 (!%p365_p3), %s4224_s27, %s3014_s21  ;;  %s3255_s13 = sadd.s32 (!%p365_p3), 8, %s3010_s16  ;;  %v4101_v8 = vld [vmem:[%s5265_s3 + $0x28] sm:$0xff] (!%p365_p3)   ;;  %v4102_v10 = vld [vmem:[%s5265_s3 + $0x30] sm:$0xff] (!%p365_p3)   ;;  %v4118_v11 = vld [vmem:[%s5265_s3 + $0x18] sm:$0xff] (!%p365_p3)   ;;  %vm4244_vm3 = vmmov (!%p365_p3), 1  }
   0xd   : > { %s3015_s24 = sshll.u32 (!%p365_p3), %s4345_s22, 4  ;;  %3838 = vmatpush3.bf16.msra.mxu0 (!%p365_p3), %v4111_v6  ;;  %p461_p8 = scmp.lt.s32.totalorder (!%p365_p3), %s3255_s13, 15  ;;  %v4103_v12 = vld [vmem:[%s5265_s3 + $0x38] sm:$0xff] (!%p365_p3)   ;;  %v4105_v13 = vld [vmem:[%s5265_s3] sm:$0xff] (!%p365_p3)   ;;  %v4106_v17 = vld [vmem:[%s5265_s3 + $0x8] sm:$0xff] (!%p365_p3)   ;;  %v4520_v58 = vadd.s32 (!%p365_p3), 24, %v4514_v56 }
   0xe   : > { %p451_p7 = scmp.lt.s32.totalorder (!%p365_p3), %s3015_s24, 63  ;;  %3839 = vmatprep.subr.bf16.mxu0 (!%p365_p3), %v4242_v1  ;;  %v4120_v14 = vld [vmem:[%s5265_s3 + $0x20] sm:$0xff] (!%p365_p3)   ;;  %v4122_v18 = vld [vmem:[%s5265_s3 + $0x28] sm:$0xff] (!%p365_p3)   ;;  %v4107_v19 = vld [vmem:[%s5265_s3 + $0x10] sm:$0xff] (!%p365_p3)   ;;  %v4523_v59 = vadd.s32 (!%p365_p3), 16, %v4514_v56  ;;  %p495_p10 = scmp.gt.s32.totalorder (!%p365_p3), %s4224_s27, 0 }
   0xf   : > { %3788 = vmatpush3.bf16.msra.mxu1 (!%p365_p3), %v4097_v2  ;;  %v4124_v20 = vld [vmem:[%s5265_s3 + $0x30] sm:$0xff] (!%p365_p3)   ;;  %v4108_v21 = vld [vmem:[%s5265_s3 + $0x18] sm:$0xff] (!%p365_p3)   ;;  %v4109_v23 = vld [vmem:[%s5265_s3 + $0x20] sm:$0xff] (!%p365_p3)   ;;  %v1045_v62 = vand.u32 (!%p365_p3), 15, %v4520_v58  ;;  %p497_p11 = scmp.lt.s32.totalorder (!%p365_p3), %s4224_s27, 1  ;;  %p488_p12 = scmp.lt.s32.totalorder (!%p365_p3), %s4345_s22, 3 }
  0x10   : > { %3789 = vmatprep.subr.bf16.mxu1 %v4242_v1  ;;  %s5331_s17 = smov (!%p433_p5, %s3011_s17), 0  ;;  %s5335_s24 = smov (!%p451_p7, %s3015_s24), 63  ;;  %v4126_v22 = vld [vmem:[%s5265_s3 + $0x38] sm:$0xff]   ;;  %v4110_v25 = vld [vmem:[%s5265_s3 + $0x28] sm:$0xff]   ;;  %v4112_v26 = vld [vmem:[%s5265_s3 + $0x30] sm:$0xff]   ;;  %v1038_v63 = vand.u32 15, %v4523_v59 }
  0x11   : > { %s435_s23 = sadd.s32 %s3009_s20, %s5331_s17  ;;  %s3016_s14 = sshll.u32 %s5335_s24, 2  ;;  %3840 = vmatpush3.bf16.msra.mxu0 %v4113_v7  ;;  %v4114_v27 = vld [vmem:[%s5265_s3 + $0x38] sm:$0xff]   ;;  %v4130_v35 = vld [vmem:[%s5267_s5 + $0x100] sm:$0xff]   ;;  %v4132_v37 = vld [vmem:[%s5267_s5 + $0x108] sm:$0xff]   ;;  %vm4045_vm1 = vcmp.ne.s32.totalorder %v1045_v62, 15 }
  0x12   : > { %s3012_s12 = sshll.u32 %s435_s23, 1  ;;  %s5337_s13 = smov (!%p461_p8, %s3255_s13), 15  ;;  %3841 = vmatprep.subr.bf16.mxu0 %v4242_v1  ;;  %v4131_v36 = vld [vmem:[%s5267_s5 + $0xc0] sm:$0xff]   ;;  %v4136_v39 = vld [vmem:[%s5267_s5 + $0x148] sm:$0xff]   ;;  %v4135_v41 = vld [vmem:[%s5267_s5 + $0x110] sm:$0xff]   ;;  %vm4037_vm2 = vcmp.ne.s32.totalorder %v1038_v63, 0 }
  0x13   : > { %3790 = vmatpush3.bf16.msra.mxu1 %v4098_v3  ;;  %p437_p6 = scmp.lt.s32.totalorder %s3012_s12, 63  ;;  %s463_s25 = sadd.s32 %s3009_s20, %s5337_s13  ;;  %v4133_v38 = vld [vmem:[%s5267_s5 + $0x140] sm:$0xff]   ;;  %v4134_v40 = vld [vmem:[%s5267_s5 + $0xc8] sm:$0xff]   ;;  %v4139_v42 = vld [vmem:[%s5267_s5 + $0x150] sm:$0xff]   ;;  %v4541_v3 = vadd.s32 56, %v4514_v56 }
  0x14   : > { %3791 = vmatprep.subr.bf16.mxu1 %v4242_v1  ;;  %s3019_s18 = sshll.u32 %s463_s25, 1  ;;  %v4137_v43 = vld [vmem:[%s5267_s5 + $0xd0] sm:$0xff]   ;;  %v4138_v44 = vld [vmem:[%s5267_s5 + $0x118] sm:$0xff]   ;;  %v4141_v46 = vld [vmem:[%s5267_s5 + $0x120] sm:$0xff]   ;;  %s5341_s22 = smov (!%p488_p12, %s4345_s22), 3 }
  0x15   : > { %s5333_s12 = smov (!%p437_p6, %s3012_s12), 63  ;;  %p465_p9 = scmp.lt.s32.totalorder %s3019_s18, 63  ;;  %3842 = vmatpush3.bf16.msra.mxu0 %v4116_v9  ;;  %v4140_v45 = vld [vmem:[%s5267_s5 + $0xd8] sm:$0xff]   ;;  %v4143_v47 = vld [vmem:[%s5267_s5 + $0xe0] sm:$0xff]   ;;  %v4144_v49 = vld [vmem:[%s5267_s5 + $0x128] sm:$0xff]   ;;  %v1073_v6 = vand.u32 15, %v4541_v3 }
  0x16   : > { %s3013_s19 = sshll.u32 %s5333_s12, 2  ;;  %3843 = vmatprep.subr.bf16.mxu0 %v4242_v1  ;;  %v4142_v48 = vld [vmem:[%s5267_s5 + $0x158] sm:$0xff]   ;;  %v4146_v50 = vld [vmem:[%s5267_s5 + $0xe8] sm:$0xff]   ;;  %v4145_v51 = vld [vmem:[%s5267_s5 + $0x160] sm:$0xff]   ;;  %s5207_s12 = scalar_lea.vmem %s5269_s7, %s3016_s14 }
  0x17   : > { %3792 = vmatpush3.bf16.msra.mxu1 %v4099_v4  ;;  %s4366_s23 = scalar_lea.vmem %s5262_s0, %s3013_s19  ;;  %s4381_s19 = scalar_lea.vmem %s5263_s1, %s3016_s14  ;;  %v4147_v52 = vld [vmem:[%s5267_s5 + $0x130] sm:$0xff]   ;;  %v4148_v55 = vld [vmem:[%s5267_s5 + $0x168] sm:$0xff]   ;;  %v4150_v57 = vld [vmem:[%s5267_s5 + $0x138] sm:$0xff]   ;;  %v4544_v4 = vadd.s32 32, %v4514_v56  ;;  %vm4670_vm7 = vcmp.ne.s32.totalorder %v1073_v6, 15 }
  0x18   : > { %3793 = vmatprep.subr.bf16.mxu1 %v4242_v1  ;;  %s5339_s18 = smov (!%p465_p9, %s3019_s18), 63  ;;  %v4104_v15 = vld [vmem:[%s4366_s23] sm:$0xff]   ;;  %v4117_v28 = vld [vmem:[%s4381_s19 + $0x8] sm:$0xff]   ;;  %v4119_v29 = vld [vmem:[%s4381_s19 + $0x10] sm:$0xff]   ;;  %s3025_s24 = sshll.u32 %s5341_s22, 3 }
  0x19   : > { %s3020_s16 = sshll.u32 %s5339_s18, 2  ;;  %3844 = vmatpush3.bf16.msra.mxu0 %v4118_v11  ;;  %v4115_v16 = vld [vmem:[%s4381_s19] sm:$0xff]   ;;  %v4121_v30 = vld [vmem:[%s4381_s19 + $0x18] sm:$0xff]   ;;  %v4125_v32 = vld [vmem:[%s4381_s19 + $0x28] sm:$0xff]   ;;  %v1052_v7 = vand.u32 15, %v4544_v4  ;;  %v4559_v11 = vadd.s32 48, %v4514_v56  ;;  %s491_s27 = scalar_lea.vmem %s5270_s8, %s3025_s24 }
  0x1a   : > { %3845 = vmatprep.subr.bf16.mxu0 %v4242_v1  ;;  %s468_s17 = scalar_lea.vmem %s5264_s2, %s3020_s16  ;;  %v4123_v31 = vld [vmem:[%s4381_s19 + $0x20] sm:$0xff]   ;;  %v4128_v33 = vld [vmem:[%s4381_s19 + $0x30] sm:$0xff]   ;;  %v4129_v34 = vld [vmem:[%s4381_s19 + $0x38] sm:$0xff]  }
  0x1b   : > { %3794 = vmatpush3.bf16.msra.mxu1 %v4100_v5  ;;  %v4127_v24 = vld [vmem:[%s468_s17] sm:$0xff]   ;;  %v4149_v54 = vld [vmem:[%s5267_s5 + $0xf0] sm:$0xff]   ;;  %v4152_v60 = vld [vmem:[%s5267_s5 + $0xf8] sm:$0xff]   ;;  %s496_s26 = scalar_select %p495_p10, 1.0, 0.0  ;;  %vm4692_vm9 = vcmp.ne.s32.totalorder %v1052_v7, 0 }
  0x1c   : > { %3795 = vmatprep.subr.bf16.mxu1 %v4242_v1  ;;  %v4151_v61 = vld [vmem:[%s5267_s5 + $0x170] sm:$0xff]   ;;  %v4153_v0 = vld [vmem:[%s5267_s5 + $0x178] sm:$0xff]   ;;  %v4154_v5 = vld [vmem:[%s5267_s5 + $0x40] sm:$0xff]   ;;  %s498_s28 = scalar_select %p497_p11, 1.0, 0.0 }
  0x1d   : > { %3846 = vmatpush3.bf16.msra.mxu0 %v4120_v14  ;;  %v4564_v14 = vadd.s32 104, %v4514_v56  ;;  %vm4642_vm4 = vmpackc.low %vm4045_vm1, %vm4244_vm3  ;;  %v4171_v63 = vld [vmem:[%s5267_s5 + $0x180] sm:$0xff]   ;;  %v4175_v4 = vld [vmem:[%s5267_s5 + $0x1d0] sm:$0xff]  }
  0x1e   : > { %3847 = vmatprep.subr.bf16.mxu0 %v4242_v1  ;;  %vm4648_vm5 = vmpackc.low %vm4244_vm3, %vm4037_vm2  ;;  %v4155_v6 = vld [vmem:[%s5267_s5] sm:$0xff]  }
  0x1f   : > { %3796 = vmatpush3.bf16.msra.mxu1 %v4101_v8  ;;  %v4552_v8 = vadd.s32 72, %v4514_v56  ;;  %vm4703_vm10 = vmpackc.low %vm4670_vm7, %vm4244_vm3 }
  0x20   : > { %3797 = vmatprep.subr.bf16.mxu1 %v4242_v1  ;;  %vm4717_vm11 = vmpackc.low %vm4244_vm3, %vm4692_vm9 }
  0x21   : > { %3848 = vmatpush3.bf16.msra.mxu0 %v4122_v18  ;;  %v1087_v9 = vand.u32 15, %v4552_v8 }
  0x22   : > { %3849 = vmatprep.subr.bf16.mxu0 %v4242_v1 }
  0x23   : > { %3798 = vmatpush3.bf16.msra.mxu1 %v4102_v10  ;;  %v4556_v10 = vadd.s32 88, %v4514_v56  ;;  %vm4735_vm12 = vcmp.ne.s32.totalorder %v1087_v9, 15  ;;  %v4178_v9 = vld [vmem:[%s5267_s5 + $0x1d8] sm:$0xff]  }
  0x24   : > { %3799 = vmatprep.subr.bf16.mxu1 %v4242_v1  ;;  %vm4770_vm14 = vmpackc.low %vm4735_vm12, %vm4244_vm3 }
  0x25   : > { %3850 = vmatpush3.bf16.msra.mxu0 %v4124_v20  ;;  %v4576_v20 = vadd.s32 136, %v4514_v56 }
  0x26   : > { %3851 = vmatprep.subr.bf16.mxu0 %v4242_v1  ;;  %v4537_v1 = vadd.s32 40, %v4514_v56 }
  0x27   : > { %3800 = vmatpush3.bf16.msra.mxu1 %v4103_v12  ;;  %v1101_v12 = vand.u32 15, %v4556_v10  ;;  %v4158_v10 = vld [vmem:[%s5267_s5 + $0x50] sm:$0xff]  }
  0x28   : > { %3805 = vmatprep.subr.bf16.mxu1 %v4105_v13  ;;  %v1059_v2 = vand.u32 15, %v4537_v1 }
  0x29   : > { %3852 = vmatpush3.bf16.msra.mxu0 %v4126_v22  ;;  %v4580_v22 = vadd.s32 80, %v4514_v56  ;;  %vm4749_vm13 = vcmp.ne.s32.totalorder %v1101_v12, 15 }
  0x2a   : > { %3802 = vmatmul.mubr.bf16.vlgmr.msra.gmra.mrb[0].mxu1 %v4104_v15  ;;  %3857 = vmatprep.subr.bf16.mxu0 %v4133_v38  ;;  %v1115_v15 = vand.u32 15, %v4564_v14  ;;  %vm4046_vm6 = vcmp.ne.s32.totalorder %v1059_v2, 15  ;;  %vm4787_vm0 = vmpackc.low %vm4749_vm13, %vm4244_vm3  ;;  %v4162_v14 = vld [vmem:[%s5267_s5 + $0x60] sm:$0xff]  }
  0x2b   : > { %3806 = vmatpush3.bf16.msra.mxu1 %v4105_v13  ;;  %3821 = vmatprep.mubr.bf16.mxu1 %v4115_v16  ;;  %v1066_v13 = vand.u32 15, %v4559_v11  ;;  %v4568_v16 = vadd.s32 120, %v4514_v56  ;;  %vm4683_vm8 = vmpackc.low %vm4046_vm6, %vm4244_vm3  ;;  %v4180_v11 = vld [vmem:[%s5267_s5 + $0x1e0] sm:$0xff]  }
  0x2c   : > { %3807 = vmatprep.subr.bf16.mxu1 %v4106_v17  ;;  %3854 = vmatmul.mubr.bf16.vlgmr.msra.gmra.mrb[0].mxu0 %v4127_v24  ;;  %v4169_v24 = vld [vmem:[%s5267_s5 + $0x1c0] sm:$0xff]   ;;  %vm4050_vm2 = vcmp.ne.s32.totalorder %v1115_v15, 15 }
  0x2d   : > { %3858 = vmatpush3.bf16.msra.mxu0 %v4133_v38  ;;  %v1129_v18 = vand.u32 15, %v4568_v16  ;;  %vm4779_vm15 = vcmp.ne.s32.totalorder %v1066_v13, 0  ;;  %vm4844_vm6 = vmpackc.low %vm4050_vm2, %vm4244_vm3 }
  0x2e   : > { %3859 = vmatprep.subr.bf16.mxu0 %v4136_v39  ;;  %vm4804_vm1 = vmpackc.low %vm4244_vm3, %vm4779_vm15 }
  0x2f   : > { %3808 = vmatpush3.bf16.msra.mxu1 %v4106_v17  ;;  %v4571_v17 = vadd.s32 64, %v4514_v56  ;;  %vm4051_vm7 = vcmp.ne.s32.totalorder %v1129_v18, 15 }
  0x30   : > { %3809 = vmatprep.subr.bf16.mxu1 %v4107_v19  ;;  %vm4868_vm12 = vmpackc.low %vm4051_vm7, %vm4244_vm3 }
  0x31   : > { %3860 = vmatpush3.bf16.msra.mxu0 %v4136_v39 }
  0x32   : > { %3861 = vmatprep.subr.bf16.mxu0 %v4139_v42 }
  0x33   : > { %3810 = vmatpush3.bf16.msra.mxu1 %v4107_v19  ;;  %v1080_v19 = vand.u32 15, %v4571_v17 }
  0x34   : > { %3811 = vmatprep.subr.bf16.mxu1 %v4108_v21 }
  0x35   : > { %3862 = vmatpush3.bf16.msra.mxu0 %v4139_v42  ;;  %vm4855_vm9 = vcmp.ne.s32.totalorder %v1080_v19, 0  ;;  %v5304_v19 = vmov 0 }
  0x36   : > { %3863 = vmatprep.subr.bf16.mxu0 %v4142_v48  ;;  %v5305_v19 = vsel %vm4868_vm12, 4294967295, %v5304_v19  ;;  %vm4878_vm13 = vmpackc.low %vm4244_vm3, %vm4855_vm9 }
  0x37   : > { %3812 = vmatpush3.bf16.msra.mxu1 %v4108_v21  ;;  %v1143_v21 = vand.u32 15, %v4576_v20  ;;  %v4167_v20 = vld [vmem:[%s5267_s5 + $0x30] sm:$0xff]  }
  0x38   : > { %3813 = vmatprep.subr.bf16.mxu1 %v4109_v23 }
  0x39   : > { %3864 = vmatpush3.bf16.msra.mxu0 %v4142_v48  ;;  %vm4052_vm15 = vcmp.ne.s32.totalorder %v1143_v21, 15 }
  0x3a   : > { %3865 = vmatprep.subr.bf16.mxu0 %v4145_v51  ;;  %vm4916_vm7 = vmpackc.low %vm4052_vm15, %vm4244_vm3 }
  0x3b   : > { %3814 = vmatpush3.bf16.msra.mxu1 %v4109_v23  ;;  %v1094_v23 = vand.u32 15, %v4580_v22 }
  0x3c   : > { %3815 = vmatprep.subr.bf16.mxu1 %v4110_v25 }
  0x3d   : > { %3866 = vmatpush3.bf16.msra.mxu0 %v4145_v51  ;;  %vm4041_vm2 = vcmp.ne.s32.totalorder %v1094_v23, 0  ;;  %v4168_v23 = vld [vmem:[%s5267_s5 + $0x78] sm:$0xff]  }
  0x3e   : > { %3867 = vmatprep.subr.bf16.mxu0 %v4148_v55  ;;  %vm4930_vm9 = vmpackc.low %vm4244_vm3, %vm4041_vm2 }
  0x3f   : > { %3816 = vmatpush3.bf16.msra.mxu1 %v4110_v25  ;;  %v4587_v25 = vadd.s32 96, %v4514_v56 }
  0x40   : > { %3817 = vmatprep.subr.bf16.mxu1 %v4112_v26 }
  0x41   : > { %3868 = vmatpush3.bf16.msra.mxu0 %v4148_v55 }
  0x42   : > { %3869 = vmatprep.subr.bf16.mxu0 %v4151_v61 }
  0x43   : > { %3818 = vmatpush3.bf16.msra.mxu1 %v4112_v26  ;;  %v1108_v26 = vand.u32 15, %v4587_v25  ;;  %v4182_v25 = vld [vmem:[%s5267_s5 + $0x90] sm:$0xff]  }
  0x44   : > { %3819 = vmatprep.subr.bf16.mxu1 %v4114_v27 }
  0x45   : > { %3870 = vmatpush3.bf16.msra.mxu0 %v4151_v61  ;;  %vm4042_vm2 = vcmp.ne.s32.totalorder %v1108_v26, 0 }
  0x46   : > { %3871 = vmatprep.subr.bf16.mxu0 %v4153_v0 }
  0x47   : > { %3820 = vmatpush3.bf16.msra.mxu1 %v4114_v27  ;;  %v4591_v27 = vadd.s32 112, %v4514_v56 }
  0x48   : > { %3545 = vmatprep.subr.bf16.mxu1 %v4130_v35 }
  0x49   : > { %3872 = vmatpush3.bf16.msra.mxu0 %v4153_v0 }
  0x4a   : > { %3822 = vmatmul.mubr.bf16.vlgmr.msra.gmra.mrb[4].mxu1 %v4117_v28  ;;  %3625 = vmatprep.subr.bf16.mxu0 %v4154_v5  ;;  %v1122_v28 = vand.u32 15, %v4591_v27  ;;  %v4190_v27 = vld [vmem:[%s5267_s5 + $0xa0] sm:$0xff]  }
  0x4b   : > { %3825 = vmatprep.mubr.bf16.mxu1 %v4119_v29  ;;  %3546 = vmatpush3.bf16.msra.mxu1 %v4131_v36  ;;  %v4595_v29 = vadd.s32 128, %v4514_v56 }
  0x4c   : > { %3547 = vmatprep.subr.bf16.mxu1 %v4132_v37 }
  0x4f   : > { %3548 = vmatpush3.bf16.msra.mxu1 %v4134_v40 }
  0x50   : > { %3549 = vmatprep.subr.bf16.mxu1 %v4135_v41 }
  0x52   : > { %3826 = vmatmul.mubr.bf16.gmra.mrb[8].mxu1 %v4121_v30  ;;  %v1136_v30 = vand.u32 15, %v4595_v29  ;;  %v4192_v29 = vld [vmem:[%s5267_s5 + $0xb0] sm:$0xff]  }
  0x53   : > { %3829 = vmatprep.mubr.bf16.mxu1 %v4123_v31  ;;  %3550 = vmatpush3.bf16.msra.mxu1 %v4137_v43  ;;  %v4602_v31 = vld [vmem:[%s5266_s4] ss:$0 sm:$0xff]  ;;  %v994_v43 = vstv %s498_s28 }
  0x54   : > { %3551 = vmatprep.subr.bf16.mxu1 %v4138_v44 }
  0x57   : > { %3552 = vmatpush3.bf16.msra.mxu1 %v4140_v45 }
  0x58   : > { %3553 = vmatprep.subr.bf16.mxu1 %v4141_v46 }
  0x5a   : > { %3830 = vmatmul.mubr.bf16.gmra.mrb[12].mxu1 %v4125_v32 }
  0x5b   : > { %3833 = vmatprep.mubr.bf16.mxu1 %v4128_v33  ;;  %3554 = vmatpush3.bf16.msra.mxu1 %v4143_v47  ;;  %v621_v33 = vstv %s496_s26 }
  0x5c   : > { %3555 = vmatprep.subr.bf16.mxu1 %v4144_v49 }
  0x5f   : > { %3556 = vmatpush3.bf16.msra.mxu1 %v4146_v50 }
  0x60   : > { %3557 = vmatprep.subr.bf16.mxu1 %v4147_v52 }
  0x62   : > { %3834 = vmatmul.mubr.bf16.gmra.mrb[16].mxu1 %v4129_v34 }
  0x63   : > { %3558 = vmatpush3.bf16.msra.mxu1 %v4149_v54 }
  0x64   : > { %3559 = vmatprep.subr.bf16.mxu1 %v4150_v57 }
  0x67   : > { %3560 = vmatpush3.bf16.msra.mxu1 %v4152_v60 }
  0x68   : > { %3705 = vmatprep.subr.bf16.mxu1 %v4169_v24 }
  0xfd   : > { %v614_v32 = vpop.f32.mrb[0].mxu1 }
  0xfe   : > { %v615_v34 = vadd.f32 %v4602_v31, %v614_v32  ;;  %v3803_v35 = vpop.f32.mrb[1].mxu1 }
  0xff   : > { %v617_v36 = vpop.f32.mrb[2].mxu1  ;;  %v987_v42 = vpop.f32.mrb[0].mxu0 }
 0x100   : > { %v4605_v37 = vmul.f32 %v621_v33, %v615_v34  ;;  %v618_v38 = vadd.f32 %v4602_v31, %v617_v36  ;;  %v3804_v39 = vpop.f32.mrb[3].mxu1  ;;  %v988_v44 = vadd.f32 %v4602_v31, %v987_v42  ;;  %v3855_v45 = vpop.f32.mrb[1].mxu0  ;;  %v4197_v42 = vld [vmem:[%s5267_s5 + $0x218] sm:$0xff]  }
 0x101   : > { %v990_v46 = vpop.f32.mrb[2].mxu0 }
 0x102   : > { %624 = vst [vmem:[#allocation3 + $0x8] sm:$0xff] %v4605_v37  ;;  %v4609_v40 = vmul.f32 %v621_v33, %v618_v38  ;;  %v4616_v47 = vmul.f32 %v994_v43, %v988_v44  ;;  %v991_v48 = vadd.f32 %v4602_v31, %v990_v46  ;;  %v3856_v49 = vpop.f32.mrb[3].mxu0 }
 0x104   : > { %625 = vst [vmem:[#allocation3 + $0x10] sm:$0xff] %v4609_v40  ;;  %v1420_v41 = vpack.c.bf16 %v4609_v40, %v4605_v37  ;;  %997 = vst [vmem:[#allocation3 + $0x98] sm:$0xff] %v4616_v47  ;;  %v4620_v50 = vmul.f32 %v994_v43, %v991_v48 }
 0x106   : > { %998 = vst [vmem:[#allocation3 + $0xa0] sm:$0xff] %v4620_v50  ;;  %v1429_v51 = vpack.c.bf16 %v4620_v50, %v4616_v47  ;;  %v4200_v47 = vld [vmem:[%s5267_s5 + $0x230] sm:$0xff]   ;;  %v4201_v50 = vld [vmem:[%s5267_s5 + $0x238] sm:$0xff]  }
 0x11d   : > { %v3823_v52 = vpop.f32.mrb[4].mxu1 }
 0x11e   : > { %v804_v53 = vadd.f32 %v3823_v52, %v4602_v31  ;;  %v795_v54 = vpop.f32.mrb[5].mxu1 }
 0x11f   : > { %v796_v55 = vadd.f32 %v4602_v31, %v795_v54  ;;  %v3824_v57 = vpop.f32.mrb[6].mxu1 }
 0x120   : > { %860 = vst [vmem:[#allocation3 + $0x28] sm:$0xff] %v804_v53  ;;  %v807_v60 = vadd.f32 %v3824_v57, %v4602_v31  ;;  %v798_v61 = vpop.f32.mrb[7].mxu1  ;;  %v4157_v57 = vld [vmem:[%s5267_s5 + $0x8] sm:$0xff]  }
 0x121   : > { %858 = vst [vmem:[#allocation3 + $0x18] sm:$0xff] %v796_v55  ;;  %v799_v0 = vadd.f32 %v4602_v31, %v798_v61 }
 0x122   : > { %861 = vst [vmem:[#allocation3 + $0x30] sm:$0xff] %v807_v60  ;;  %v4629_v5 = vpack.c.bf16 %v807_v60, %v804_v53  ;;  %v4173_v53 = vld [vmem:[%s5267_s5 + $0x1c8] sm:$0xff]  }
 0x123   : > { %859 = vst [vmem:[#allocation3 + $0x20] sm:$0xff] %v799_v0  ;;  %v4631_v24 = vpack.c.bf16 %v799_v0, %v796_v55  ;;  %v4174_v60 = vld [vmem:[%s5267_s5 + $0x188] sm:$0xff]  }
 0x125   : > { %v3827_v32 = vpop.f32.mrb[8].mxu1  ;;  %1761 = vmatprep.mubr.bf16.mxu1 %v4631_v24 }
 0x126   : > { %v820_v33 = vadd.f32 %v3827_v32, %v4602_v31  ;;  %v811_v34 = vpop.f32.mrb[9].mxu1 }
 0x127   : > { %v812_v35 = vadd.f32 %v4602_v31, %v811_v34  ;;  %v3828_v36 = vpop.f32.mrb[10].mxu1 }
 0x128   : > { %864 = vst [vmem:[#allocation3 + $0x48] sm:$0xff] %v820_v33  ;;  %v823_v38 = vadd.f32 %v3828_v36, %v4602_v31  ;;  %v814_v39 = vpop.f32.mrb[11].mxu1  ;;  %v1302_v62 = vld [vmem:[#allocation3 + $0x17] sm:$0xff] }
 0x129   : > { %862 = vst [vmem:[#allocation3 + $0x38] sm:$0xff] %v812_v35  ;;  %v815_v58 = vadd.f32 %v4602_v31, %v814_v39  ;;  %v1364_v32 = vld [vmem:[#allocation3 + $0x29] sm:$0xff] }
 0x12a   : > { %865 = vst [vmem:[#allocation3 + $0x50] sm:$0xff] %v823_v38  ;;  %v1362_v43 = vld [vmem:[#allocation3 + $0x19] sm:$0xff]  ;;  %v1363_v44 = vld [vmem:[#allocation3 + $0x21] sm:$0xff]  ;;  %v4655_v46 = vpack.c.bf16 %v823_v38, %v820_v33  ;;  %v1305_v38 = vld [vmem:[#allocation3 + $0x2f] sm:$0xff] }
 0x12b   : > { %v1303_v45 = vld [vmem:[#allocation3 + $0x1f] sm:$0xff]  ;;  %863 = vst [vmem:[#allocation3 + $0x40] sm:$0xff] %v815_v58  ;;  %v4657_v48 = vpack.c.bf16 %v1363_v44, %v1362_v43  ;;  %v4663_v52 = vpack.c.bf16 %v815_v58, %v812_v35  ;;  %v1304_v36 = vld [vmem:[#allocation3 + $0x27] sm:$0xff] }
 0x12c   : > { %v4659_v49 = vpack.c.bf16 %v1303_v45, %v1302_v62  ;;  %v4156_v44 = vld [vmem:[%s5267_s5 + $0x48] sm:$0xff]   ;;  %v4731_v54 = vpack.c.bf16 %v1305_v38, %v1304_v36  ;;  %v1378_v33 = vld [vmem:[#allocation3 + $0x99] sm:$0xff] }
 0x12d   : > { %v3831_v55 = vpop.f32.mrb[12].mxu1  ;;  %3873 = vmatprep.mubr.msk.bf16.mxu0 %vm4642_vm4, %v4657_v48 }
 0x12e   : > { %3322 = vmatmul.mubr.msk.bf16.vlgmr.msra.gmra.mrb[20].mxu1 %vm4648_vm5, %v4659_v49  ;;  %v836_v1 = vadd.f32 %v3831_v55, %v4602_v31  ;;  %v827_v2 = vpop.f32.mrb[13].mxu1  ;;  %v4196_v55 = vld [vmem:[%s5267_s5 + $0x210] sm:$0xff]  }
 0x12f   : > { %1769 = vmatprep.mubr.bf16.mxu1 %v4629_v5  ;;  %3706 = vmatpush3.bf16.msra.mxu1 %v4171_v63  ;;  %v828_v61 = vadd.f32 %v4602_v31, %v827_v2  ;;  %v3832_v0 = vpop.f32.mrb[14].mxu1 }
 0x130   : > { %3707 = vmatprep.subr.bf16.mxu1 %v4173_v53  ;;  %868 = vst [vmem:[#allocation3 + $0x68] sm:$0xff] %v836_v1  ;;  %v839_v7 = vadd.f32 %v3832_v0, %v4602_v31  ;;  %v830_v34 = vpop.f32.mrb[15].mxu1  ;;  %v1365_v35 = vld [vmem:[#allocation3 + $0x31] sm:$0xff] }
 0x131   : > { %866 = vst [vmem:[#allocation3 + $0x58] sm:$0xff] %v828_v61  ;;  %v831_v39 = vadd.f32 %v4602_v31, %v830_v34  ;;  %v4712_v58 = vpack.c.bf16 %v1365_v35, %v1364_v32  ;;  %v4159_v0 = vld [vmem:[%s5267_s5 + $0x10] sm:$0xff]   ;;  %v4179_v35 = vld [vmem:[%s5267_s5 + $0x198] sm:$0xff]  }
 0x132   : > { %869 = vst [vmem:[#allocation3 + $0x70] sm:$0xff] %v839_v7  ;;  %v1366_v63 = vld [vmem:[#allocation3 + $0x39] sm:$0xff]  ;;  %v1367_v43 = vld [vmem:[#allocation3 + $0x41] sm:$0xff]  ;;  %v4724_v45 = vpack.c.bf16 %v839_v7, %v836_v1  ;;  %v4176_v1 = vld [vmem:[%s5267_s5 + $0x190] sm:$0xff]  }
 0x133   : > { %3708 = vmatpush3.bf16.msra.mxu1 %v4174_v60  ;;  %867 = vst [vmem:[#allocation3 + $0x60] sm:$0xff] %v831_v39  ;;  %3874 = vmatmul.mubr.msk.bf16.vlgmr.msra.gmra.mrb[4].mxu0 %vm4683_vm8, %v4712_v58  ;;  %v4729_v53 = vpack.c.bf16 %v1367_v43, %v1366_v63  ;;  %v4739_v2 = vpack.c.bf16 %v831_v39, %v828_v61  ;;  %v1368_v38 = vld [vmem:[#allocation3 + $0x49] sm:$0xff]  ;;  %v1307_v63 = vld [vmem:[#allocation3 + $0x3f] sm:$0xff] }
 0x134   : > { %3709 = vmatprep.subr.bf16.mxu1 %v4175_v4  ;;  %3626 = vmatpush3.bf16.msra.mxu0 %v4155_v6  ;;  %v4161_v32 = vld [vmem:[%s5267_s5 + $0x18] sm:$0xff]   ;;  %v1308_v18 = vld [vmem:[#allocation3 + $0x47] sm:$0xff] }
 0x135   : > { %v3835_v60 = vpop.f32.mrb[16].mxu1  ;;  %3877 = vmatprep.mubr.msk.bf16.mxu0 %vm4703_vm10, %v4729_v53  ;;  %3627 = vmatprep.subr.bf16.mxu0 %v4156_v44 }
 0x136   : > { %3326 = vmatmul.mubr.msk.bf16.gmra.mrb[24].mxu1 %vm4717_vm11, %v4731_v54  ;;  %v852_v12 = vadd.f32 %v3835_v60, %v4602_v31  ;;  %v843_v6 = vpop.f32.mrb[17].mxu1 }
 0x137   : > { %1777 = vmatprep.mubr.bf16.mxu1 %v4663_v52  ;;  %v844_v4 = vadd.f32 %v4602_v31, %v843_v6  ;;  %v3836_v7 = vpop.f32.mrb[18].mxu1  ;;  %3710 = vmatpush3.bf16.msra.mxu1 %v4176_v1  ;;  %v4160_v1 = vld [vmem:[%s5267_s5 + $0x58] sm:$0xff]  }
 0x138   : > { %872 = vst [vmem:[#allocation3 + $0x88] sm:$0xff] %v852_v12  ;;  %v855_v13 = vadd.f32 %v3836_v7, %v4602_v31  ;;  %3628 = vmatpush3.bf16.msra.mxu0 %v4157_v57  ;;  %v846_v36 = vpop.f32.mrb[19].mxu1  ;;  %v1369_v39 = vld [vmem:[#allocation3 + $0x51] sm:$0xff]  ;;  %3711 = vmatprep.subr.bf16.mxu1 %v4178_v9  ;;  %v4183_v7 = vld [vmem:[%s5267_s5 + $0x1e8] sm:$0xff]  }
 0x139   : > { %870 = vst [vmem:[#allocation3 + $0x78] sm:$0xff] %v844_v4  ;;  %v847_v43 = vadd.f32 %v4602_v31, %v846_v36  ;;  %3629 = vmatprep.subr.bf16.mxu0 %v4158_v10  ;;  %v4799_v44 = vpack.c.bf16 %v1369_v39, %v1368_v38  ;;  %v1306_v9 = vld [vmem:[#allocation3 + $0x37] sm:$0xff]  ;;  %v1372_v36 = vld [vmem:[#allocation3 + $0x69] sm:$0xff] }
 0x13a   : > { %873 = vst [vmem:[#allocation3 + $0x90] sm:$0xff] %v855_v13  ;;  %v1370_v57 = vld [vmem:[#allocation3 + $0x59] sm:$0xff]  ;;  %v1371_v8 = vld [vmem:[#allocation3 + $0x61] sm:$0xff]  ;;  %v4811_v60 = vpack.c.bf16 %v855_v13, %v852_v12  ;;  %v4818_v10 = vpack.c.bf16 %v1307_v63, %v1306_v9  ;;  %v4185_v13 = vld [vmem:[%s5267_s5 + $0x1f0] sm:$0xff]  }
 0x13b   : > { %871 = vst [vmem:[#allocation3 + $0x80] sm:$0xff] %v847_v43  ;;  %3878 = vmatmul.mubr.msk.bf16.gmra.mrb[8].mxu0 %vm4770_vm14, %v4799_v44  ;;  %v4816_v31 = vpack.c.bf16 %v1371_v8, %v1370_v57  ;;  %v4822_v6 = vpack.c.bf16 %v847_v43, %v844_v4  ;;  %3712 = vmatpush3.bf16.msra.mxu1 %v4179_v35  ;;  %v4181_v12 = vld [vmem:[%s5267_s5 + $0x1a0] sm:$0xff]   ;;  %v1309_v4 = vld [vmem:[#allocation3 + $0x4f] sm:$0xff]  ;;  %v1024_v35 = vand.u32 15, %v4514_v56 }
 0x13c   : > { %3630 = vmatpush3.bf16.msra.mxu0 %v4159_v0  ;;  %3713 = vmatprep.subr.bf16.mxu1 %v4180_v11  ;;  %v4163_v0 = vld [vmem:[%s5267_s5 + $0x20] sm:$0xff]   ;;  %v4184_v11 = vld [vmem:[%s5267_s5 + $0x1a8] sm:$0xff]   ;;  %v4887_v57 = vpack.c.bf16 %v1309_v4, %v1308_v18  ;;  %v4186_v8 = vld [vmem:[%s5267_s5 + $0x1b0] sm:$0xff]   ;;  %v5308_v4 = vmov 0 }
 0x13d   : > { %3881 = vmatprep.mubr.msk.bf16.mxu0 %vm4787_vm0, %v4816_v31  ;;  %3631 = vmatprep.subr.bf16.mxu0 %v4160_v1  ;;  %v4164_v38 = vld [vmem:[%s5267_s5 + $0x68] sm:$0xff]   ;;  %v5309_v4 = vsel %vm4916_vm7, 4294967295, %v5308_v4  ;;  %v1311_v21 = vld [vmem:[#allocation3 + $0x5f] sm:$0xff]  ;;  %vm4033_vm15 = vcmp.ne.s32.totalorder %v1024_v35, 0 }
 0x13e   : > { %3330 = vmatmul.mubr.msk.bf16.gmra.mrb[28].mxu1 %vm4804_vm1, %v4818_v10  ;;  %v4165_v9 = vld [vmem:[%s5267_s5 + $0x28] sm:$0xff]   ;;  %v4172_v18 = vld [vmem:[%s5267_s5 + $0x80] sm:$0xff]  }
 0x13f   : > { %1785 = vmatprep.mubr.bf16.mxu1 %v4655_v46  ;;  %3714 = vmatpush3.bf16.msra.mxu1 %v4181_v12  ;;  %v4188_v12 = vld [vmem:[%s5267_s5 + $0x1f8] sm:$0xff]   ;;  %v1312_v37 = vld [vmem:[#allocation3 + $0x67] sm:$0xff]  ;;  %v1313_v40 = vld [vmem:[#allocation3 + $0x6f] sm:$0xff] }
 0x140   : > { %3632 = vmatpush3.bf16.msra.mxu0 %v4161_v32  ;;  %v1373_v16 = vld [vmem:[#allocation3 + $0x71] sm:$0xff]  ;;  %3715 = vmatprep.subr.bf16.mxu1 %v4183_v7  ;;  %v1319_v43 = vld [vmem:[#allocation3 + $0x9f] sm:$0xff] }
 0x141   : > { %3633 = vmatprep.subr.bf16.mxu0 %v4162_v14  ;;  %v4865_v17 = vpack.c.bf16 %v1373_v16, %v1372_v36  ;;  %v4166_v32 = vld [vmem:[%s5267_s5 + $0x70] sm:$0xff]   ;;  %v4170_v16 = vld [vmem:[%s5267_s5 + $0x38] sm:$0xff]  }
 0x142   : > { %v1374_v39 = vld [vmem:[#allocation3 + $0x79] sm:$0xff]  ;;  %v1375_v63 = vld [vmem:[#allocation3 + $0x81] sm:$0xff]  ;;  %v1376_v7 = vld [vmem:[#allocation3 + $0x89] sm:$0xff] }
 0x143   : > { %3882 = vmatmul.mubr.msk.bf16.gmra.mrb[12].mxu0 %vm4844_vm6, %v4865_v17  ;;  %v4885_v1 = vpack.c.bf16 %v1375_v63, %v1374_v39  ;;  %3716 = vmatpush3.bf16.msra.mxu1 %v4184_v11  ;;  %v1377_v14 = vld [vmem:[#allocation3 + $0x91] sm:$0xff]  ;;  %v4177_v63 = vld [vmem:[%s5267_s5 + $0x88] sm:$0xff]   ;;  %v1315_v26 = vld [vmem:[#allocation3 + $0x7f] sm:$0xff] }
 0x144   : > { %3634 = vmatpush3.bf16.msra.mxu0 %v4163_v0  ;;  %3717 = vmatprep.subr.bf16.mxu1 %v4185_v13  ;;  %v4189_v0 = vld [vmem:[%s5267_s5 + $0x1b8] sm:$0xff]   ;;  %v4923_v22 = vpack.c.bf16 %v1377_v14, %v1376_v7  ;;  %v1301_v39 = vld [vmem:[#allocation3 + $0xf] sm:$0xff] }
 0x145   : > { %3885 = vmatprep.mubr.msk.bf16.mxu0 %vm4868_vm12, %v4885_v1  ;;  %3635 = vmatprep.subr.bf16.mxu0 %v4164_v38  ;;  %v1310_v11 = vld [vmem:[#allocation3 + $0x57] sm:$0xff]  ;;  %v1300_v38 = vld [vmem:[#allocation3 + $0x7] sm:$0xff]  ;;  %vm4959_vm12 = vmpackc.low %vm4244_vm3, %vm4042_vm2  ;;  %vm4044_vm2 = vcmp.ne.s32.totalorder %v1136_v30, 0 }
 0x146   : > { %3334 = vmatmul.mubr.msk.bf16.gmra.mrb[32].mxu1 %vm4878_vm13, %v4887_v57  ;;  %v4937_v36 = vpack.c.bf16 %v1311_v21, %v1310_v11  ;;  %v1317_v59 = vld [vmem:[#allocation3 + $0x8f] sm:$0xff]  ;;  %v4193_v30 = vld [vmem:[%s5267_s5 + $0xb8] sm:$0xff]  }
 0x147   : > { %1793 = vmatprep.mubr.bf16.mxu1 %v4739_v2  ;;  %3718 = vmatpush3.bf16.msra.mxu1 %v4186_v8 }
 0x148   : > { %3636 = vmatpush3.bf16.msra.mxu0 %v4165_v9  ;;  %3719 = vmatprep.subr.bf16.mxu1 %v4188_v12  ;;  %v4963_v9 = vpack.c.bf16 %v1313_v40, %v1312_v37  ;;  %v1314_v12 = vld [vmem:[#allocation3 + $0x77] sm:$0xff] }
 0x149   : > { %3637 = vmatprep.subr.bf16.mxu0 %v4166_v32  ;;  %v3345_v7 = vpack.c.bf16 %v1315_v26, %v1314_v12 }
 0x14b   : > { %3886 = vmatmul.mubr.msk.bf16.gmra.mrb[16].mxu0 %vm4916_vm7, %v4923_v22  ;;  %3720 = vmatpush3.bf16.msra.mxu1 %v4189_v0  ;;  %vm3384_vm7 = vmpackc.low %vm4244_vm3, %vm4033_vm15  ;;  %vm4043_vm15 = vcmp.ne.s32.totalorder %v1122_v28, 0  ;;  %v1316_v28 = vld [vmem:[#allocation3 + $0x87] sm:$0xff] }
 0x14c   : > { %3638 = vmatpush3.bf16.msra.mxu0 %v4167_v20  ;;  %2099 = vmatprep.mubr.bf16.mxu0 %v1420_v41  ;;  %v3385_v41 = vpack.c.bf16 %v1301_v39, %v1300_v38  ;;  %v3349_v0 = vpack.c.bf16 %v1317_v59, %v1316_v28 }
 0x14d   : > { %3639 = vmatprep.subr.bf16.mxu0 %v4168_v23 }
 0x14e   : > { %3338 = vmatmul.mubr.msk.bf16.gmra.mrb[36].mxu1 %vm4930_vm9, %v4937_v36 }
 0x14f   : > { %1801 = vmatprep.mubr.bf16.mxu1 %v4724_v45 }
 0x150   : > { %3640 = vmatpush3.bf16.msra.mxu0 %v4170_v16 }
 0x151   : > { %3889 = vmatprep.subr.bf16.mxu0 %v4172_v18 }
 0x153   : > { %3386 = vmatmul.mubr.msk.bf16.vlgmr.msra.gmra.mrb[20].mxu0 %vm3384_vm7, %v3385_v41  ;;  %vm4979_vm7 = vmpackc.low %vm4244_vm3, %vm4043_vm15 }
 0x154   : > { %3890 = vmatpush3.bf16.msra.mxu0 %v4172_v18  ;;  %2107 = vmatprep.mubr.bf16.mxu0 %v4631_v24  ;;  %v4187_v24 = vld [vmem:[%s5267_s5 + $0x98] sm:$0xff]  }
 0x155   : > { %3891 = vmatprep.subr.bf16.mxu0 %v4177_v63 }
 0x156   : > { %3342 = vmatmul.mubr.msk.bf16.gmra.mrb[40].mxu1 %vm4959_vm12, %v4963_v9 }
 0x157   : > { %1809 = vmatprep.mubr.bf16.mxu1 %v4822_v6 }
 0x158   : > { %3892 = vmatpush3.bf16.msra.mxu0 %v4177_v63 }
 0x159   : > { %3893 = vmatprep.subr.bf16.mxu0 %v4182_v25 }
 0x15b   : > { %3390 = vmatmul.mubr.msk.bf16.gmra.mrb[24].mxu0 %vm4648_vm5, %v4659_v49  ;;  %v4191_v49 = vld [vmem:[%s5267_s5 + $0xa8] sm:$0xff]   ;;  %vm4999_vm5 = vmpackc.low %vm4244_vm3, %vm4044_vm2 }
 0x15c   : > { %2115 = vmatprep.mubr.bf16.mxu0 %v4629_v5  ;;  %3894 = vmatpush3.bf16.msra.mxu0 %v4182_v25 }
 0x15d   : > { %3895 = vmatprep.subr.bf16.mxu0 %v4187_v24 }
 0x15e   : > { %3346 = vmatmul.mubr.msk.bf16.gmra.mrb[44].mxu1 %vm4979_vm7, %v3345_v7 }
 0x15f   : > { %1817 = vmatprep.mubr.bf16.mxu1 %v4811_v60 }
 0x160   : > { %3896 = vmatpush3.bf16.msra.mxu0 %v4187_v24 }
 0x161   : > { %3897 = vmatprep.subr.bf16.mxu0 %v4190_v27 }
 0x163   : > { %3394 = vmatmul.mubr.msk.bf16.gmra.mrb[28].mxu0 %vm4717_vm11, %v4731_v54 }
 0x164   : > { %2123 = vmatprep.mubr.bf16.mxu0 %v4663_v52  ;;  %3898 = vmatpush3.bf16.msra.mxu0 %v4190_v27 }
 0x165   : > { %3899 = vmatprep.subr.bf16.mxu0 %v4191_v49 }
 0x166   : > { %3350 = vmatmul.mubr.msk.bf16.gmra.mrb[48].mxu1 %vm4999_vm5, %v3349_v0 }
 0x167   : > { %2510 = vmatprep.mubr.bf16.mxu1 %v4629_v5  ;;  %v4194_v5 = vld [vmem:[%s5267_s5 + $0x200] sm:$0xff]  }
 0x168   : > { %3900 = vmatpush3.bf16.msra.mxu0 %v4191_v49 }
 0x169   : > { %3901 = vmatprep.subr.bf16.mxu0 %v4192_v29 }
 0x16b   : > { %3398 = vmatmul.mubr.msk.bf16.gmra.mrb[32].mxu0 %vm4804_vm1, %v4818_v10 }
 0x16c   : > { %2131 = vmatprep.mubr.bf16.mxu0 %v4655_v46  ;;  %3902 = vmatpush3.bf16.msra.mxu0 %v4192_v29 }
 0x16d   : > { %3903 = vmatprep.subr.bf16.mxu0 %v4193_v30 }
 0x16e   : > { %3450 = vmatmul.mubr.msk.bf16.vlgmr.msra.gmra.mrb[52].mxu1 %vm4717_vm11, %v4731_v54  ;;  %v1360_v54 = vld [vmem:[#allocation3 + $0x9] sm:$0xff] }
 0x16f   : > { %2518 = vmatprep.mubr.bf16.mxu1 %v4663_v52  ;;  %v1001_v52 = vadd.s32 8, %v4514_v56 }
 0x170   : > { %3904 = vmatpush3.bf16.msra.mxu0 %v4193_v30 }
 0x171   : > { %3921 = vmatprep.subr.bf16.mxu0 %v4194_v5  ;;  %v1031_v62 = vand.u32 15, %v1001_v52 }
 0x173   : > { %3402 = vmatmul.mubr.msk.bf16.gmra.mrb[36].mxu0 %vm4878_vm13, %v4887_v57  ;;  %vm4034_vm11 = vcmp.ne.s32.totalorder %v1031_v62, 15 }
 0x174   : > { %2139 = vmatprep.mubr.bf16.mxu0 %v4739_v2 }
 0x176   : > { %3454 = vmatmul.mubr.msk.bf16.gmra.mrb[56].mxu1 %vm4804_vm1, %v4818_v10  ;;  %vm3416_vm1 = vmpackc.low %vm4034_vm11, %vm4244_vm3  ;;  %v1018_v10 = vadd.s32 144, %v4514_v56 }
 0x177   : > { %2526 = vmatprep.mubr.bf16.mxu1 %v4655_v46  ;;  %v1361_v46 = vld [vmem:[#allocation3 + $0x11] sm:$0xff] }
 0x17b   : > { %3406 = vmatmul.mubr.msk.bf16.gmra.mrb[40].mxu0 %vm4930_vm9, %v4937_v36 }
 0x17c   : > { %2147 = vmatprep.mubr.bf16.mxu0 %v4724_v45 }
 0x17e   : > { %3458 = vmatmul.mubr.msk.bf16.gmra.mrb[60].mxu1 %vm4878_vm13, %v4887_v57  ;;  %v4199_v57 = vld [vmem:[%s5267_s5 + $0x228] sm:$0xff]   ;;  %vm5318_vm13 = vnez %v5305_v19 }
 0x17f   : > { %2534 = vmatprep.mubr.bf16.mxu1 %v4739_v2  ;;  %v3417_v2 = vpack.c.bf16 %v1361_v46, %v1360_v54 }
 0x183   : > { %3410 = vmatmul.mubr.msk.bf16.gmra.mrb[44].mxu0 %vm4959_vm12, %v4963_v9 }
 0x184   : > { %2155 = vmatprep.mubr.bf16.mxu0 %v4822_v6 }
 0x186   : > { %3462 = vmatmul.mubr.msk.bf16.gmra.mrb[64].mxu1 %vm4930_vm9, %v4937_v36 }
 0x187   : > { %2542 = vmatprep.mubr.bf16.mxu1 %v4724_v45  ;;  %v4195_v45 = vld [vmem:[%s5267_s5 + $0x208] sm:$0xff]  }
 0x18b   : > { %3414 = vmatmul.mubr.msk.bf16.gmra.mrb[48].mxu0 %vm4979_vm7, %v3345_v7 }
 0x18c   : > { %3905 = vmatprep.mubr.msk.bf16.mxu0 %vm3416_vm1, %v3417_v2 }
 0x18e   : > { %3466 = vmatmul.mubr.msk.bf16.gmra.mrb[68].mxu1 %vm4959_vm12, %v4963_v9 }
 0x18f   : > { %2550 = vmatprep.mubr.bf16.mxu1 %v4822_v6  ;;  %v1318_v6 = vld [vmem:[#allocation3 + $0x97] sm:$0xff] }
 0x190   : > { %v3477_v20 = vpack.c.bf16 %v1319_v43, %v1318_v6 }
 0x193   : > { %3906 = vmatmul.mubr.msk.bf16.vlgmr.msra.gmra.mrb[4].mxu0 %vm4642_vm4, %v4657_v48  ;;  %v1150_v48 = vand.u32 15, %v1018_v10 }
 0x194   : > { %3922 = vmatpush3.bf16.msra.mxu0 %v4194_v5  ;;  %3909 = vmatprep.mubr.msk.bf16.mxu0 %vm4683_vm8, %v4712_v58 }
 0x195   : > { %3923 = vmatprep.subr.bf16.mxu0 %v4195_v45  ;;  %vm4035_vm4 = vcmp.ne.s32.totalorder %v1150_v48, 0 }
 0x196   : > { %3470 = vmatmul.mubr.msk.bf16.gmra.mrb[72].mxu1 %vm4979_vm7, %v3345_v7  ;;  %vm3476_vm12 = vmpackc.low %vm4244_vm3, %vm4035_vm4 }
 0x197   : > { %2558 = vmatprep.mubr.bf16.mxu1 %v4811_v60  ;;  %v4198_v60 = vld [vmem:[%s5267_s5 + $0x220] sm:$0xff]  }
 0x198   : > { %3924 = vmatpush3.bf16.msra.mxu0 %v4195_v45 }
 0x199   : > { %3925 = vmatprep.subr.bf16.mxu0 %v4196_v55 }
 0x19b   : > { %3910 = vmatmul.mubr.msk.bf16.gmra.mrb[8].mxu0 %vm4703_vm10, %v4729_v53 }
 0x19c   : > { %3926 = vmatpush3.bf16.msra.mxu0 %v4196_v55  ;;  %3913 = vmatprep.mubr.msk.bf16.mxu0 %vm4770_vm14, %v4799_v44 }
 0x19d   : > { %3927 = vmatprep.subr.bf16.mxu0 %v4197_v42 }
 0x19e   : > { %3474 = vmatmul.mubr.msk.bf16.gmra.mrb[76].mxu1 %vm4999_vm5, %v3349_v0 }
 0x19f   : > { %2566 = vmatprep.mubr.bf16.mxu1 %v1429_v51  ;;  %v1019_v51 = vadd.s32 152, %v4514_v56 }
 0x1a0   : > { %3928 = vmatpush3.bf16.msra.mxu0 %v4197_v42 }
 0x1a1   : > { %3929 = vmatprep.subr.bf16.mxu0 %v4198_v60  ;;  %v1157_v3 = vand.u32 15, %v1019_v51 }
 0x1a3   : > { %3914 = vmatmul.mubr.msk.bf16.gmra.mrb[12].mxu0 %vm4787_vm0, %v4816_v31 }
 0x1a4   : > { %3930 = vmatpush3.bf16.msra.mxu0 %v4198_v60  ;;  %3917 = vmatprep.mubr.msk.bf16.mxu0 %vm4844_vm6, %v4865_v17 }
 0x1a5   : > { %3931 = vmatprep.subr.bf16.mxu0 %v4199_v57 }
 0x1a6   : > { %3478 = vmatmul.mubr.msk.bf16.gmra.mrb[80].mxu1 %vm3476_vm12, %v3477_v20 }
 0x1a8   : > { %3932 = vmatpush3.bf16.msra.mxu0 %v4199_v57 }
 0x1a9   : > { %3933 = vmatprep.subr.bf16.mxu0 %v4200_v47 }
 0x1ab   : > { %3918 = vmatmul.mubr.msk.bf16.gmra.mrb[16].mxu0 %vm5318_vm13, %v4885_v1 }
 0x1ac   : > { %3934 = vmatpush3.bf16.msra.mxu0 %v4200_v47  ;;  %3937 = vmatprep.mubr.msk.bf16.mxu0 %vm4683_vm8, %v4712_v58  ;;  %vm5319_vm8 = vnez %v5309_v4  ;;  %v1379_v58 = vld [vmem:[#allocation3 + $0xa1] sm:$0xff] }
 0x1ad   : > { %3935 = vmatprep.subr.bf16.mxu0 %v4201_v50 }
 0x1b0   : > { %3936 = vmatpush3.bf16.msra.mxu0 %v4201_v50 }
 0x1b3   : > { %3938 = vmatmul.mubr.msk.bf16.vlgmr.msra.gmra.mrb[4].mxu0 %vm4703_vm10, %v4729_v53  ;;  %vm4036_vm10 = vcmp.ne.s32.totalorder %v1157_v3, 15  ;;  %v3509_v53 = vpack.c.bf16 %v1379_v58, %v1378_v33 }
 0x1b4   : > { %3941 = vmatprep.mubr.msk.bf16.mxu0 %vm4770_vm14, %v4799_v44  ;;  %vm3508_vm14 = vmpackc.low %vm4036_vm10, %vm4244_vm3  ;;  %vm2848_vm3 = vcmask 1040384  }
 0x1bb   : > { %3942 = vmatmul.mubr.msk.bf16.gmra.mrb[8].mxu0 %vm4787_vm0, %v4816_v31  ;;  %vm2850_vm0 = vcmask 1041408  }
 0x1bc   : > { %3945 = vmatprep.mubr.msk.bf16.mxu0 %vm4844_vm6, %v4865_v17 }
 0x1c3   : > { %3946 = vmatmul.mubr.msk.bf16.gmra.mrb[12].mxu0 %vm5318_vm13, %v4885_v1 }
 0x1c4   : > { %3949 = vmatprep.mubr.msk.bf16.mxu0 %vm5319_vm8, %v4923_v22 }
 0x1cb   : > { %3950 = vmatmul.mubr.msk.bf16.gmra.mrb[16].mxu0 %vm3508_vm14, %v3509_v53 }
 0x201   : > { %v3561_v61 = vpop.f32.mrb[20].mxu1 }
 0x202   : > { %v3562_v34 = vpop.f32.mrb[21].mxu1 }
 0x203   : > { %v3563_v44 = vadd.f32 %v3562_v34, %v3561_v61  ;;  %v3564_v56 = vpop.f32.mrb[22].mxu1 }
 0x204   : > { %v3565_v31 = vpop.f32.mrb[23].mxu1 }
 0x205   : > { %v3566_v15 = vadd.f32 %v3565_v31, %v3564_v56 }
 0x209   : > { %v3567_v17 = vpop.f32.mrb[24].mxu1 }
 0x20a   : > { %v3568_v19 = vpop.f32.mrb[25].mxu1 }
 0x20b   : > { %v3569_v1 = vadd.f32 %v3568_v19, %v3567_v17  ;;  %v3570_v21 = vpop.f32.mrb[26].mxu1 }
 0x20c   : > { %v3571_v23 = vpop.f32.mrb[27].mxu1 }
 0x20d   : > { %v3572_v4 = vadd.f32 %v3571_v23, %v3570_v21 }
 0x211   : > { %v3573_v22 = vpop.f32.mrb[28].mxu1 }
 0x212   : > { %v3574_v35 = vpop.f32.mrb[29].mxu1 }
 0x213   : > { %v3575_v11 = vadd.f32 %v3574_v35, %v3573_v22  ;;  %v3576_v13 = vpop.f32.mrb[30].mxu1 }
 0x214   : > { %v3577_v36 = vpop.f32.mrb[31].mxu1 }
 0x215   : > { %v3578_v16 = vadd.f32 %v3577_v36, %v3576_v13 }
 0x219   : > { %v3579_v18 = vpop.f32.mrb[32].mxu1 }
 0x21a   : > { %v3580_v38 = vpop.f32.mrb[33].mxu1 }
 0x21b   : > { %v3581_v39 = vadd.f32 %v3580_v38, %v3579_v18  ;;  %v3582_v37 = vpop.f32.mrb[34].mxu1 }
 0x21c   : > { %v3583_v40 = vpop.f32.mrb[35].mxu1 }
 0x21d   : > { %v3584_v41 = vadd.f32 %v3583_v40, %v3582_v37 }
 0x221   : > { %v3585_v63 = vpop.f32.mrb[36].mxu1 }
 0x222   : > { %v3586_v8 = vpop.f32.mrb[37].mxu1 }
 0x223   : > { %v5134_v9 = vadd.f32 %v3586_v8, %v3585_v63  ;;  %v3588_v25 = vpop.f32.mrb[38].mxu1 }
 0x224   : > { %v3589_v26 = vpop.f32.mrb[39].mxu1 }
 0x225   : > { %v5136_v24 = vadd.f32 %v3589_v26, %v3588_v25 }
 0x226   : > { %v3641_v12 = vpop.f32.mrb[20].mxu0 }
 0x227   : > { %v3642_v32 = vpop.f32.mrb[21].mxu0 }
 0x228   : > { %v3643_v7 = vadd.f32 %v3642_v32, %v3641_v12  ;;  %v3644_v27 = vpop.f32.mrb[22].mxu0 }
 0x229   : > { %v3591_v28 = vpop.f32.mrb[40].mxu1  ;;  %v3645_v59 = vpop.f32.mrb[23].mxu0 }
 0x22a   : > { %v3592_v49 = vpop.f32.mrb[41].mxu1  ;;  %v3956_v14 = vadd.f32 %v3643_v7, %v3563_v44  ;;  %v3646_v0 = vadd.f32 %v3645_v59, %v3644_v27 }
 0x22b   : > { %v5138_v29 = vadd.f32 %v3592_v49, %v3591_v28  ;;  %v3594_v30 = vpop.f32.mrb[42].mxu1 }
 0x22c   : > { %v3595_v5 = vpop.f32.mrb[43].mxu1  ;;  %v3962_v52 = vadd.f32 %v3646_v0, %v3566_v15 }
 0x22d   : > { %v5140_v62 = vadd.f32 %v3595_v5, %v3594_v30 }
 0x22e   : > { %v3647_v46 = vpop.f32.mrb[24].mxu0 }
 0x22f   : > { %v3648_v54 = vpop.f32.mrb[25].mxu0 }
 0x230   : > { %v3649_v2 = vadd.f32 %v3648_v54, %v3647_v46  ;;  %v3650_v45 = vpop.f32.mrb[26].mxu0 }
 0x231   : > { %v3597_v55 = vpop.f32.mrb[44].mxu1  ;;  %v3651_v10 = vpop.f32.mrb[27].mxu0 }
 0x232   : > { %v3598_v42 = vpop.f32.mrb[45].mxu1  ;;  %v3953_v48 = vadd.f32 %v3649_v2, %v3569_v1  ;;  %v3652_v60 = vadd.f32 %v3651_v10, %v3650_v45 }
 0x233   : > { %v5142_v6 = vadd.f32 %v3598_v42, %v3597_v55  ;;  %v3600_v43 = vpop.f32.mrb[46].mxu1 }
 0x234   : > { %v3601_v57 = vpop.f32.mrb[47].mxu1  ;;  %v3959_v20 = vadd.f32 %v3652_v60, %v3572_v4 }
 0x235   : > { %v5144_v47 = vadd.f32 %v3601_v57, %v3600_v43 }
 0x236   : > { %v3653_v50 = vpop.f32.mrb[28].mxu0 }
 0x237   : > { %v3654_v51 = vpop.f32.mrb[29].mxu0 }
 0x238   : > { %v3655_v3 = vadd.f32 %v3654_v51, %v3653_v50  ;;  %v3656_v33 = vpop.f32.mrb[30].mxu0 }
 0x239   : > { %v3603_v58 = vpop.f32.mrb[48].mxu1  ;;  %v3657_v53 = vpop.f32.mrb[31].mxu0 }
 0x23a   : > { %v3604_v61 = vpop.f32.mrb[49].mxu1  ;;  %v3968_v34 = vadd.f32 %v3655_v3, %v3575_v11  ;;  %v3658_v44 = vadd.f32 %v3657_v53, %v3656_v33 }
 0x23b   : > { %v5146_v56 = vadd.f32 %v3604_v61, %v3603_v58  ;;  %v3606_v31 = vpop.f32.mrb[50].mxu1 }
 0x23c   : > { %v3607_v15 = vpop.f32.mrb[51].mxu1  ;;  %v3974_v17 = vadd.f32 %v3658_v44, %v3578_v16 }
 0x23d   : > { %v5148_v19 = vadd.f32 %v3607_v15, %v3606_v31 }
 0x23e   : > { %v3659_v1 = vpop.f32.mrb[32].mxu0 }
 0x23f   : > { %v3660_v21 = vpop.f32.mrb[33].mxu0 }
 0x240   : > { %v3661_v23 = vadd.f32 %v3660_v21, %v3659_v1  ;;  %v3662_v4 = vpop.f32.mrb[34].mxu0 }
 0x241   : > { %v3721_v22 = vpop.f32.mrb[52].mxu1  ;;  %v3663_v35 = vpop.f32.mrb[35].mxu0 }
 0x242   : > { %v3722_v13 = vpop.f32.mrb[53].mxu1  ;;  %v3965_v36 = vadd.f32 %v3661_v23, %v3581_v39  ;;  %v3664_v18 = vadd.f32 %v3663_v35, %v3662_v4 }
 0x243   : > { %v3723_v38 = vadd.f32 %v3722_v13, %v3721_v22  ;;  %v3724_v37 = vpop.f32.mrb[54].mxu1 }
 0x244   : > { %v3725_v11 = vpop.f32.mrb[55].mxu1  ;;  %v3971_v40 = vadd.f32 %v3664_v18, %v3584_v41 }
 0x245   : > { %v3726_v63 = vadd.f32 %v3725_v11, %v3724_v37  ;;  %v5150_v8 = vadd.f32 %v3956_v14, %v3723_v38 }
 0x246   : > { %v3665_v25 = vpop.f32.mrb[36].mxu0 }
 0x247   : > { %v5152_v16 = vadd.f32 %v3962_v52, %v3726_v63  ;;  %v3666_v26 = vpop.f32.mrb[37].mxu0 }
 0x248   : > { %v3667_v12 = vadd.f32 %v3666_v26, %v3665_v25  ;;  %v3668_v32 = vpop.f32.mrb[38].mxu0 }
 0x249   : > { %v3727_v7 = vpop.f32.mrb[56].mxu1  ;;  %v3669_v27 = vpop.f32.mrb[39].mxu0 }
 0x24a   : > { %v3728_v28 = vpop.f32.mrb[57].mxu1  ;;  %v3980_v59 = vadd.f32 %v3667_v12, %v5134_v9  ;;  %v3670_v39 = vadd.f32 %v3669_v27, %v3668_v32 }
 0x24b   : > { %v3729_v49 = vadd.f32 %v3728_v28, %v3727_v7  ;;  %v3730_v0 = vpop.f32.mrb[58].mxu1 }
 0x24c   : > { %v3731_v30 = vpop.f32.mrb[59].mxu1  ;;  %v3986_v41 = vadd.f32 %v3670_v39, %v5136_v24 }
 0x24d   : > { %v3732_v5 = vadd.f32 %v3731_v30, %v3730_v0  ;;  %v5156_v14 = vadd.f32 %v3953_v48, %v3729_v49 }
 0x24e   : > { %v3671_v46 = vpop.f32.mrb[40].mxu0 }
 0x24f   : > { %v5158_v52 = vadd.f32 %v3959_v20, %v3732_v5  ;;  %v3672_v54 = vpop.f32.mrb[41].mxu0 }
 0x250   : > { %v3673_v2 = vadd.f32 %v3672_v54, %v3671_v46  ;;  %v3674_v45 = vpop.f32.mrb[42].mxu0 }
 0x251   : > { %v3733_v55 = vpop.f32.mrb[60].mxu1  ;;  %v3675_v10 = vpop.f32.mrb[43].mxu0 }
 0x252   : > { %v3734_v42 = vpop.f32.mrb[61].mxu1  ;;  %v3977_v9 = vadd.f32 %v3673_v2, %v5138_v29  ;;  %v3676_v60 = vadd.f32 %v3675_v10, %v3674_v45 }
 0x253   : > { %v3735_v43 = vadd.f32 %v3734_v42, %v3733_v55  ;;  %v3736_v57 = vpop.f32.mrb[62].mxu1 }
 0x254   : > { %v3737_v50 = vpop.f32.mrb[63].mxu1  ;;  %v3983_v24 = vadd.f32 %v3676_v60, %v5140_v62 }
 0x255   : > { %v3738_v51 = vadd.f32 %v3737_v50, %v3736_v57  ;;  %v5162_v48 = vadd.f32 %v3968_v34, %v3735_v43 }
 0x256   : > { %v3677_v3 = vpop.f32.mrb[44].mxu0 }
 0x257   : > { %v5164_v20 = vadd.f32 %v3974_v17, %v3738_v51  ;;  %v3678_v33 = vpop.f32.mrb[45].mxu0  ;;  %v5193_v51 = vld [vmem:[%s5268_s6] ss:$0 sm:$0xff] }
 0x258   : > { %v3679_v58 = vadd.f32 %v3678_v33, %v3677_v3  ;;  %v3680_v53 = vpop.f32.mrb[46].mxu0 }
 0x259   : > { %v3739_v61 = vpop.f32.mrb[64].mxu1  ;;  %v3681_v44 = vpop.f32.mrb[47].mxu0 }
 0x25a   : > { %v3740_v31 = vpop.f32.mrb[65].mxu1  ;;  %v3992_v29 = vadd.f32 %v3679_v58, %v5142_v6  ;;  %v3682_v15 = vadd.f32 %v3681_v44, %v3680_v53 }
 0x25b   : > { %v3741_v1 = vadd.f32 %v3740_v31, %v3739_v61  ;;  %v3742_v21 = vpop.f32.mrb[66].mxu1 }
 0x25c   : > { %v3743_v23 = vpop.f32.mrb[67].mxu1  ;;  %v3998_v62 = vadd.f32 %v3682_v15, %v5144_v47 }
 0x25d   : > { %v3744_v4 = vadd.f32 %v3743_v23, %v3742_v21  ;;  %v5168_v34 = vadd.f32 %v3965_v36, %v3741_v1 }
 0x25e   : > { %v3683_v22 = vpop.f32.mrb[48].mxu0 }
 0x25f   : > { %v5170_v17 = vadd.f32 %v3971_v40, %v3744_v4  ;;  %v3684_v35 = vpop.f32.mrb[49].mxu0 }
 0x260   : > { %v3685_v13 = vadd.f32 %v3684_v35, %v3683_v22  ;;  %v3686_v18 = vpop.f32.mrb[50].mxu0 }
 0x261   : > { %v3745_v38 = vpop.f32.mrb[68].mxu1  ;;  %v3687_v37 = vpop.f32.mrb[51].mxu0 }
 0x262   : > { %v3746_v11 = vpop.f32.mrb[69].mxu1  ;;  %v3989_v6 = vadd.f32 %v3685_v13, %v5146_v56  ;;  %v3688_v63 = vadd.f32 %v3687_v37, %v3686_v18 }
 0x263   : > { %v3747_v25 = vadd.f32 %v3746_v11, %v3745_v38  ;;  %v3748_v26 = vpop.f32.mrb[70].mxu1 }
 0x264   : > { %v3749_v12 = vpop.f32.mrb[71].mxu1  ;;  %v3995_v47 = vadd.f32 %v3688_v63, %v5148_v19 }
 0x265   : > { %v3750_v32 = vadd.f32 %v3749_v12, %v3748_v26  ;;  %v5174_v36 = vadd.f32 %v3980_v59, %v3747_v25 }
 0x267   : > { %v5176_v7 = vadd.f32 %v3986_v41, %v3750_v32 }
 0x269   : > { %v3751_v40 = vpop.f32.mrb[72].mxu1 }
 0x26a   : > { %v3752_v27 = vpop.f32.mrb[73].mxu1 }
 0x26b   : > { %v3753_v28 = vadd.f32 %v3752_v27, %v3751_v40  ;;  %v3754_v39 = vpop.f32.mrb[74].mxu1 }
 0x26c   : > { %v3755_v49 = vpop.f32.mrb[75].mxu1 }
 0x26d   : > { %v3756_v0 = vadd.f32 %v3755_v49, %v3754_v39  ;;  %v5178_v30 = vadd.f32 %v3977_v9, %v3753_v28 }
 0x26f   : > { %v5180_v56 = vadd.f32 %v3983_v24, %v3756_v0 }
 0x271   : > { %v3757_v5 = vpop.f32.mrb[76].mxu1 }
 0x272   : > { %v3758_v46 = vpop.f32.mrb[77].mxu1 }
 0x273   : > { %v3759_v54 = vadd.f32 %v3758_v46, %v3757_v5  ;;  %v3760_v2 = vpop.f32.mrb[78].mxu1 }
 0x274   : > { %v3761_v19 = vpop.f32.mrb[79].mxu1 }
 0x275   : > { %v3762_v45 = vadd.f32 %v3761_v19, %v3760_v2  ;;  %v5182_v59 = vadd.f32 %v3992_v29, %v3759_v54 }
 0x277   : > { %v5184_v41 = vadd.f32 %v3998_v62, %v3762_v45 }
 0x279   : > { %v3763_v55 = vpop.f32.mrb[80].mxu1 }
 0x27a   : > { %v3764_v10 = vpop.f32.mrb[81].mxu1 }
 0x27b   : > { %v3765_v42 = vadd.f32 %v3764_v10, %v3763_v55  ;;  %v3766_v60 = vpop.f32.mrb[82].mxu1 }
 0x27c   : > { %v3767_v43 = vpop.f32.mrb[83].mxu1 }
 0x27d   : > { %v3768_v9 = vadd.f32 %v3767_v43, %v3766_v60  ;;  %v5186_v57 = vadd.f32 %v3989_v6, %v3765_v42 }
 0x27f   : > { %v5188_v50 = vadd.f32 %v3995_v47, %v3768_v9 }
 0x286   : > { %v3939_v24 = vpop.f32.mrb[4].mxu0 }
 0x287   : > { %v3955_v3 = vadd.f32 %v5156_v14, %v3939_v24  ;;  %v2609_v33 = vpop.f32.mrb[5].mxu0 }
 0x288   : > { %v3958_v58 = vadd.f32 %v5150_v8, %v2609_v33  ;;  %v3940_v53 = vpop.f32.mrb[6].mxu0 }
 0x289   : > { %v3961_v61 = vadd.f32 %v5158_v52, %v3940_v53  ;;  %v2612_v44 = vpop.f32.mrb[7].mxu0  ;;  %v2696_v15 = vadd.f32 %v3955_v3, %v5193_v51 }
 0x28a   : > { %v2694_v31 = vadd.f32 %v3958_v58, %v5193_v51  ;;  %v3964_v29 = vadd.f32 %v5152_v16, %v2612_v44 }
 0x28b   : > { %v2697_v1 = vadd.f32 %v3961_v61, %v5193_v51  ;;  %v2813_v35 = vmul.f32 %v2696_v15, %v2696_v15 }
 0x28c   : > { %v2695_v8 = vadd.f32 %v3964_v29, %v5193_v51  ;;  %v2811_v52 = vmul.f32 %v2694_v31, %v2694_v31 }
 0x28d   : > { %v3280_v14 = vpack.c.bf16 %v2697_v1, %v2696_v15  ;;  %v2814_v11 = vmul.f32 %v2697_v1, %v2697_v1 }
 0x28e   : > { %v3275_v21 = vpack.c.bf16 %v2695_v8, %v2694_v31  ;;  %v2790_v23 = vadd.f32 %v2695_v8, %v2694_v31  ;;  %v2812_v62 = vmul.f32 %v2695_v8, %v2695_v8  ;;  %v3943_v16 = vpop.f32.mrb[8].mxu0 }
 0x28f   : > { %3312 = vst [vmem:[%s5207_s12 + $0x8] sm:$0xff] %v3280_v14   ;;  %v3967_v4 = vadd.f32 %v5168_v34, %v3943_v16  ;;  %v2625_v22 = vpop.f32.mrb[9].mxu0 }
 0x290   : > { %3276 = vst [vmem:[%s5207_s12] sm:$0xff] %v3275_v21   ;;  %v2791_v13 = vadd.f32 %v2790_v23, %v2696_v15  ;;  %v2827_v18 = vadd.f32 %v2812_v62, %v2811_v52  ;;  %v3970_v38 = vadd.f32 %v5162_v48, %v2625_v22  ;;  %v3944_v37 = vpop.f32.mrb[10].mxu0 }
 0x291   : > { %v3973_v6 = vadd.f32 %v5170_v17, %v3944_v37  ;;  %v2628_v63 = vpop.f32.mrb[11].mxu0  ;;  %v2700_v34 = vadd.f32 %v3967_v4, %v5193_v51 }
 0x292   : > { %v2828_v25 = vadd.f32 %v2827_v18, %v2813_v35  ;;  %v2698_v26 = vadd.f32 %v3970_v38, %v5193_v51  ;;  %v2792_v12 = vadd.f32 %v2791_v13, %v2697_v1  ;;  %v3976_v47 = vadd.f32 %v5164_v20, %v2628_v63 }
 0x293   : > { %v2701_v32 = vadd.f32 %v3973_v6, %v5193_v51  ;;  %v2817_v2 = vmul.f32 %v2700_v34, %v2700_v34 }
 0x294   : > { %v2793_v40 = vadd.f32 %v2792_v12, %v2698_v26  ;;  %v2815_v27 = vmul.f32 %v2698_v26, %v2698_v26  ;;  %v2829_v48 = vadd.f32 %v2828_v25, %v2814_v11  ;;  %v2699_v28 = vadd.f32 %v3976_v47, %v5193_v51 }
 0x295   : > { %v3290_v39 = vpack.c.bf16 %v2701_v32, %v2700_v34  ;;  %v2818_v42 = vmul.f32 %v2701_v32, %v2701_v32 }
 0x296   : > { %v2830_v17 = vadd.f32 %v2829_v48, %v2815_v27  ;;  %v3285_v49 = vpack.c.bf16 %v2699_v28, %v2698_v26  ;;  %v2794_v0 = vadd.f32 %v2793_v40, %v2699_v28  ;;  %v2816_v5 = vmul.f32 %v2699_v28, %v2699_v28  ;;  %v3947_v46 = vpop.f32.mrb[12].mxu0 }
 0x297   : > { %3314 = vst [vmem:[%s5207_s12 + $0x18] sm:$0xff] %v3290_v39   ;;  %v3979_v54 = vadd.f32 %v5178_v30, %v3947_v46  ;;  %v2641_v20 = vpop.f32.mrb[13].mxu0 }
 0x298   : > { %3313 = vst [vmem:[%s5207_s12 + $0x10] sm:$0xff] %v3285_v49   ;;  %v2795_v19 = vadd.f32 %v2794_v0, %v2700_v34  ;;  %v2831_v45 = vadd.f32 %v2830_v17, %v2816_v5  ;;  %v3982_v55 = vadd.f32 %v5174_v36, %v2641_v20  ;;  %v3948_v10 = vpop.f32.mrb[14].mxu0 }
 0x299   : > { %v3985_v60 = vadd.f32 %v5180_v56, %v3948_v10  ;;  %v2644_v43 = vpop.f32.mrb[15].mxu0  ;;  %v2704_v30 = vadd.f32 %v3979_v54, %v5193_v51 }
 0x29a   : > { %v2832_v9 = vadd.f32 %v2831_v45, %v2817_v2  ;;  %v2702_v24 = vadd.f32 %v3982_v55, %v5193_v51  ;;  %v2796_v3 = vadd.f32 %v2795_v19, %v2701_v32  ;;  %v3988_v33 = vadd.f32 %v5176_v7, %v2644_v43 }
 0x29b   : > { %v2705_v58 = vadd.f32 %v3985_v60, %v5193_v51  ;;  %v2821_v52 = vmul.f32 %v2704_v30, %v2704_v30 }
 0x29c   : > { %v2797_v53 = vadd.f32 %v2796_v3, %v2702_v24  ;;  %v2819_v61 = vmul.f32 %v2702_v24, %v2702_v24  ;;  %v2833_v36 = vadd.f32 %v2832_v9, %v2818_v42  ;;  %v2703_v44 = vadd.f32 %v3988_v33, %v5193_v51 }
 0x29d   : > { %v3300_v31 = vpack.c.bf16 %v2705_v58, %v2704_v30  ;;  %v2822_v4 = vmul.f32 %v2705_v58, %v2705_v58 }
 0x29e   : > { %v2834_v56 = vadd.f32 %v2833_v36, %v2819_v61  ;;  %v3295_v29 = vpack.c.bf16 %v2703_v44, %v2702_v24  ;;  %v2798_v15 = vadd.f32 %v2797_v53, %v2703_v44  ;;  %v2820_v1 = vmul.f32 %v2703_v44, %v2703_v44  ;;  %v3951_v8 = vpop.f32.mrb[16].mxu0 }
 0x29f   : > { %3316 = vst [vmem:[%s5207_s12 + $0x28] sm:$0xff] %v3300_v31   ;;  %v3991_v14 = vadd.f32 %v5186_v57, %v3951_v8  ;;  %v2657_v7 = vpop.f32.mrb[17].mxu0 }
 0x2a0   : > { %3315 = vst [vmem:[%s5207_s12 + $0x20] sm:$0xff] %v3295_v29   ;;  %v2799_v21 = vadd.f32 %v2798_v15, %v2704_v30  ;;  %v2835_v23 = vadd.f32 %v2834_v56, %v2820_v1  ;;  %v3994_v62 = vadd.f32 %v5182_v59, %v2657_v7  ;;  %v3952_v16 = vpop.f32.mrb[18].mxu0 }
 0x2a1   : > { %v3997_v22 = vadd.f32 %v5188_v50, %v3952_v16  ;;  %v2660_v35 = vpop.f32.mrb[19].mxu0  ;;  %v2708_v37 = vadd.f32 %v3991_v14, %v5193_v51 }
 0x2a2   : > { %v2836_v13 = vadd.f32 %v2835_v23, %v2821_v52  ;;  %v2706_v18 = vadd.f32 %v3994_v62, %v5193_v51  ;;  %v2800_v38 = vadd.f32 %v2799_v21, %v2705_v58  ;;  %v4000_v57 = vadd.f32 %v5184_v41, %v2660_v35 }
 0x2a3   : > { %v2709_v11 = vadd.f32 %v3997_v22, %v5193_v51  ;;  %v2825_v32 = vmul.f32 %v2708_v37, %v2708_v37 }
 0x2a4   : > { %v2801_v6 = vadd.f32 %v2800_v38, %v2706_v18  ;;  %v2823_v63 = vmul.f32 %v2706_v18, %v2706_v18  ;;  %v2837_v59 = vadd.f32 %v2836_v13, %v2822_v4  ;;  %v2707_v25 = vadd.f32 %v4000_v57, %v5193_v51 }
 0x2a5   : > { %v3310_v50 = vpack.c.bf16 %v2709_v11, %v2708_v37  ;;  %v2826_v27 = vmul.f32 %v2709_v11, %v2709_v11 }
 0x2a6   : > { %v2838_v26 = vadd.f32 %v2837_v59, %v2823_v63  ;;  %v3305_v12 = vpack.c.bf16 %v2707_v25, %v2706_v18  ;;  %v2802_v47 = vadd.f32 %v2801_v6, %v2707_v25  ;;  %v2824_v34 = vmul.f32 %v2707_v25, %v2707_v25 }
 0x2a7   : > { %3318 = vst [vmem:[%s5207_s12 + $0x38] sm:$0xff] %v3310_v50  }
 0x2a8   : > { %3317 = vst [vmem:[%s5207_s12 + $0x30] sm:$0xff] %v3305_v12   ;;  %v2803_v41 = vadd.f32 %v2802_v47, %v2708_v37  ;;  %v2839_v40 = vadd.f32 %v2838_v26, %v2824_v34 }
 0x2aa   : > { %v2804_v48 = vadd.f32 %v2803_v41, %v2709_v11  ;;  %v2840_v28 = vadd.f32 %v2839_v40, %v2825_v32 }
 0x2ac   : > { %v2805_v39 = vrot.slane %v2804_v48, 4  ;;  %v2841_v17 = vadd.f32 %v2840_v28, %v2826_v27 }
 0x2ae   : > { %v2806_v49 = vadd.f32 %v2805_v39, %v2804_v48  ;;  %v2842_v51 = vrot.slane %v2841_v17, 4 }
 0x2b0   : > { %v2807_v0 = vrot.slane %v2806_v49, 2  ;;  %v2843_v5 = vadd.f32 %v2842_v51, %v2841_v17 }
 0x2b2   : > { %v2808_v46 = vadd.f32 %v2807_v0, %v2806_v49  ;;  %v2844_v54 = vrot.slane %v2843_v5, 2 }
 0x2b4   : > { %v2809_v20 = vrot.slane %v2808_v46, 1  ;;  %v2845_v2 = vadd.f32 %v2844_v54, %v2843_v5 }
 0x2b6   : > { %v2846_v19 = vrot.slane %v2845_v2, 1  ;;  %v2810_v45 = vadd.f32 %v2809_v20, %v2808_v46 }
 0x2b8   : > { %v2847_v55 = vadd.f32 %v2846_v19, %v2845_v2 }
 0x2ba   : > { %v2849_v10 = vsel %vm2848_vm3, %v2810_v45, %v2847_v55 }
 0x2bb   : > { %v2851_v42 = vsel %vm2850_vm0, %v2849_v10, 0.0 }
 0x2bc   : > { %2852 = vst [vmem:[%s491_s27] sm:$0xff] %v2851_v42 }
 0x2bd PF: > { %s19_s9 = sadd.s32 1, %s4240_s9   ;;  %s5320_s27 = smov %s4232_s29 }
 0x2be   : > { %p16_p13 = scmp.ge.s32.totalorder %s19_s9, 6   ;;  %s5321_s28 = smov %s4236_s30 }
 0x2bf   : > { %s5322_s29 = smov %s5325_s10  ;;  %s5323_s30 = smov %s5329_s11 }
 0x2c0   :  { %18 = sbr.rel (!%p16_p13) target bundleno = 3 (0x3), region = 98 }

</bundles_post_ra>
